<compile_context>
chip_gen: v6e
topology: v6e:2x2x1
jax: 0.10.0
libtpu: 0.0.40
codegen_flags: <defaults>
</compile_context>

<pallas_src>
import functools

import jax
import jax.numpy as jnp
from jax import lax
from jax.experimental import pallas as pl
from jax.experimental.pallas import tpu as pltpu


def _round_up(x, m):
    return ((x + m - 1) // m) * m


def _vmem_limit_bytes():
    # Per-generation scoped-VMEM budget: ~3/4 of physical VMEM (v5e/v6e:
    # 128 MiB -> 96 MiB, v7x: 64 MiB -> 48 MiB), capped at 100 MiB.
    try:
        cap = pltpu.get_tpu_info().vmem_capacity_bytes
        return int(min(cap * 3 // 4, 100 * 1024 * 1024))
    except Exception:
        return 48 * 1024 * 1024


# ----------------------------------------------------------------------------
# In-kernel helpers
# ----------------------------------------------------------------------------
def _layernorm(v, w, b, eps):
    # v: (rows, D); w, b: (1, D)
    mu = jnp.mean(v, axis=-1, keepdims=True)
    var = jnp.mean((v - mu) ** 2, axis=-1, keepdims=True)
    return (v - mu) * lax.rsqrt(var + eps) * w + b


def _gelu(x):
    # tanh-approximate GELU (GPT2 style)
    c = jnp.float32(0.7978845608028654)  # sqrt(2/pi)
    return 0.5 * x * (1.0 + jnp.tanh(c * (x + 0.044715 * x * x * x)))


# ----------------------------------------------------------------------------
# Pallas kernel: one GPT2 decoder block, per (batch, q-row-tile) grid cell
# ----------------------------------------------------------------------------
def gpt2_block_kernel(xq_ref, xkv_ref, ln1w, ln1b, wq, bq, wkv, bkv, wo, bo,
                      ln2w, ln2b, w1, b1, w2, b2, out_ref,
                      *, num_heads, eps, q_tile):
    f32, bf16 = jnp.float32, jnp.bfloat16
    H = num_heads

    xq = xq_ref[0].astype(f32)            # (tq, D)  query rows of this tile
    xkv = xkv_ref[0].astype(f32)          # (S,  D)  full sequence (K/V source)
    tq, D = xq.shape
    S = xkv.shape[0]
    Dh = D // H
    scale = f32(1.0 / (Dh ** 0.5))

    # ---- LayerNorm1 (pre-norm; reference adds the *normalized* x residually) ----
    xn_q = _layernorm(xq, ln1w[...], ln1b[...], eps)       # (tq, D)
    xn_kv = _layernorm(xkv, ln1w[...], ln1b[...], eps)     # (S, D)

    # ---- projections: bf16 MXU inputs, f32 accumulation ----
    q = jnp.dot(xn_q.astype(bf16), wq[...], preferred_element_type=f32) + bq[...]      # (tq, D)
    kv = jnp.dot(xn_kv.astype(bf16), wkv[...], preferred_element_type=f32) + bkv[...]  # (S, 2D)
    k = kv[:, :D]
    v = kv[:, D:]

    # ---- head-batched causal attention ----
    # Heads split with static lane slices + leading-axis stack (robust Mosaic
    # lowering); outputs re-merged IN REGISTERS with a lane concatenate, so
    # there is no VMEM scratch round-trip / masked partial store.
    q3 = jnp.stack([q[:, h * Dh:(h + 1) * Dh] for h in range(H)], axis=0).astype(bf16)  # (H,tq,Dh)
    k3 = jnp.stack([k[:, h * Dh:(h + 1) * Dh] for h in range(H)], axis=0).astype(bf16)  # (H,S,Dh)
    v3 = jnp.stack([v[:, h * Dh:(h + 1) * Dh] for h in range(H)], axis=0).astype(bf16)  # (H,S,Dh)

    q0 = pl.program_id(1) * q_tile                                   # global row offset
    row = q0 + lax.broadcasted_iota(jnp.int32, (tq, S), 0)
    col = lax.broadcasted_iota(jnp.int32, (tq, S), 1)
    causal = (col <= row)[None, :, :]                                # (1, tq, S)

    s = jnp.einsum("hqd,hkd->hqk", q3, k3, preferred_element_type=f32) * scale  # (H,tq,S)
    s = jnp.where(causal, s, f32(-1e30))                             # softmax in f32
    s = s - jnp.max(s, axis=-1, keepdims=True)
    p = jnp.exp(s)
    p = p * pl.reciprocal(jnp.sum(p, axis=-1, keepdims=True), approx=True)
    o3 = jnp.einsum("hqk,hkd->hqd", p.astype(bf16), v3, preferred_element_type=f32)  # (H,tq,Dh)

    ctx = jnp.concatenate([o3[h] for h in range(H)], axis=-1).astype(bf16)            # (tq, D)
    mha = jnp.dot(ctx, wo[...], preferred_element_type=f32) + bo[...]                 # (tq, D)

    # ---- residual (with normalized x, per reference) + LayerNorm2 ----
    skip = _layernorm(xn_q + mha, ln2w[...], ln2b[...], eps)

    # ---- position-wise FFN (dropout_ffn is identity in eval) ----
    h1 = _gelu(jnp.dot(skip.astype(bf16), w1[...], preferred_element_type=f32) + b1[...])  # (tq, F)
    ffn = jnp.dot(h1.astype(bf16), w2[...], preferred_element_type=f32) + b2[...]          # (tq, D)

    out_ref[0] = (skip + ffn).astype(out_ref.dtype)


# ----------------------------------------------------------------------------
# Pallas kernel: final LayerNorm + LM head, tiled over vocab (LN cached)
# ----------------------------------------------------------------------------
def lm_head_kernel(x_ref, lnw, lnb, fcw, fcb, out_ref, xn_scratch, *, eps):
    # Final LayerNorm computed once per batch element and cached in VMEM
    # across all vocab tiles (innermost grid axis).
    @pl.when(pl.program_id(1) == 0)
    def _():
        xn = _layernorm(x_ref[0].astype(jnp.float32), lnw[...], lnb[...], eps)
        xn_scratch[...] = xn.astype(xn_scratch.dtype)

    logits = jnp.dot(xn_scratch[...], fcw[...],
                     preferred_element_type=jnp.float32) + fcb[...]   # (S, tn)
    out_ref[0] = logits.astype(out_ref.dtype)


# ----------------------------------------------------------------------------
# Wrappers (pallas_call plumbing)
# ----------------------------------------------------------------------------
_BLOCK_WEIGHT_NAMES = ("ln1w", "ln1b", "wq", "bq", "wkv", "bkv", "wo", "bo",
                       "ln2w", "ln2b", "w1", "b1", "w2", "b2")


def _const_spec(shape, buffered):
    # Constant block index across the whole grid -> a single VMEM buffer is
    # enough (no re-DMA ever happens); default double-buffering would reserve
    # 2x the weight footprint.
    if buffered:
        return pl.BlockSpec(shape, lambda b, j: (0, 0), pipeline_mode=pl.Buffered(1))
    return pl.BlockSpec(shape, lambda b, j: (0, 0))


def gpt2_block(x, lp, num_heads, eps, vmem_limit, buffered_weights):
    B, S, D = x.shape
    weights = [lp[n] for n in _BLOCK_WEIGHT_NAMES]

    # Row (M) tile for the MXU: whole sequence when short, else 256-row tiles.
    tq = 256 if (S > 256 and S % 256 == 0) else S
    grid = (B, S // tq)

    in_specs = [
        pl.BlockSpec((1, tq, D), lambda b, q: (b, q, 0)),   # q-row tile
        pl.BlockSpec((1, S, D), lambda b, q: (b, 0, 0)),    # full sequence for K/V
    ]
    in_specs += [_const_spec(w.shape, buffered_weights) for w in weights]

    return pl.pallas_call(
        functools.partial(gpt2_block_kernel, num_heads=num_heads, eps=eps, q_tile=tq),
        grid_spec=pltpu.PrefetchScalarGridSpec(
            num_scalar_prefetch=0,
            grid=grid,
            in_specs=in_specs,
            out_specs=pl.BlockSpec((1, tq, D), lambda b, q: (b, q, 0)),
        ),
        out_shape=jax.ShapeDtypeStruct((B, S, D), jnp.bfloat16),   # bf16 residual stream
        compiler_params=pltpu.CompilerParams(
            dimension_semantics=("parallel", "parallel"),
            vmem_limit_bytes=vmem_limit),
    )(x, x, *weights)


def lm_head(x, lnw, lnb, fcw, fcb, eps, vmem_limit, buffered_weights):
    B, S, D = x.shape
    V = fcw.shape[1]
    # 512-wide lane-dense vocab tiles (memory-bound weight stream); pad V up
    # to a tile multiple and slice the logits back afterwards.
    tn = 512 if V >= 512 else _round_up(V, 128)
    Vp = _round_up(V, tn)
    if Vp != V:
        fcw = jnp.pad(fcw, ((0, 0), (0, Vp - V)))
        fcb = jnp.pad(fcb, ((0, 0), (0, Vp - V)))

    in_specs = [
        pl.BlockSpec((1, S, D), lambda b, j: (b, 0, 0)),
        _const_spec(lnw.shape, buffered_weights),
        _const_spec(lnb.shape, buffered_weights),
        pl.BlockSpec((D, tn), lambda b, j: (0, j)),     # stream the (D, V) head weight
        pl.BlockSpec((1, tn), lambda b, j: (0, j)),
    ]
    logits = pl.pallas_call(
        functools.partial(lm_head_kernel, eps=eps),
        grid_spec=pltpu.PrefetchScalarGridSpec(
            num_scalar_prefetch=0,
            grid=(B, Vp // tn),
            in_specs=in_specs,
            out_specs=pl.BlockSpec((1, S, tn), lambda b, j: (b, 0, j)),
            scratch_shapes=[pltpu.VMEM((S, D), jnp.bfloat16)],     # cached final LN
        ),
        out_shape=jax.ShapeDtypeStruct((B, S, Vp), jnp.float32),   # f32 logits for sampling
        compiler_params=pltpu.CompilerParams(
            dimension_semantics=("parallel", "arbitrary"),
            vmem_limit_bytes=vmem_limit),
    )(x, lnw, lnb, fcw, fcb)
    return logits[..., :V] if Vp != V else logits


# ----------------------------------------------------------------------------
# Parameter init (matches GPT2LanguageModel._init_weights semantics)
# ----------------------------------------------------------------------------
def init_params(key, num_layers, d_model, ffn_dim, vocab, max_pos):
    std = 0.02
    keys = iter(jax.random.split(key, 2 + 5 * num_layers))

    def nrm(shape, dtype=jnp.bfloat16):
        w = jax.random.normal(next(keys), shape, dtype=jnp.float32) * std
        return w.astype(dtype)

    params = {
        "tok_emb": nrm((vocab, d_model), jnp.float32),
        "pos_emb": jnp.zeros((1, max_pos, d_model), jnp.float32),
        "layers": [],
        "lnfw": jnp.ones((1, d_model), jnp.float32),
        "lnfb": jnp.zeros((1, d_model), jnp.float32),
        "fcw": nrm((d_model, vocab)),                          # bf16 LM head
        "fcb": jnp.zeros((1, vocab), jnp.float32),
    }
    for _ in range(num_layers):
        params["layers"].append({
            "ln1w": jnp.ones((1, d_model), jnp.float32),
            "ln1b": jnp.zeros((1, d_model), jnp.float32),
            "wq": nrm((d_model, d_model)),                     # bf16
            "bq": jnp.zeros((1, d_model), jnp.float32),
            "wkv": nrm((d_model, 2 * d_model)),                # fused K/V, bf16
            "bkv": jnp.zeros((1, 2 * d_model), jnp.float32),
            "wo": nrm((d_model, d_model)),
            "bo": jnp.zeros((1, d_model), jnp.float32),
            "ln2w": jnp.ones((1, d_model), jnp.float32),
            "ln2b": jnp.zeros((1, d_model), jnp.float32),
            "w1": nrm((d_model, ffn_dim)),
            "b1": jnp.zeros((1, ffn_dim), jnp.float32),
            "w2": nrm((ffn_dim, d_model)),
            "b2": jnp.zeros((1, d_model), jnp.float32),
        })
    return params


# ----------------------------------------------------------------------------
# Full forward pass
# ----------------------------------------------------------------------------
def gpt2_forward(ids, params, num_heads, layernorm_eps=1e-6, buffered_weights=True):
    B, S = ids.shape
    vmem_limit = _vmem_limit_bytes()
    # token embedding gather + learned positions (plain-JAX glue); dropout = identity
    tok = jnp.take(params["tok_emb"], ids, axis=0)                  # (B, S, D)
    x = (tok + params["pos_emb"][:, :S, :]).astype(jnp.bfloat16)    # bf16 residual stream
    for lp in params["layers"]:
        x = gpt2_block(x, lp, num_heads, layernorm_eps, vmem_limit, buffered_weights)
    # final nn.LayerNorm uses torch's default eps=1e-5
    return lm_head(x, params["lnfw"], params["lnfb"],
                   params["fcw"], params["fcb"], eps=1e-5,
                   vmem_limit=vmem_limit, buffered_weights=buffered_weights)


if __name__ == "__main__":
    # small, TPU-friendly configuration consistent with the module
    B, S = 2, 8
    num_layers, num_heads = 2, 4
    d_model, ffn_dim = 32, 64
    vocab, max_pos = 256, 16

    key = jax.random.PRNGKey(0)
    kp, kx = jax.random.split(key)
    params = init_params(kp, num_layers, d_model, ffn_dim, vocab, max_pos)
    ids = jax.random.randint(kx, (B, S), 0, vocab, dtype=jnp.int32)

    def run(buffered):
        out = gpt2_forward(ids, params, num_heads, buffered_weights=buffered)
        return jax.block_until_ready(out)

    try:
        logits = run(True)       # Buffered(1) resident-weight specs (v7x VMEM win)
    except Exception:
        logits = run(False)      # fall back to default double-buffered specs

    assert logits.shape == (B, S, vocab), logits.shape
    assert bool(jnp.all(jnp.isfinite(logits)))
    print("KERNEL_OK")
</pallas_src>

<mosaic_0001>
module attributes {stable_mosaic.version = 11 : i64} {
  func.func @gpt2_block_kernel(%arg0: i32, %arg1: i32, %arg2: memref<1x8x32xbf16, #tpu.memory_space<vmem>>, %arg3: memref<1x8x32xbf16, #tpu.memory_space<vmem>>, %arg4: memref<1x32xf32, #tpu.memory_space<vmem>>, %arg5: memref<1x32xf32, #tpu.memory_space<vmem>>, %arg6: memref<32x32xbf16, #tpu.memory_space<vmem>>, %arg7: memref<1x32xf32, #tpu.memory_space<vmem>>, %arg8: memref<32x64xbf16, #tpu.memory_space<vmem>>, %arg9: memref<1x64xf32, #tpu.memory_space<vmem>>, %arg10: memref<32x32xbf16, #tpu.memory_space<vmem>>, %arg11: memref<1x32xf32, #tpu.memory_space<vmem>>, %arg12: memref<1x32xf32, #tpu.memory_space<vmem>>, %arg13: memref<1x32xf32, #tpu.memory_space<vmem>>, %arg14: memref<32x64xbf16, #tpu.memory_space<vmem>>, %arg15: memref<1x64xf32, #tpu.memory_space<vmem>>, %arg16: memref<64x32xbf16, #tpu.memory_space<vmem>>, %arg17: memref<1x32xf32, #tpu.memory_space<vmem>>, %arg18: memref<1x8x32xbf16, #tpu.memory_space<vmem>>) attributes {dimension_semantics = [#tpu.dimension_semantics<parallel>, #tpu.dimension_semantics<parallel>], iteration_bounds = array<i64: 2, 1>, scalar_prefetch = 0 : i64, scratch_operands = 0 : i64, tpu.core_type = #tpu.core_type<tc>, window_params = [{transform_indices = @transform_0, window_bounds = array<i64: 1, 8, 32>}, {transform_indices = @transform_1, window_bounds = array<i64: 1, 8, 32>}, {pipeline_mode = #tpu.pipeline_mode<synchronous>, transform_indices = @transform_2, window_bounds = array<i64: 1, 32>}, {pipeline_mode = #tpu.pipeline_mode<synchronous>, transform_indices = @transform_3, window_bounds = array<i64: 1, 32>}, {pipeline_mode = #tpu.pipeline_mode<synchronous>, transform_indices = @transform_4, window_bounds = array<i64: 32, 32>}, {pipeline_mode = #tpu.pipeline_mode<synchronous>, transform_indices = @transform_5, window_bounds = array<i64: 1, 32>}, {pipeline_mode = #tpu.pipeline_mode<synchronous>, transform_indices = @transform_6, window_bounds = array<i64: 32, 64>}, {pipeline_mode = #tpu.pipeline_mode<synchronous>, transform_indices = @transform_7, window_bounds = array<i64: 1, 64>}, {pipeline_mode = #tpu.pipeline_mode<synchronous>, transform_indices = @transform_8, window_bounds = array<i64: 32, 32>}, {pipeline_mode = #tpu.pipeline_mode<synchronous>, transform_indices = @transform_9, window_bounds = array<i64: 1, 32>}, {pipeline_mode = #tpu.pipeline_mode<synchronous>, transform_indices = @transform_10, window_bounds = array<i64: 1, 32>}, {pipeline_mode = #tpu.pipeline_mode<synchronous>, transform_indices = @transform_11, window_bounds = array<i64: 1, 32>}, {pipeline_mode = #tpu.pipeline_mode<synchronous>, transform_indices = @transform_12, window_bounds = array<i64: 32, 64>}, {pipeline_mode = #tpu.pipeline_mode<synchronous>, transform_indices = @transform_13, window_bounds = array<i64: 1, 64>}, {pipeline_mode = #tpu.pipeline_mode<synchronous>, transform_indices = @transform_14, window_bounds = array<i64: 64, 32>}, {pipeline_mode = #tpu.pipeline_mode<synchronous>, transform_indices = @transform_15, window_bounds = array<i64: 1, 32>}, {transform_indices = @transform_16, window_bounds = array<i64: 1, 8, 32>}]} {
    %c0 = arith.constant 0 : index
    %c0_0 = arith.constant 0 : index
    %c0_1 = arith.constant 0 : index
    %0 = vector.load %arg2[%c0, %c0_0, %c0_1] : memref<1x8x32xbf16, #tpu.memory_space<vmem>>, vector<1x8x32xbf16>
    %1 = vector.shape_cast %0 : vector<1x8x32xbf16> to vector<8x32xbf16>
    %2 = arith.extf %1 : vector<8x32xbf16> to vector<8x32xf32>
    %c0_2 = arith.constant 0 : index
    %c0_3 = arith.constant 0 : index
    %c0_4 = arith.constant 0 : index
    %3 = vector.load %arg3[%c0_2, %c0_3, %c0_4] : memref<1x8x32xbf16, #tpu.memory_space<vmem>>, vector<1x8x32xbf16>
    %4 = vector.shape_cast %3 : vector<1x8x32xbf16> to vector<8x32xbf16>
    %5 = arith.extf %4 : vector<8x32xbf16> to vector<8x32xf32>
    %c0_5 = arith.constant 0 : index
    %c0_6 = arith.constant 0 : index
    %6 = vector.load %arg4[%c0_5, %c0_6] : memref<1x32xf32, #tpu.memory_space<vmem>>, vector<1x32xf32>
    %c0_7 = arith.constant 0 : index
    %c0_8 = arith.constant 0 : index
    %7 = vector.load %arg5[%c0_7, %c0_8] : memref<1x32xf32, #tpu.memory_space<vmem>>, vector<1x32xf32>
    %cst = arith.constant dense<0.000000e+00> : vector<8xf32>
    %8 = vector.multi_reduction <add>, %2, %cst [1] : vector<8x32xf32> to vector<8xf32>
    %9 = vector.shape_cast %8 : vector<8xf32> to vector<8x1xf32>
    %cst_9 = arith.constant 3.200000e+01 : f32
    %10 = vector.broadcast %cst_9 : f32 to vector<8x1xf32>
    %11 = arith.divf %9, %10 : vector<8x1xf32>
    %12 = vector.broadcast %11 : vector<8x1xf32> to vector<8x32xf32>
    %13 = arith.subf %2, %12 : vector<8x32xf32>
    %14 = arith.mulf %13, %13 : vector<8x32xf32>
    %cst_10 = arith.constant dense<0.000000e+00> : vector<8xf32>
    %15 = vector.multi_reduction <add>, %14, %cst_10 [1] : vector<8x32xf32> to vector<8xf32>
    %16 = vector.shape_cast %15 : vector<8xf32> to vector<8x1xf32>
    %cst_11 = arith.constant 3.200000e+01 : f32
    %17 = vector.broadcast %cst_11 : f32 to vector<8x1xf32>
    %18 = arith.divf %16, %17 : vector<8x1xf32>
    %19 = vector.broadcast %11 : vector<8x1xf32> to vector<8x32xf32>
    %20 = arith.subf %2, %19 : vector<8x32xf32>
    %cst_12 = arith.constant 9.99999997E-7 : f32
    %21 = vector.broadcast %cst_12 : f32 to vector<8x1xf32>
    %22 = arith.addf %18, %21 : vector<8x1xf32>
    %23 = math.rsqrt %22 : vector<8x1xf32>
    %24 = vector.broadcast %23 : vector<8x1xf32> to vector<8x32xf32>
    %25 = arith.mulf %20, %24 : vector<8x32xf32>
    %26 = vector.broadcast %6 : vector<1x32xf32> to vector<8x32xf32>
    %27 = arith.mulf %25, %26 : vector<8x32xf32>
    %28 = vector.broadcast %7 : vector<1x32xf32> to vector<8x32xf32>
    %29 = arith.addf %27, %28 : vector<8x32xf32>
    %c0_13 = arith.constant 0 : index
    %c0_14 = arith.constant 0 : index
    %30 = vector.load %arg4[%c0_13, %c0_14] : memref<1x32xf32, #tpu.memory_space<vmem>>, vector<1x32xf32>
    %c0_15 = arith.constant 0 : index
    %c0_16 = arith.constant 0 : index
    %31 = vector.load %arg5[%c0_15, %c0_16] : memref<1x32xf32, #tpu.memory_space<vmem>>, vector<1x32xf32>
    %cst_17 = arith.constant dense<0.000000e+00> : vector<8xf32>
    %32 = vector.multi_reduction <add>, %5, %cst_17 [1] : vector<8x32xf32> to vector<8xf32>
    %33 = vector.shape_cast %32 : vector<8xf32> to vector<8x1xf32>
    %cst_18 = arith.constant 3.200000e+01 : f32
    %34 = vector.broadcast %cst_18 : f32 to vector<8x1xf32>
    %35 = arith.divf %33, %34 : vector<8x1xf32>
    %36 = vector.broadcast %35 : vector<8x1xf32> to vector<8x32xf32>
    %37 = arith.subf %5, %36 : vector<8x32xf32>
    %38 = arith.mulf %37, %37 : vector<8x32xf32>
    %cst_19 = arith.constant dense<0.000000e+00> : vector<8xf32>
    %39 = vector.multi_reduction <add>, %38, %cst_19 [1] : vector<8x32xf32> to vector<8xf32>
    %40 = vector.shape_cast %39 : vector<8xf32> to vector<8x1xf32>
    %cst_20 = arith.constant 3.200000e+01 : f32
    %41 = vector.broadcast %cst_20 : f32 to vector<8x1xf32>
    %42 = arith.divf %40, %41 : vector<8x1xf32>
    %43 = vector.broadcast %35 : vector<8x1xf32> to vector<8x32xf32>
    %44 = arith.subf %5, %43 : vector<8x32xf32>
    %cst_21 = arith.constant 9.99999997E-7 : f32
    %45 = vector.broadcast %cst_21 : f32 to vector<8x1xf32>
    %46 = arith.addf %42, %45 : vector<8x1xf32>
    %47 = math.rsqrt %46 : vector<8x1xf32>
    %48 = vector.broadcast %47 : vector<8x1xf32> to vector<8x32xf32>
    %49 = arith.mulf %44, %48 : vector<8x32xf32>
    %50 = vector.broadcast %30 : vector<1x32xf32> to vector<8x32xf32>
    %51 = arith.mulf %49, %50 : vector<8x32xf32>
    %52 = vector.broadcast %31 : vector<1x32xf32> to vector<8x32xf32>
    %53 = arith.addf %51, %52 : vector<8x32xf32>
    %54 = arith.truncf %29 : vector<8x32xf32> to vector<8x32xbf16>
    %c0_22 = arith.constant 0 : index
    %c0_23 = arith.constant 0 : index
    %55 = vector.load %arg6[%c0_22, %c0_23] : memref<32x32xbf16, #tpu.memory_space<vmem>>, vector<32x32xbf16>
    %cst_24 = arith.constant dense<0.000000e+00> : vector<8x32xf32>
    %56 = tpu.matmul %54, %55, %cst_24 {dimension_numbers = #tpu.dot_dimension_numbers<[1], [0], [0], [1], [0, 0, 1, 1], [], []>} : vector<8x32xbf16>, vector<32x32xbf16>, vector<8x32xf32> -> vector<8x32xf32>
    %c0_25 = arith.constant 0 : index
    %c0_26 = arith.constant 0 : index
    %57 = vector.load %arg7[%c0_25, %c0_26] : memref<1x32xf32, #tpu.memory_space<vmem>>, vector<1x32xf32>
    %58 = vector.broadcast %57 : vector<1x32xf32> to vector<8x32xf32>
    %59 = arith.addf %56, %58 : vector<8x32xf32>
    %60 = arith.truncf %53 : vector<8x32xf32> to vector<8x32xbf16>
    %c0_27 = arith.constant 0 : index
    %c0_28 = arith.constant 0 : index
    %61 = vector.load %arg8[%c0_27, %c0_28] : memref<32x64xbf16, #tpu.memory_space<vmem>>, vector<32x64xbf16>
    %cst_29 = arith.constant dense<0.000000e+00> : vector<8x64xf32>
    %62 = tpu.matmul %60, %61, %cst_29 {dimension_numbers = #tpu.dot_dimension_numbers<[1], [0], [0], [1], [0, 0, 1, 1], [], []>} : vector<8x32xbf16>, vector<32x64xbf16>, vector<8x64xf32> -> vector<8x64xf32>
    %c0_30 = arith.constant 0 : index
    %c0_31 = arith.constant 0 : index
    %63 = vector.load %arg9[%c0_30, %c0_31] : memref<1x64xf32, #tpu.memory_space<vmem>>, vector<1x64xf32>
    %64 = vector.broadcast %63 : vector<1x64xf32> to vector<8x64xf32>
    %65 = arith.addf %62, %64 : vector<8x64xf32>
    %66 = vector.extract_strided_slice %65 {offsets = [0, 0], sizes = [8, 32], strides = [1, 1]} : vector<8x64xf32> to vector<8x32xf32>
    %67 = vector.extract_strided_slice %65 {offsets = [0, 32], sizes = [8, 32], strides = [1, 1]} : vector<8x64xf32> to vector<8x32xf32>
    %68 = vector.extract_strided_slice %59 {offsets = [0, 0], sizes = [8, 8], strides = [1, 1]} : vector<8x32xf32> to vector<8x8xf32>
    %69 = vector.extract_strided_slice %59 {offsets = [0, 8], sizes = [8, 8], strides = [1, 1]} : vector<8x32xf32> to vector<8x8xf32>
    %70 = vector.extract_strided_slice %59 {offsets = [0, 16], sizes = [8, 8], strides = [1, 1]} : vector<8x32xf32> to vector<8x8xf32>
    %71 = vector.extract_strided_slice %59 {offsets = [0, 24], sizes = [8, 8], strides = [1, 1]} : vector<8x32xf32> to vector<8x8xf32>
    %72 = vector.shape_cast %68 : vector<8x8xf32> to vector<1x8x8xf32>
    %73 = vector.shape_cast %69 : vector<8x8xf32> to vector<1x8x8xf32>
    %74 = vector.shape_cast %70 : vector<8x8xf32> to vector<1x8x8xf32>
    %75 = vector.shape_cast %71 : vector<8x8xf32> to vector<1x8x8xf32>
    %76 = tpu.concatenate %72, %73, %74, %75 in 0 : vector<1x8x8xf32>, vector<1x8x8xf32>, vector<1x8x8xf32>, vector<1x8x8xf32> -> vector<4x8x8xf32>
    %77 = arith.truncf %76 : vector<4x8x8xf32> to vector<4x8x8xbf16>
    %78 = vector.extract_strided_slice %66 {offsets = [0, 0], sizes = [8, 8], strides = [1, 1]} : vector<8x32xf32> to vector<8x8xf32>
    %79 = vector.extract_strided_slice %66 {offsets = [0, 8], sizes = [8, 8], strides = [1, 1]} : vector<8x32xf32> to vector<8x8xf32>
    %80 = vector.extract_strided_slice %66 {offsets = [0, 16], sizes = [8, 8], strides = [1, 1]} : vector<8x32xf32> to vector<8x8xf32>
    %81 = vector.extract_strided_slice %66 {offsets = [0, 24], sizes = [8, 8], strides = [1, 1]} : vector<8x32xf32> to vector<8x8xf32>
    %82 = vector.shape_cast %78 : vector<8x8xf32> to vector<1x8x8xf32>
    %83 = vector.shape_cast %79 : vector<8x8xf32> to vector<1x8x8xf32>
    %84 = vector.shape_cast %80 : vector<8x8xf32> to vector<1x8x8xf32>
    %85 = vector.shape_cast %81 : vector<8x8xf32> to vector<1x8x8xf32>
    %86 = tpu.concatenate %82, %83, %84, %85 in 0 : vector<1x8x8xf32>, vector<1x8x8xf32>, vector<1x8x8xf32>, vector<1x8x8xf32> -> vector<4x8x8xf32>
    %87 = arith.truncf %86 : vector<4x8x8xf32> to vector<4x8x8xbf16>
    %88 = vector.extract_strided_slice %67 {offsets = [0, 0], sizes = [8, 8], strides = [1, 1]} : vector<8x32xf32> to vector<8x8xf32>
    %89 = vector.extract_strided_slice %67 {offsets = [0, 8], sizes = [8, 8], strides = [1, 1]} : vector<8x32xf32> to vector<8x8xf32>
    %90 = vector.extract_strided_slice %67 {offsets = [0, 16], sizes = [8, 8], strides = [1, 1]} : vector<8x32xf32> to vector<8x8xf32>
    %91 = vector.extract_strided_slice %67 {offsets = [0, 24], sizes = [8, 8], strides = [1, 1]} : vector<8x32xf32> to vector<8x8xf32>
    %92 = vector.shape_cast %88 : vector<8x8xf32> to vector<1x8x8xf32>
    %93 = vector.shape_cast %89 : vector<8x8xf32> to vector<1x8x8xf32>
    %94 = vector.shape_cast %90 : vector<8x8xf32> to vector<1x8x8xf32>
    %95 = vector.shape_cast %91 : vector<8x8xf32> to vector<1x8x8xf32>
    %96 = tpu.concatenate %92, %93, %94, %95 in 0 : vector<1x8x8xf32>, vector<1x8x8xf32>, vector<1x8x8xf32>, vector<1x8x8xf32> -> vector<4x8x8xf32>
    %97 = arith.truncf %96 : vector<4x8x8xf32> to vector<4x8x8xbf16>
    %c8_i32 = arith.constant 8 : i32
    %98 = arith.muli %arg1, %c8_i32 : i32
    %99 = tpu.iota {dimensions = array<i32: 0>} : vector<8x8xi32>
    %100 = vector.broadcast %98 : i32 to vector<8x8xi32>
    %101 = arith.addi %100, %99 : vector<8x8xi32>
    %102 = tpu.iota {dimensions = array<i32: 1>} : vector<8x8xi32>
    %103 = arith.cmpi sle, %102, %101 : vector<8x8xi32>
    %104 = vector.shape_cast %103 : vector<8x8xi1> to vector<1x8x8xi1>
    "tpu.trace_start"() <{level = 10 : i32, message = "hqd,hkd->hqk"}> : () -> ()
    %cst_32 = arith.constant dense<0.000000e+00> : vector<4x8x8xf32>
    %105 = tpu.matmul %77, %87, %cst_32 {dimension_numbers = #tpu.dot_dimension_numbers<[2], [2], [1], [1], [0, 0, 0, 1, 1, 1], [0], [0]>} : vector<4x8x8xbf16>, vector<4x8x8xbf16>, vector<4x8x8xf32> -> vector<4x8x8xf32>
    "tpu.trace_stop"() : () -> ()
    %cst_33 = arith.constant 0.353553385 : f32
    %106 = vector.broadcast %cst_33 : f32 to vector<4x8x8xf32>
    %107 = arith.mulf %105, %106 : vector<4x8x8xf32>
    %cst_34 = arith.constant -1.000000e+30 : f32
    %108 = vector.shape_cast %104 : vector<1x8x8xi1> to vector<1x8x8xi1>
    %109 = vector.broadcast %108 : vector<1x8x8xi1> to vector<4x8x8xi1>
    %110 = vector.broadcast %cst_34 : f32 to vector<4x8x8xf32>
    %111 = arith.select %109, %107, %110 : vector<4x8x8xi1>, vector<4x8x8xf32>
    %cst_35 = arith.constant dense<0xFF800000> : vector<4x8xf32>
    %112 = vector.multi_reduction <maximumf>, %111, %cst_35 [2] : vector<4x8x8xf32> to vector<4x8xf32>
    %113 = vector.shape_cast %112 : vector<4x8xf32> to vector<4x8x1xf32>
    %114 = vector.broadcast %113 : vector<4x8x1xf32> to vector<4x8x8xf32>
    %115 = arith.subf %111, %114 : vector<4x8x8xf32>
    %116 = math.exp %115 : vector<4x8x8xf32>
    %cst_36 = arith.constant dense<0.000000e+00> : vector<4x8xf32>
    %117 = vector.multi_reduction <add>, %116, %cst_36 [2] : vector<4x8x8xf32> to vector<4x8xf32>
    %118 = vector.shape_cast %117 : vector<4x8xf32> to vector<4x8x1xf32>
    %119 = tpu.reciprocal %118 {approx = true} : vector<4x8x1xf32> -> vector<4x8x1xf32>
    %120 = vector.broadcast %119 : vector<4x8x1xf32> to vector<4x8x8xf32>
    %121 = arith.mulf %116, %120 : vector<4x8x8xf32>
    %122 = arith.truncf %121 : vector<4x8x8xf32> to vector<4x8x8xbf16>
    "tpu.trace_start"() <{level = 10 : i32, message = "hqk,hkd->hqd"}> : () -> ()
    %cst_37 = arith.constant dense<0.000000e+00> : vector<4x8x8xf32>
    %123 = tpu.matmul %122, %97, %cst_37 {dimension_numbers = #tpu.dot_dimension_numbers<[2], [1], [1], [2], [0, 0, 0, 1, 1, 2], [0], [0]>} : vector<4x8x8xbf16>, vector<4x8x8xbf16>, vector<4x8x8xf32> -> vector<4x8x8xf32>
    "tpu.trace_stop"() : () -> ()
    %124 = vector.extract_strided_slice %123 {offsets = [0, 0, 0], sizes = [1, 8, 8], strides = [1, 1, 1]} : vector<4x8x8xf32> to vector<1x8x8xf32>
    %125 = vector.shape_cast %124 : vector<1x8x8xf32> to vector<8x8xf32>
    %126 = vector.extract_strided_slice %123 {offsets = [1, 0, 0], sizes = [1, 8, 8], strides = [1, 1, 1]} : vector<4x8x8xf32> to vector<1x8x8xf32>
    %127 = vector.shape_cast %126 : vector<1x8x8xf32> to vector<8x8xf32>
    %128 = vector.extract_strided_slice %123 {offsets = [2, 0, 0], sizes = [1, 8, 8], strides = [1, 1, 1]} : vector<4x8x8xf32> to vector<1x8x8xf32>
    %129 = vector.shape_cast %128 : vector<1x8x8xf32> to vector<8x8xf32>
    %130 = vector.extract_strided_slice %123 {offsets = [3, 0, 0], sizes = [1, 8, 8], strides = [1, 1, 1]} : vector<4x8x8xf32> to vector<1x8x8xf32>
    %131 = vector.shape_cast %130 : vector<1x8x8xf32> to vector<8x8xf32>
    %132 = tpu.concatenate %125, %127, %129, %131 in 1 : vector<8x8xf32>, vector<8x8xf32>, vector<8x8xf32>, vector<8x8xf32> -> vector<8x32xf32>
    %133 = arith.truncf %132 : vector<8x32xf32> to vector<8x32xbf16>
    %c0_38 = arith.constant 0 : index
    %c0_39 = arith.constant 0 : index
    %134 = vector.load %arg10[%c0_38, %c0_39] : memref<32x32xbf16, #tpu.memory_space<vmem>>, vector<32x32xbf16>
    %cst_40 = arith.constant dense<0.000000e+00> : vector<8x32xf32>
    %135 = tpu.matmul %133, %134, %cst_40 {dimension_numbers = #tpu.dot_dimension_numbers<[1], [0], [0], [1], [0, 0, 1, 1], [], []>} : vector<8x32xbf16>, vector<32x32xbf16>, vector<8x32xf32> -> vector<8x32xf32>
    %c0_41 = arith.constant 0 : index
    %c0_42 = arith.constant 0 : index
    %136 = vector.load %arg11[%c0_41, %c0_42] : memref<1x32xf32, #tpu.memory_space<vmem>>, vector<1x32xf32>
    %137 = vector.broadcast %136 : vector<1x32xf32> to vector<8x32xf32>
    %138 = arith.addf %135, %137 : vector<8x32xf32>
    %139 = arith.addf %29, %138 : vector<8x32xf32>
    %c0_43 = arith.constant 0 : index
    %c0_44 = arith.constant 0 : index
    %140 = vector.load %arg12[%c0_43, %c0_44] : memref<1x32xf32, #tpu.memory_space<vmem>>, vector<1x32xf32>
    %c0_45 = arith.constant 0 : index
    %c0_46 = arith.constant 0 : index
    %141 = vector.load %arg13[%c0_45, %c0_46] : memref<1x32xf32, #tpu.memory_space<vmem>>, vector<1x32xf32>
    %cst_47 = arith.constant dense<0.000000e+00> : vector<8xf32>
    %142 = vector.multi_reduction <add>, %139, %cst_47 [1] : vector<8x32xf32> to vector<8xf32>
    %143 = vector.shape_cast %142 : vector<8xf32> to vector<8x1xf32>
    %cst_48 = arith.constant 3.200000e+01 : f32
    %144 = vector.broadcast %cst_48 : f32 to vector<8x1xf32>
    %145 = arith.divf %143, %144 : vector<8x1xf32>
    %146 = vector.broadcast %145 : vector<8x1xf32> to vector<8x32xf32>
    %147 = arith.subf %139, %146 : vector<8x32xf32>
    %148 = arith.mulf %147, %147 : vector<8x32xf32>
    %cst_49 = arith.constant dense<0.000000e+00> : vector<8xf32>
    %149 = vector.multi_reduction <add>, %148, %cst_49 [1] : vector<8x32xf32> to vector<8xf32>
    %150 = vector.shape_cast %149 : vector<8xf32> to vector<8x1xf32>
    %cst_50 = arith.constant 3.200000e+01 : f32
    %151 = vector.broadcast %cst_50 : f32 to vector<8x1xf32>
    %152 = arith.divf %150, %151 : vector<8x1xf32>
    %153 = vector.broadcast %145 : vector<8x1xf32> to vector<8x32xf32>
    %154 = arith.subf %139, %153 : vector<8x32xf32>
    %cst_51 = arith.constant 9.99999997E-7 : f32
    %155 = vector.broadcast %cst_51 : f32 to vector<8x1xf32>
    %156 = arith.addf %152, %155 : vector<8x1xf32>
    %157 = math.rsqrt %156 : vector<8x1xf32>
    %158 = vector.broadcast %157 : vector<8x1xf32> to vector<8x32xf32>
    %159 = arith.mulf %154, %158 : vector<8x32xf32>
    %160 = vector.broadcast %140 : vector<1x32xf32> to vector<8x32xf32>
    %161 = arith.mulf %159, %160 : vector<8x32xf32>
    %162 = vector.broadcast %141 : vector<1x32xf32> to vector<8x32xf32>
    %163 = arith.addf %161, %162 : vector<8x32xf32>
    %164 = arith.truncf %163 : vector<8x32xf32> to vector<8x32xbf16>
    %c0_52 = arith.constant 0 : index
    %c0_53 = arith.constant 0 : index
    %165 = vector.load %arg14[%c0_52, %c0_53] : memref<32x64xbf16, #tpu.memory_space<vmem>>, vector<32x64xbf16>
    %cst_54 = arith.constant dense<0.000000e+00> : vector<8x64xf32>
    %166 = tpu.matmul %164, %165, %cst_54 {dimension_numbers = #tpu.dot_dimension_numbers<[1], [0], [0], [1], [0, 0, 1, 1], [], []>} : vector<8x32xbf16>, vector<32x64xbf16>, vector<8x64xf32> -> vector<8x64xf32>
    %c0_55 = arith.constant 0 : index
    %c0_56 = arith.constant 0 : index
    %167 = vector.load %arg15[%c0_55, %c0_56] : memref<1x64xf32, #tpu.memory_space<vmem>>, vector<1x64xf32>
    %168 = vector.broadcast %167 : vector<1x64xf32> to vector<8x64xf32>
    %169 = arith.addf %166, %168 : vector<8x64xf32>
    %cst_57 = arith.constant 5.000000e-01 : f32
    %170 = vector.broadcast %cst_57 : f32 to vector<8x64xf32>
    %171 = arith.mulf %170, %169 : vector<8x64xf32>
    %cst_58 = arith.constant 4.471500e-02 : f32
    %172 = vector.broadcast %cst_58 : f32 to vector<8x64xf32>
    %173 = arith.mulf %172, %169 : vector<8x64xf32>
    %174 = arith.mulf %173, %169 : vector<8x64xf32>
    %175 = arith.mulf %174, %169 : vector<8x64xf32>
    %176 = arith.addf %169, %175 : vector<8x64xf32>
    %cst_59 = arith.constant 0.797884583 : f32
    %177 = vector.broadcast %cst_59 : f32 to vector<8x64xf32>
    %178 = arith.mulf %177, %176 : vector<8x64xf32>
    %179 = math.tanh %178 : vector<8x64xf32>
    %cst_60 = arith.constant 1.000000e+00 : f32
    %180 = vector.broadcast %cst_60 : f32 to vector<8x64xf32>
    %181 = arith.addf %180, %179 : vector<8x64xf32>
    %182 = arith.mulf %171, %181 : vector<8x64xf32>
    %183 = arith.truncf %182 : vector<8x64xf32> to vector<8x64xbf16>
    %c0_61 = arith.constant 0 : index
    %c0_62 = arith.constant 0 : index
    %184 = vector.load %arg16[%c0_61, %c0_62] : memref<64x32xbf16, #tpu.memory_space<vmem>>, vector<64x32xbf16>
    %cst_63 = arith.constant dense<0.000000e+00> : vector<8x32xf32>
    %185 = tpu.matmul %183, %184, %cst_63 {dimension_numbers = #tpu.dot_dimension_numbers<[1], [0], [0], [1], [0, 0, 1, 1], [], []>} : vector<8x64xbf16>, vector<64x32xbf16>, vector<8x32xf32> -> vector<8x32xf32>
    %c0_64 = arith.constant 0 : index
    %c0_65 = arith.constant 0 : index
    %186 = vector.load %arg17[%c0_64, %c0_65] : memref<1x32xf32, #tpu.memory_space<vmem>>, vector<1x32xf32>
    %187 = vector.broadcast %186 : vector<1x32xf32> to vector<8x32xf32>
    %188 = arith.addf %185, %187 : vector<8x32xf32>
    %189 = arith.addf %163, %188 : vector<8x32xf32>
    %190 = arith.truncf %189 : vector<8x32xf32> to vector<8x32xbf16>
    %c0_66 = arith.constant 0 : index
    %c0_67 = arith.constant 0 : index
    %c0_68 = arith.constant 0 : index
    %191 = vector.load %arg18[%c0_66, %c0_67, %c0_68] : memref<1x8x32xbf16, #tpu.memory_space<vmem>>, vector<1x8x32xbf16>
    %192 = vector.shape_cast %191 : vector<1x8x32xbf16> to vector<8x32xbf16>
    %193 = vector.shape_cast %190 : vector<8x32xbf16> to vector<1x8x32xbf16>
    tpu.vector_store %arg18[%c0_66, %c0_67, %c0_68], %193 {strides = array<i32>} : memref<1x8x32xbf16, #tpu.memory_space<vmem>>, vector<1x8x32xbf16>,
    return
  }
  func.func @transform_0(%arg0: i32, %arg1: i32) -> (i32, i32, i32) {
    %c0_i32 = arith.constant 0 : i32
    %c0_i32_0 = arith.constant 0 : i32
    return %arg0, %arg1, %c0_i32 : i32, i32, i32
  }
  func.func @transform_1(%arg0: i32, %arg1: i32) -> (i32, i32, i32) {
    %c0_i32 = arith.constant 0 : i32
    %c0_i32_0 = arith.constant 0 : i32
    %c0_i32_1 = arith.constant 0 : i32
    return %arg0, %c0_i32, %c0_i32_0 : i32, i32, i32
  }
  func.func @transform_2(%arg0: i32, %arg1: i32) -> (i32, i32) {
    %c0_i32 = arith.constant 0 : i32
    %c0_i32_0 = arith.constant 0 : i32
    %c0_i32_1 = arith.constant 0 : i32
    return %c0_i32, %c0_i32_0 : i32, i32
  }
  func.func @transform_3(%arg0: i32, %arg1: i32) -> (i32, i32) {
    %c0_i32 = arith.constant 0 : i32
    %c0_i32_0 = arith.constant 0 : i32
    %c0_i32_1 = arith.constant 0 : i32
    return %c0_i32, %c0_i32_0 : i32, i32
  }
  func.func @transform_4(%arg0: i32, %arg1: i32) -> (i32, i32) {
    %c0_i32 = arith.constant 0 : i32
    %c0_i32_0 = arith.constant 0 : i32
    %c0_i32_1 = arith.constant 0 : i32
    return %c0_i32, %c0_i32_0 : i32, i32
  }
  func.func @transform_5(%arg0: i32, %arg1: i32) -> (i32, i32) {
    %c0_i32 = arith.constant 0 : i32
    %c0_i32_0 = arith.constant 0 : i32
    %c0_i32_1 = arith.constant 0 : i32
    return %c0_i32, %c0_i32_0 : i32, i32
  }
  func.func @transform_6(%arg0: i32, %arg1: i32) -> (i32, i32) {
    %c0_i32 = arith.constant 0 : i32
    %c0_i32_0 = arith.constant 0 : i32
    %c0_i32_1 = arith.constant 0 : i32
    return %c0_i32, %c0_i32_0 : i32, i32
  }
  func.func @transform_7(%arg0: i32, %arg1: i32) -> (i32, i32) {
    %c0_i32 = arith.constant 0 : i32
    %c0_i32_0 = arith.constant 0 : i32
    %c0_i32_1 = arith.constant 0 : i32
    return %c0_i32, %c0_i32_0 : i32, i32
  }
  func.func @transform_8(%arg0: i32, %arg1: i32) -> (i32, i32) {
    %c0_i32 = arith.constant 0 : i32
    %c0_i32_0 = arith.constant 0 : i32
    %c0_i32_1 = arith.constant 0 : i32
    return %c0_i32, %c0_i32_0 : i32, i32
  }
  func.func @transform_9(%arg0: i32, %arg1: i32) -> (i32, i32) {
    %c0_i32 = arith.constant 0 : i32
    %c0_i32_0 = arith.constant 0 : i32
    %c0_i32_1 = arith.constant 0 : i32
    return %c0_i32, %c0_i32_0 : i32, i32
  }
  func.func @transform_10(%arg0: i32, %arg1: i32) -> (i32, i32) {
    %c0_i32 = arith.constant 0 : i32
    %c0_i32_0 = arith.constant 0 : i32
    %c0_i32_1 = arith.constant 0 : i32
    return %c0_i32, %c0_i32_0 : i32, i32
  }
  func.func @transform_11(%arg0: i32, %arg1: i32) -> (i32, i32) {
    %c0_i32 = arith.constant 0 : i32
    %c0_i32_0 = arith.constant 0 : i32
    %c0_i32_1 = arith.constant 0 : i32
    return %c0_i32, %c0_i32_0 : i32, i32
  }
  func.func @transform_12(%arg0: i32, %arg1: i32) -> (i32, i32) {
    %c0_i32 = arith.constant 0 : i32
    %c0_i32_0 = arith.constant 0 : i32
    %c0_i32_1 = arith.constant 0 : i32
    return %c0_i32, %c0_i32_0 : i32, i32
  }
  func.func @transform_13(%arg0: i32, %arg1: i32) -> (i32, i32) {
    %c0_i32 = arith.constant 0 : i32
    %c0_i32_0 = arith.constant 0 : i32
    %c0_i32_1 = arith.constant 0 : i32
    return %c0_i32, %c0_i32_0 : i32, i32
  }
  func.func @transform_14(%arg0: i32, %arg1: i32) -> (i32, i32) {
    %c0_i32 = arith.constant 0 : i32
    %c0_i32_0 = arith.constant 0 : i32
    %c0_i32_1 = arith.constant 0 : i32
    return %c0_i32, %c0_i32_0 : i32, i32
  }
  func.func @transform_15(%arg0: i32, %arg1: i32) -> (i32, i32) {
    %c0_i32 = arith.constant 0 : i32
    %c0_i32_0 = arith.constant 0 : i32
    %c0_i32_1 = arith.constant 0 : i32
    return %c0_i32, %c0_i32_0 : i32, i32
  }
  func.func @transform_16(%arg0: i32, %arg1: i32) -> (i32, i32, i32) {
    %c0_i32 = arith.constant 0 : i32
    %c0_i32_0 = arith.constant 0 : i32
    return %arg0, %arg1, %c0_i32 : i32, i32, i32
  }
}

module attributes {stable_mosaic.version = 11 : i64} {
  func.func @gpt2_block_kernel(%arg0: i32, %arg1: i32, %arg2: memref<1x8x32xbf16, #tpu.memory_space<vmem>>, %arg3: memref<1x8x32xbf16, #tpu.memory_space<vmem>>, %arg4: memref<1x32xf32, #tpu.memory_space<vmem>>, %arg5: memref<1x32xf32, #tpu.memory_space<vmem>>, %arg6: memref<32x32xbf16, #tpu.memory_space<vmem>>, %arg7: memref<1x32xf32, #tpu.memory_space<vmem>>, %arg8: memref<32x64xbf16, #tpu.memory_space<vmem>>, %arg9: memref<1x64xf32, #tpu.memory_space<vmem>>, %arg10: memref<32x32xbf16, #tpu.memory_space<vmem>>, %arg11: memref<1x32xf32, #tpu.memory_space<vmem>>, %arg12: memref<1x32xf32, #tpu.memory_space<vmem>>, %arg13: memref<1x32xf32, #tpu.memory_space<vmem>>, %arg14: memref<32x64xbf16, #tpu.memory_space<vmem>>, %arg15: memref<1x64xf32, #tpu.memory_space<vmem>>, %arg16: memref<64x32xbf16, #tpu.memory_space<vmem>>, %arg17: memref<1x32xf32, #tpu.memory_space<vmem>>, %arg18: memref<1x8x32xbf16, #tpu.memory_space<vmem>>) attributes {dimension_semantics = [#tpu.dimension_semantics<parallel>, #tpu.dimension_semantics<parallel>], iteration_bounds = array<i64: 2, 1>, scalar_prefetch = 0 : i64, scratch_operands = 0 : i64, tpu.core_type = #tpu.core_type<tc>, window_params = [{transform_indices = @transform_0, window_bounds = array<i64: 1, 8, 32>}, {transform_indices = @transform_1, window_bounds = array<i64: 1, 8, 32>}, {pipeline_mode = #tpu.pipeline_mode<synchronous>, transform_indices = @transform_2, window_bounds = array<i64: 1, 32>}, {pipeline_mode = #tpu.pipeline_mode<synchronous>, transform_indices = @transform_3, window_bounds = array<i64: 1, 32>}, {pipeline_mode = #tpu.pipeline_mode<synchronous>, transform_indices = @transform_4, window_bounds = array<i64: 32, 32>}, {pipeline_mode = #tpu.pipeline_mode<synchronous>, transform_indices = @transform_5, window_bounds = array<i64: 1, 32>}, {pipeline_mode = #tpu.pipeline_mode<synchronous>, transform_indices = @transform_6, window_bounds = array<i64: 32, 64>}, {pipeline_mode = #tpu.pipeline_mode<synchronous>, transform_indices = @transform_7, window_bounds = array<i64: 1, 64>}, {pipeline_mode = #tpu.pipeline_mode<synchronous>, transform_indices = @transform_8, window_bounds = array<i64: 32, 32>}, {pipeline_mode = #tpu.pipeline_mode<synchronous>, transform_indices = @transform_9, window_bounds = array<i64: 1, 32>}, {pipeline_mode = #tpu.pipeline_mode<synchronous>, transform_indices = @transform_10, window_bounds = array<i64: 1, 32>}, {pipeline_mode = #tpu.pipeline_mode<synchronous>, transform_indices = @transform_11, window_bounds = array<i64: 1, 32>}, {pipeline_mode = #tpu.pipeline_mode<synchronous>, transform_indices = @transform_12, window_bounds = array<i64: 32, 64>}, {pipeline_mode = #tpu.pipeline_mode<synchronous>, transform_indices = @transform_13, window_bounds = array<i64: 1, 64>}, {pipeline_mode = #tpu.pipeline_mode<synchronous>, transform_indices = @transform_14, window_bounds = array<i64: 64, 32>}, {pipeline_mode = #tpu.pipeline_mode<synchronous>, transform_indices = @transform_15, window_bounds = array<i64: 1, 32>}, {transform_indices = @transform_16, window_bounds = array<i64: 1, 8, 32>}]} {
    %c0 = arith.constant 0 : index
    %c0_0 = arith.constant 0 : index
    %c0_1 = arith.constant 0 : index
    %0 = vector.load %arg2[%c0, %c0_0, %c0_1] : memref<1x8x32xbf16, #tpu.memory_space<vmem>>, vector<1x8x32xbf16>
    %1 = vector.shape_cast %0 : vector<1x8x32xbf16> to vector<8x32xbf16>
    %2 = arith.extf %1 : vector<8x32xbf16> to vector<8x32xf32>
    %c0_2 = arith.constant 0 : index
    %c0_3 = arith.constant 0 : index
    %c0_4 = arith.constant 0 : index
    %3 = vector.load %arg3[%c0_2, %c0_3, %c0_4] : memref<1x8x32xbf16, #tpu.memory_space<vmem>>, vector<1x8x32xbf16>
    %4 = vector.shape_cast %3 : vector<1x8x32xbf16> to vector<8x32xbf16>
    %5 = arith.extf %4 : vector<8x32xbf16> to vector<8x32xf32>
    %c0_5 = arith.constant 0 : index
    %c0_6 = arith.constant 0 : index
    %6 = vector.load %arg4[%c0_5, %c0_6] : memref<1x32xf32, #tpu.memory_space<vmem>>, vector<1x32xf32>
    %c0_7 = arith.constant 0 : index
    %c0_8 = arith.constant 0 : index
    %7 = vector.load %arg5[%c0_7, %c0_8] : memref<1x32xf32, #tpu.memory_space<vmem>>, vector<1x32xf32>
    %cst = arith.constant dense<0.000000e+00> : vector<8xf32>
    %8 = vector.multi_reduction <add>, %2, %cst [1] : vector<8x32xf32> to vector<8xf32>
    %9 = vector.shape_cast %8 : vector<8xf32> to vector<8x1xf32>
    %cst_9 = arith.constant 3.200000e+01 : f32
    %10 = vector.broadcast %cst_9 : f32 to vector<8x1xf32>
    %11 = arith.divf %9, %10 : vector<8x1xf32>
    %12 = vector.broadcast %11 : vector<8x1xf32> to vector<8x32xf32>
    %13 = arith.subf %2, %12 : vector<8x32xf32>
    %14 = arith.mulf %13, %13 : vector<8x32xf32>
    %cst_10 = arith.constant dense<0.000000e+00> : vector<8xf32>
    %15 = vector.multi_reduction <add>, %14, %cst_10 [1] : vector<8x32xf32> to vector<8xf32>
    %16 = vector.shape_cast %15 : vector<8xf32> to vector<8x1xf32>
    %cst_11 = arith.constant 3.200000e+01 : f32
    %17 = vector.broadcast %cst_11 : f32 to vector<8x1xf32>
    %18 = arith.divf %16, %17 : vector<8x1xf32>
    %19 = vector.broadcast %11 : vector<8x1xf32> to vector<8x32xf32>
    %20 = arith.subf %2, %19 : vector<8x32xf32>
    %cst_12 = arith.constant 9.99999997E-7 : f32
    %21 = vector.broadcast %cst_12 : f32 to vector<8x1xf32>
    %22 = arith.addf %18, %21 : vector<8x1xf32>
    %23 = math.rsqrt %22 : vector<8x1xf32>
    %24 = vector.broadcast %23 : vector<8x1xf32> to vector<8x32xf32>
    %25 = arith.mulf %20, %24 : vector<8x32xf32>
    %26 = vector.broadcast %6 : vector<1x32xf32> to vector<8x32xf32>
    %27 = arith.mulf %25, %26 : vector<8x32xf32>
    %28 = vector.broadcast %7 : vector<1x32xf32> to vector<8x32xf32>
    %29 = arith.addf %27, %28 : vector<8x32xf32>
    %c0_13 = arith.constant 0 : index
    %c0_14 = arith.constant 0 : index
    %30 = vector.load %arg4[%c0_13, %c0_14] : memref<1x32xf32, #tpu.memory_space<vmem>>, vector<1x32xf32>
    %c0_15 = arith.constant 0 : index
    %c0_16 = arith.constant 0 : index
    %31 = vector.load %arg5[%c0_15, %c0_16] : memref<1x32xf32, #tpu.memory_space<vmem>>, vector<1x32xf32>
    %cst_17 = arith.constant dense<0.000000e+00> : vector<8xf32>
    %32 = vector.multi_reduction <add>, %5, %cst_17 [1] : vector<8x32xf32> to vector<8xf32>
    %33 = vector.shape_cast %32 : vector<8xf32> to vector<8x1xf32>
    %cst_18 = arith.constant 3.200000e+01 : f32
    %34 = vector.broadcast %cst_18 : f32 to vector<8x1xf32>
    %35 = arith.divf %33, %34 : vector<8x1xf32>
    %36 = vector.broadcast %35 : vector<8x1xf32> to vector<8x32xf32>
    %37 = arith.subf %5, %36 : vector<8x32xf32>
    %38 = arith.mulf %37, %37 : vector<8x32xf32>
    %cst_19 = arith.constant dense<0.000000e+00> : vector<8xf32>
    %39 = vector.multi_reduction <add>, %38, %cst_19 [1] : vector<8x32xf32> to vector<8xf32>
    %40 = vector.shape_cast %39 : vector<8xf32> to vector<8x1xf32>
    %cst_20 = arith.constant 3.200000e+01 : f32
    %41 = vector.broadcast %cst_20 : f32 to vector<8x1xf32>
    %42 = arith.divf %40, %41 : vector<8x1xf32>
    %43 = vector.broadcast %35 : vector<8x1xf32> to vector<8x32xf32>
    %44 = arith.subf %5, %43 : vector<8x32xf32>
    %cst_21 = arith.constant 9.99999997E-7 : f32
    %45 = vector.broadcast %cst_21 : f32 to vector<8x1xf32>
    %46 = arith.addf %42, %45 : vector<8x1xf32>
    %47 = math.rsqrt %46 : vector<8x1xf32>
    %48 = vector.broadcast %47 : vector<8x1xf32> to vector<8x32xf32>
    %49 = arith.mulf %44, %48 : vector<8x32xf32>
    %50 = vector.broadcast %30 : vector<1x32xf32> to vector<8x32xf32>
    %51 = arith.mulf %49, %50 : vector<8x32xf32>
    %52 = vector.broadcast %31 : vector<1x32xf32> to vector<8x32xf32>
    %53 = arith.addf %51, %52 : vector<8x32xf32>
    %54 = arith.truncf %29 : vector<8x32xf32> to vector<8x32xbf16>
    %c0_22 = arith.constant 0 : index
    %c0_23 = arith.constant 0 : index
    %55 = vector.load %arg6[%c0_22, %c0_23] : memref<32x32xbf16, #tpu.memory_space<vmem>>, vector<32x32xbf16>
    %cst_24 = arith.constant dense<0.000000e+00> : vector<8x32xf32>
    %56 = tpu.matmul %54, %55, %cst_24 {dimension_numbers = #tpu.dot_dimension_numbers<[1], [0], [0], [1], [0, 0, 1, 1], [], []>} : vector<8x32xbf16>, vector<32x32xbf16>, vector<8x32xf32> -> vector<8x32xf32>
    %c0_25 = arith.constant 0 : index
    %c0_26 = arith.constant 0 : index
    %57 = vector.load %arg7[%c0_25, %c0_26] : memref<1x32xf32, #tpu.memory_space<vmem>>, vector<1x32xf32>
    %58 = vector.broadcast %57 : vector<1x32xf32> to vector<8x32xf32>
    %59 = arith.addf %56, %58 : vector<8x32xf32>
    %60 = arith.truncf %53 : vector<8x32xf32> to vector<8x32xbf16>
    %c0_27 = arith.constant 0 : index
    %c0_28 = arith.constant 0 : index
    %61 = vector.load %arg8[%c0_27, %c0_28] : memref<32x64xbf16, #tpu.memory_space<vmem>>, vector<32x64xbf16>
    %cst_29 = arith.constant dense<0.000000e+00> : vector<8x64xf32>
    %62 = tpu.matmul %60, %61, %cst_29 {dimension_numbers = #tpu.dot_dimension_numbers<[1], [0], [0], [1], [0, 0, 1, 1], [], []>} : vector<8x32xbf16>, vector<32x64xbf16>, vector<8x64xf32> -> vector<8x64xf32>
    %c0_30 = arith.constant 0 : index
    %c0_31 = arith.constant 0 : index
    %63 = vector.load %arg9[%c0_30, %c0_31] : memref<1x64xf32, #tpu.memory_space<vmem>>, vector<1x64xf32>
    %64 = vector.broadcast %63 : vector<1x64xf32> to vector<8x64xf32>
    %65 = arith.addf %62, %64 : vector<8x64xf32>
    %66 = vector.extract_strided_slice %65 {offsets = [0, 0], sizes = [8, 32], strides = [1, 1]} : vector<8x64xf32> to vector<8x32xf32>
    %67 = vector.extract_strided_slice %65 {offsets = [0, 32], sizes = [8, 32], strides = [1, 1]} : vector<8x64xf32> to vector<8x32xf32>
    %68 = vector.extract_strided_slice %59 {offsets = [0, 0], sizes = [8, 8], strides = [1, 1]} : vector<8x32xf32> to vector<8x8xf32>
    %69 = vector.extract_strided_slice %59 {offsets = [0, 8], sizes = [8, 8], strides = [1, 1]} : vector<8x32xf32> to vector<8x8xf32>
    %70 = vector.extract_strided_slice %59 {offsets = [0, 16], sizes = [8, 8], strides = [1, 1]} : vector<8x32xf32> to vector<8x8xf32>
    %71 = vector.extract_strided_slice %59 {offsets = [0, 24], sizes = [8, 8], strides = [1, 1]} : vector<8x32xf32> to vector<8x8xf32>
    %72 = vector.shape_cast %68 : vector<8x8xf32> to vector<1x8x8xf32>
    %73 = vector.shape_cast %69 : vector<8x8xf32> to vector<1x8x8xf32>
    %74 = vector.shape_cast %70 : vector<8x8xf32> to vector<1x8x8xf32>
    %75 = vector.shape_cast %71 : vector<8x8xf32> to vector<1x8x8xf32>
    %76 = tpu.concatenate %72, %73, %74, %75 in 0 : vector<1x8x8xf32>, vector<1x8x8xf32>, vector<1x8x8xf32>, vector<1x8x8xf32> -> vector<4x8x8xf32>
    %77 = arith.truncf %76 : vector<4x8x8xf32> to vector<4x8x8xbf16>
    %78 = vector.extract_strided_slice %66 {offsets = [0, 0], sizes = [8, 8], strides = [1, 1]} : vector<8x32xf32> to vector<8x8xf32>
    %79 = vector.extract_strided_slice %66 {offsets = [0, 8], sizes = [8, 8], strides = [1, 1]} : vector<8x32xf32> to vector<8x8xf32>
    %80 = vector.extract_strided_slice %66 {offsets = [0, 16], sizes = [8, 8], strides = [1, 1]} : vector<8x32xf32> to vector<8x8xf32>
    %81 = vector.extract_strided_slice %66 {offsets = [0, 24], sizes = [8, 8], strides = [1, 1]} : vector<8x32xf32> to vector<8x8xf32>
    %82 = vector.shape_cast %78 : vector<8x8xf32> to vector<1x8x8xf32>
    %83 = vector.shape_cast %79 : vector<8x8xf32> to vector<1x8x8xf32>
    %84 = vector.shape_cast %80 : vector<8x8xf32> to vector<1x8x8xf32>
    %85 = vector.shape_cast %81 : vector<8x8xf32> to vector<1x8x8xf32>
    %86 = tpu.concatenate %82, %83, %84, %85 in 0 : vector<1x8x8xf32>, vector<1x8x8xf32>, vector<1x8x8xf32>, vector<1x8x8xf32> -> vector<4x8x8xf32>
    %87 = arith.truncf %86 : vector<4x8x8xf32> to vector<4x8x8xbf16>
    %88 = vector.extract_strided_slice %67 {offsets = [0, 0], sizes = [8, 8], strides = [1, 1]} : vector<8x32xf32> to vector<8x8xf32>
    %89 = vector.extract_strided_slice %67 {offsets = [0, 8], sizes = [8, 8], strides = [1, 1]} : vector<8x32xf32> to vector<8x8xf32>
    %90 = vector.extract_strided_slice %67 {offsets = [0, 16], sizes = [8, 8], strides = [1, 1]} : vector<8x32xf32> to vector<8x8xf32>
    %91 = vector.extract_strided_slice %67 {offsets = [0, 24], sizes = [8, 8], strides = [1, 1]} : vector<8x32xf32> to vector<8x8xf32>
    %92 = vector.shape_cast %88 : vector<8x8xf32> to vector<1x8x8xf32>
    %93 = vector.shape_cast %89 : vector<8x8xf32> to vector<1x8x8xf32>
    %94 = vector.shape_cast %90 : vector<8x8xf32> to vector<1x8x8xf32>
    %95 = vector.shape_cast %91 : vector<8x8xf32> to vector<1x8x8xf32>
    %96 = tpu.concatenate %92, %93, %94, %95 in 0 : vector<1x8x8xf32>, vector<1x8x8xf32>, vector<1x8x8xf32>, vector<1x8x8xf32> -> vector<4x8x8xf32>
    %97 = arith.truncf %96 : vector<4x8x8xf32> to vector<4x8x8xbf16>
    %c8_i32 = arith.constant 8 : i32
    %98 = arith.muli %arg1, %c8_i32 : i32
    %99 = tpu.iota {dimensions = array<i32: 0>} : vector<8x8xi32>
    %100 = vector.broadcast %98 : i32 to vector<8x8xi32>
    %101 = arith.addi %100, %99 : vector<8x8xi32>
    %102 = tpu.iota {dimensions = array<i32: 1>} : vector<8x8xi32>
    %103 = arith.cmpi sle, %102, %101 : vector<8x8xi32>
    %104 = vector.shape_cast %103 : vector<8x8xi1> to vector<1x8x8xi1>
    "tpu.trace_start"() <{level = 10 : i32, message = "hqd,hkd->hqk"}> : () -> ()
    %cst_32 = arith.constant dense<0.000000e+00> : vector<4x8x8xf32>
    %105 = tpu.matmul %77, %87, %cst_32 {dimension_numbers = #tpu.dot_dimension_numbers<[2], [2], [1], [1], [0, 0, 0, 1, 1, 1], [0], [0]>} : vector<4x8x8xbf16>, vector<4x8x8xbf16>, vector<4x8x8xf32> -> vector<4x8x8xf32>
    "tpu.trace_stop"() : () -> ()
    %cst_33 = arith.constant 0.353553385 : f32
    %106 = vector.broadcast %cst_33 : f32 to vector<4x8x8xf32>
    %107 = arith.mulf %105, %106 : vector<4x8x8xf32>
    %cst_34 = arith.constant -1.000000e+30 : f32
    %108 = vector.shape_cast %104 : vector<1x8x8xi1> to vector<1x8x8xi1>
    %109 = vector.broadcast %108 : vector<1x8x8xi1> to vector<4x8x8xi1>
    %110 = vector.broadcast %cst_34 : f32 to vector<4x8x8xf32>
    %111 = arith.select %109, %107, %110 : vector<4x8x8xi1>, vector<4x8x8xf32>
    %cst_35 = arith.constant dense<0xFF800000> : vector<4x8xf32>
    %112 = vector.multi_reduction <maximumf>, %111, %cst_35 [2] : vector<4x8x8xf32> to vector<4x8xf32>
    %113 = vector.shape_cast %112 : vector<4x8xf32> to vector<4x8x1xf32>
    %114 = vector.broadcast %113 : vector<4x8x1xf32> to vector<4x8x8xf32>
    %115 = arith.subf %111, %114 : vector<4x8x8xf32>
    %116 = math.exp %115 : vector<4x8x8xf32>
    %cst_36 = arith.constant dense<0.000000e+00> : vector<4x8xf32>
    %117 = vector.multi_reduction <add>, %116, %cst_36 [2] : vector<4x8x8xf32> to vector<4x8xf32>
    %118 = vector.shape_cast %117 : vector<4x8xf32> to vector<4x8x1xf32>
    %119 = tpu.reciprocal %118 {approx = true} : vector<4x8x1xf32> -> vector<4x8x1xf32>
    %120 = vector.broadcast %119 : vector<4x8x1xf32> to vector<4x8x8xf32>
    %121 = arith.mulf %116, %120 : vector<4x8x8xf32>
    %122 = arith.truncf %121 : vector<4x8x8xf32> to vector<4x8x8xbf16>
    "tpu.trace_start"() <{level = 10 : i32, message = "hqk,hkd->hqd"}> : () -> ()
    %cst_37 = arith.constant dense<0.000000e+00> : vector<4x8x8xf32>
    %123 = tpu.matmul %122, %97, %cst_37 {dimension_numbers = #tpu.dot_dimension_numbers<[2], [1], [1], [2], [0, 0, 0, 1, 1, 2], [0], [0]>} : vector<4x8x8xbf16>, vector<4x8x8xbf16>, vector<4x8x8xf32> -> vector<4x8x8xf32>
    "tpu.trace_stop"() : () -> ()
    %124 = vector.extract_strided_slice %123 {offsets = [0, 0, 0], sizes = [1, 8, 8], strides = [1, 1, 1]} : vector<4x8x8xf32> to vector<1x8x8xf32>
    %125 = vector.shape_cast %124 : vector<1x8x8xf32> to vector<8x8xf32>
    %126 = vector.extract_strided_slice %123 {offsets = [1, 0, 0], sizes = [1, 8, 8], strides = [1, 1, 1]} : vector<4x8x8xf32> to vector<1x8x8xf32>
    %127 = vector.shape_cast %126 : vector<1x8x8xf32> to vector<8x8xf32>
    %128 = vector.extract_strided_slice %123 {offsets = [2, 0, 0], sizes = [1, 8, 8], strides = [1, 1, 1]} : vector<4x8x8xf32> to vector<1x8x8xf32>
    %129 = vector.shape_cast %128 : vector<1x8x8xf32> to vector<8x8xf32>
    %130 = vector.extract_strided_slice %123 {offsets = [3, 0, 0], sizes = [1, 8, 8], strides = [1, 1, 1]} : vector<4x8x8xf32> to vector<1x8x8xf32>
    %131 = vector.shape_cast %130 : vector<1x8x8xf32> to vector<8x8xf32>
    %132 = tpu.concatenate %125, %127, %129, %131 in 1 : vector<8x8xf32>, vector<8x8xf32>, vector<8x8xf32>, vector<8x8xf32> -> vector<8x32xf32>
    %133 = arith.truncf %132 : vector<8x32xf32> to vector<8x32xbf16>
    %c0_38 = arith.constant 0 : index
    %c0_39 = arith.constant 0 : index
    %134 = vector.load %arg10[%c0_38, %c0_39] : memref<32x32xbf16, #tpu.memory_space<vmem>>, vector<32x32xbf16>
    %cst_40 = arith.constant dense<0.000000e+00> : vector<8x32xf32>
    %135 = tpu.matmul %133, %134, %cst_40 {dimension_numbers = #tpu.dot_dimension_numbers<[1], [0], [0], [1], [0, 0, 1, 1], [], []>} : vector<8x32xbf16>, vector<32x32xbf16>, vector<8x32xf32> -> vector<8x32xf32>
    %c0_41 = arith.constant 0 : index
    %c0_42 = arith.constant 0 : index
    %136 = vector.load %arg11[%c0_41, %c0_42] : memref<1x32xf32, #tpu.memory_space<vmem>>, vector<1x32xf32>
    %137 = vector.broadcast %136 : vector<1x32xf32> to vector<8x32xf32>
    %138 = arith.addf %135, %137 : vector<8x32xf32>
    %139 = arith.addf %29, %138 : vector<8x32xf32>
    %c0_43 = arith.constant 0 : index
    %c0_44 = arith.constant 0 : index
    %140 = vector.load %arg12[%c0_43, %c0_44] : memref<1x32xf32, #tpu.memory_space<vmem>>, vector<1x32xf32>
    %c0_45 = arith.constant 0 : index
    %c0_46 = arith.constant 0 : index
    %141 = vector.load %arg13[%c0_45, %c0_46] : memref<1x32xf32, #tpu.memory_space<vmem>>, vector<1x32xf32>
    %cst_47 = arith.constant dense<0.000000e+00> : vector<8xf32>
    %142 = vector.multi_reduction <add>, %139, %cst_47 [1] : vector<8x32xf32> to vector<8xf32>
    %143 = vector.shape_cast %142 : vector<8xf32> to vector<8x1xf32>
    %cst_48 = arith.constant 3.200000e+01 : f32
    %144 = vector.broadcast %cst_48 : f32 to vector<8x1xf32>
    %145 = arith.divf %143, %144 : vector<8x1xf32>
    %146 = vector.broadcast %145 : vector<8x1xf32> to vector<8x32xf32>
    %147 = arith.subf %139, %146 : vector<8x32xf32>
    %148 = arith.mulf %147, %147 : vector<8x32xf32>
    %cst_49 = arith.constant dense<0.000000e+00> : vector<8xf32>
    %149 = vector.multi_reduction <add>, %148, %cst_49 [1] : vector<8x32xf32> to vector<8xf32>
    %150 = vector.shape_cast %149 : vector<8xf32> to vector<8x1xf32>
    %cst_50 = arith.constant 3.200000e+01 : f32
    %151 = vector.broadcast %cst_50 : f32 to vector<8x1xf32>
    %152 = arith.divf %150, %151 : vector<8x1xf32>
    %153 = vector.broadcast %145 : vector<8x1xf32> to vector<8x32xf32>
    %154 = arith.subf %139, %153 : vector<8x32xf32>
    %cst_51 = arith.constant 9.99999997E-7 : f32
    %155 = vector.broadcast %cst_51 : f32 to vector<8x1xf32>
    %156 = arith.addf %152, %155 : vector<8x1xf32>
    %157 = math.rsqrt %156 : vector<8x1xf32>
    %158 = vector.broadcast %157 : vector<8x1xf32> to vector<8x32xf32>
    %159 = arith.mulf %154, %158 : vector<8x32xf32>
    %160 = vector.broadcast %140 : vector<1x32xf32> to vector<8x32xf32>
    %161 = arith.mulf %159, %160 : vector<8x32xf32>
    %162 = vector.broadcast %141 : vector<1x32xf32> to vector<8x32xf32>
    %163 = arith.addf %161, %162 : vector<8x32xf32>
    %164 = arith.truncf %163 : vector<8x32xf32> to vector<8x32xbf16>
    %c0_52 = arith.constant 0 : index
    %c0_53 = arith.constant 0 : index
    %165 = vector.load %arg14[%c0_52, %c0_53] : memref<32x64xbf16, #tpu.memory_space<vmem>>, vector<32x64xbf16>
    %cst_54 = arith.constant dense<0.000000e+00> : vector<8x64xf32>
    %166 = tpu.matmul %164, %165, %cst_54 {dimension_numbers = #tpu.dot_dimension_numbers<[1], [0], [0], [1], [0, 0, 1, 1], [], []>} : vector<8x32xbf16>, vector<32x64xbf16>, vector<8x64xf32> -> vector<8x64xf32>
    %c0_55 = arith.constant 0 : index
    %c0_56 = arith.constant 0 : index
    %167 = vector.load %arg15[%c0_55, %c0_56] : memref<1x64xf32, #tpu.memory_space<vmem>>, vector<1x64xf32>
    %168 = vector.broadcast %167 : vector<1x64xf32> to vector<8x64xf32>
    %169 = arith.addf %166, %168 : vector<8x64xf32>
    %cst_57 = arith.constant 5.000000e-01 : f32
    %170 = vector.broadcast %cst_57 : f32 to vector<8x64xf32>
    %171 = arith.mulf %170, %169 : vector<8x64xf32>
    %cst_58 = arith.constant 4.471500e-02 : f32
    %172 = vector.broadcast %cst_58 : f32 to vector<8x64xf32>
    %173 = arith.mulf %172, %169 : vector<8x64xf32>
    %174 = arith.mulf %173, %169 : vector<8x64xf32>
    %175 = arith.mulf %174, %169 : vector<8x64xf32>
    %176 = arith.addf %169, %175 : vector<8x64xf32>
    %cst_59 = arith.constant 0.797884583 : f32
    %177 = vector.broadcast %cst_59 : f32 to vector<8x64xf32>
    %178 = arith.mulf %177, %176 : vector<8x64xf32>
    %179 = math.tanh %178 : vector<8x64xf32>
    %cst_60 = arith.constant 1.000000e+00 : f32
    %180 = vector.broadcast %cst_60 : f32 to vector<8x64xf32>
    %181 = arith.addf %180, %179 : vector<8x64xf32>
    %182 = arith.mulf %171, %181 : vector<8x64xf32>
    %183 = arith.truncf %182 : vector<8x64xf32> to vector<8x64xbf16>
    %c0_61 = arith.constant 0 : index
    %c0_62 = arith.constant 0 : index
    %184 = vector.load %arg16[%c0_61, %c0_62] : memref<64x32xbf16, #tpu.memory_space<vmem>>, vector<64x32xbf16>
    %cst_63 = arith.constant dense<0.000000e+00> : vector<8x32xf32>
    %185 = tpu.matmul %183, %184, %cst_63 {dimension_numbers = #tpu.dot_dimension_numbers<[1], [0], [0], [1], [0, 0, 1, 1], [], []>} : vector<8x64xbf16>, vector<64x32xbf16>, vector<8x32xf32> -> vector<8x32xf32>
    %c0_64 = arith.constant 0 : index
    %c0_65 = arith.constant 0 : index
    %186 = vector.load %arg17[%c0_64, %c0_65] : memref<1x32xf32, #tpu.memory_space<vmem>>, vector<1x32xf32>
    %187 = vector.broadcast %186 : vector<1x32xf32> to vector<8x32xf32>
    %188 = arith.addf %185, %187 : vector<8x32xf32>
    %189 = arith.addf %163, %188 : vector<8x32xf32>
    %190 = arith.truncf %189 : vector<8x32xf32> to vector<8x32xbf16>
    %c0_66 = arith.constant 0 : index
    %c0_67 = arith.constant 0 : index
    %c0_68 = arith.constant 0 : index
    %191 = vector.load %arg18[%c0_66, %c0_67, %c0_68] : memref<1x8x32xbf16, #tpu.memory_space<vmem>>, vector<1x8x32xbf16>
    %192 = vector.shape_cast %191 : vector<1x8x32xbf16> to vector<8x32xbf16>
    %193 = vector.shape_cast %190 : vector<8x32xbf16> to vector<1x8x32xbf16>
    tpu.vector_store %arg18[%c0_66, %c0_67, %c0_68], %193 {strides = array<i32>} : memref<1x8x32xbf16, #tpu.memory_space<vmem>>, vector<1x8x32xbf16>,
    return
  }
  func.func @transform_0(%arg0: i32, %arg1: i32) -> (i32, i32, i32) {
    %c0_i32 = arith.constant 0 : i32
    %c0_i32_0 = arith.constant 0 : i32
    return %arg0, %arg1, %c0_i32 : i32, i32, i32
  }
  func.func @transform_1(%arg0: i32, %arg1: i32) -> (i32, i32, i32) {
    %c0_i32 = arith.constant 0 : i32
    %c0_i32_0 = arith.constant 0 : i32
    %c0_i32_1 = arith.constant 0 : i32
    return %arg0, %c0_i32, %c0_i32_0 : i32, i32, i32
  }
  func.func @transform_2(%arg0: i32, %arg1: i32) -> (i32, i32) {
    %c0_i32 = arith.constant 0 : i32
    %c0_i32_0 = arith.constant 0 : i32
    %c0_i32_1 = arith.constant 0 : i32
    return %c0_i32, %c0_i32_0 : i32, i32
  }
  func.func @transform_3(%arg0: i32, %arg1: i32) -> (i32, i32) {
    %c0_i32 = arith.constant 0 : i32
    %c0_i32_0 = arith.constant 0 : i32
    %c0_i32_1 = arith.constant 0 : i32
    return %c0_i32, %c0_i32_0 : i32, i32
  }
  func.func @transform_4(%arg0: i32, %arg1: i32) -> (i32, i32) {
    %c0_i32 = arith.constant 0 : i32
    %c0_i32_0 = arith.constant 0 : i32
    %c0_i32_1 = arith.constant 0 : i32
    return %c0_i32, %c0_i32_0 : i32, i32
  }
  func.func @transform_5(%arg0: i32, %arg1: i32) -> (i32, i32) {
    %c0_i32 = arith.constant 0 : i32
    %c0_i32_0 = arith.constant 0 : i32
    %c0_i32_1 = arith.constant 0 : i32
    return %c0_i32, %c0_i32_0 : i32, i32
  }
  func.func @transform_6(%arg0: i32, %arg1: i32) -> (i32, i32) {
    %c0_i32 = arith.constant 0 : i32
    %c0_i32_0 = arith.constant 0 : i32
    %c0_i32_1 = arith.constant 0 : i32
    return %c0_i32, %c0_i32_0 : i32, i32
  }
  func.func @transform_7(%arg0: i32, %arg1: i32) -> (i32, i32) {
    %c0_i32 = arith.constant 0 : i32
    %c0_i32_0 = arith.constant 0 : i32
    %c0_i32_1 = arith.constant 0 : i32
    return %c0_i32, %c0_i32_0 : i32, i32
  }
  func.func @transform_8(%arg0: i32, %arg1: i32) -> (i32, i32) {
    %c0_i32 = arith.constant 0 : i32
    %c0_i32_0 = arith.constant 0 : i32
    %c0_i32_1 = arith.constant 0 : i32
    return %c0_i32, %c0_i32_0 : i32, i32
  }
  func.func @transform_9(%arg0: i32, %arg1: i32) -> (i32, i32) {
    %c0_i32 = arith.constant 0 : i32
    %c0_i32_0 = arith.constant 0 : i32
    %c0_i32_1 = arith.constant 0 : i32
    return %c0_i32, %c0_i32_0 : i32, i32
  }
  func.func @transform_10(%arg0: i32, %arg1: i32) -> (i32, i32) {
    %c0_i32 = arith.constant 0 : i32
    %c0_i32_0 = arith.constant 0 : i32
    %c0_i32_1 = arith.constant 0 : i32
    return %c0_i32, %c0_i32_0 : i32, i32
  }
  func.func @transform_11(%arg0: i32, %arg1: i32) -> (i32, i32) {
    %c0_i32 = arith.constant 0 : i32
    %c0_i32_0 = arith.constant 0 : i32
    %c0_i32_1 = arith.constant 0 : i32
    return %c0_i32, %c0_i32_0 : i32, i32
  }
  func.func @transform_12(%arg0: i32, %arg1: i32) -> (i32, i32) {
    %c0_i32 = arith.constant 0 : i32
    %c0_i32_0 = arith.constant 0 : i32
    %c0_i32_1 = arith.constant 0 : i32
    return %c0_i32, %c0_i32_0 : i32, i32
  }
  func.func @transform_13(%arg0: i32, %arg1: i32) -> (i32, i32) {
    %c0_i32 = arith.constant 0 : i32
    %c0_i32_0 = arith.constant 0 : i32
    %c0_i32_1 = arith.constant 0 : i32
    return %c0_i32, %c0_i32_0 : i32, i32
  }
  func.func @transform_14(%arg0: i32, %arg1: i32) -> (i32, i32) {
    %c0_i32 = arith.constant 0 : i32
    %c0_i32_0 = arith.constant 0 : i32
    %c0_i32_1 = arith.constant 0 : i32
    return %c0_i32, %c0_i32_0 : i32, i32
  }
  func.func @transform_15(%arg0: i32, %arg1: i32) -> (i32, i32) {
    %c0_i32 = arith.constant 0 : i32
    %c0_i32_0 = arith.constant 0 : i32
    %c0_i32_1 = arith.constant 0 : i32
    return %c0_i32, %c0_i32_0 : i32, i32
  }
  func.func @transform_16(%arg0: i32, %arg1: i32) -> (i32, i32, i32) {
    %c0_i32 = arith.constant 0 : i32
    %c0_i32_0 = arith.constant 0 : i32
    return %arg0, %arg1, %c0_i32 : i32, i32, i32
  }
}

</mosaic_0001>

<bundles_post_ra>
// kernel: tpu_custom_call.1
= control target key start
LH: loop header
LB: loop body
LE: loop exit
PB: predicated region body
PF: predicated region fallthrough
CT: control target
= control target key end

     0   :  { %s2887_s0 = inlined_call_operand.hbm [shape: bf16[2,8,32], index: 0, kind: input, shape index: {}]   ;;  %s2888_s1 = inlined_call_operand.hbm [shape: bf16[2,8,32], index: 1, kind: input, shape index: {}]   ;;  %s2889_s2 = inlined_call_operand.hbm [shape: f32[1,32], index: 2, kind: input, shape index: {}]   ;;  %s2890_s3 = inlined_call_operand.hbm [shape: f32[1,32], index: 3, kind: input, shape index: {}]   ;;  %s2891_s4 = inlined_call_operand.vmem [shape: bf16[32,32], index: 4, kind: input, shape index: {}]   ;;  %s2892_s5 = inlined_call_operand.hbm [shape: f32[1,32], index: 5, kind: input, shape index: {}]   ;;  %s2893_s6 = inlined_call_operand.vmem [shape: bf16[32,64], index: 6, kind: input, shape index: {}]   ;;  %s2894_s7 = inlined_call_operand.hbm [shape: f32[1,64], index: 7, kind: input, shape index: {}]   ;;  %s2895_s8 = inlined_call_operand.vmem [shape: bf16[32,32], index: 8, kind: input, shape index: {}]   ;;  %s2896_s9 = inlined_call_operand.hbm [shape: f32[1,32], index: 9, kind: input, shape index: {}]   ;;  %s2897_s10 = inlined_call_operand.vmem [shape: f32[1,32], index: 10, kind: input, shape index: {}]   ;;  %s2898_s11 = inlined_call_operand.vmem [shape: f32[1,32], index: 11, kind: input, shape index: {}]   ;;  %s2899_s12 = inlined_call_operand.vmem [shape: bf16[32,64], index: 12, kind: input, shape index: {}]   ;;  %s2900_s13 = inlined_call_operand.vmem [shape: f32[1,64], index: 13, kind: input, shape index: {}]   ;;  %s2901_s14 = inlined_call_operand.vmem [shape: bf16[64,32], index: 14, kind: input, shape index: {}]   ;;  %s2902_s15 = inlined_call_operand.vmem [shape: f32[1,32], index: 15, kind: input, shape index: {}]   ;;  %s2903_s16 = inlined_call_operand.hbm [shape: bf16[2,8,32], index: 16, kind: output, shape index: {}]  }
   0x1   :  { %2911 = sst [smem:[#allocation27_spill]] %s2887_s0 }
   0x2   :  { %2912 = sst [smem:[#allocation28_spill]] %s2889_s2 }
   0x3   :  { %2913 = sst [smem:[#allocation29_spill]] %s2890_s3 }
   0x4   :  { %2914 = sst [smem:[#allocation30_spill]] %s2892_s5 }
   0x5   :  { %2915 = sst [smem:[#allocation31_spill]] %s2894_s7 }
   0x6   :  { %2916 = sst [smem:[#allocation32_spill]] %s2896_s9 }
   0x7   :  { %2917 = sst [smem:[#allocation33_spill]] %s2900_s13 }
   0x8   :  { %2918 = sst [smem:[#allocation34_spill]] %s2902_s15 }
   0x9   :  { %2919 = sst [smem:[#allocation35_spill]] %s2903_s16 }
   0xa   :  { %21 = vsyncpa [#allocation3], 0 }
   0xb   :  { %23 = vsyncpa [#allocation3 + $0x1], 0 }
   0xc   :  { %24 = vsyncpa [#allocation6], 0 }
   0xd   :  { %26 = vsyncpa [#allocation6 + $0x1], 0 }
   0xe   :  { %27 = vsyncpa [#allocation9], 0 }
   0xf   :  { %28 = vsyncpa [#allocation12], 0 }
  0x10   :  { %29 = vsyncpa [#allocation4], 0 }
  0x11   :  { %31 = vsyncpa [#allocation4 + $0x1], 0  ;;  %s2491_s21 = smov 0   ;;  %s2493_s22 = smov 0  }
  0x12   :  { %s2495_s23 = smov 0   ;;  %s2497_s24 = smov 0  }
  0x13   :  { %s2499_s25 = smov 0   ;;  %s2501_s26 = smov 0  }
  0x14 LB: > { %2920 = sst [smem:[#allocation21_spill]] %s2375_s23  ;;  %s2522_s27 = sadd.s32 4294967295, %s2387_s26   ;;  %s2387_s26 = sphi %s2501_s26, %s37_s26   ;;  %s2383_s25 = sphi %s2499_s25, %s2957_s25   ;;  %s2379_s24 = sphi %s2497_s24, %s2956_s24   ;;  %s2375_s23 = sphi %s2495_s23, %s2955_s23   ;;  %s2371_s22 = sphi %s2493_s22, %s2959_s22   ;;  %s2367_s21 = sphi %s2491_s21, %s2958_s21  }
  0x15   : > { %2921 = sst [smem:[#allocation22_spill]] %s2379_s24  ;;  %p1759_p0 = scmp.ge.s32.totalorder %s2387_s26, 1 }
  0x16   : > { %2922 = sst [smem:[#allocation23_spill]] %s2383_s25  ;;  %p2905_p1 = scmp.eq.s32.totalorder %s2522_s27, 0 }
  0x17   : > { %p430_p2 = scmp.lt.s32.totalorder %s2387_s26, 3  ;;  %s2389_s29 = smov [#allocation7]  }
  0x18   : > { %s443_s30 = sshll.u32 %s2389_s29, 4  ;;  %s2390_s0 = smov [#allocation8]   ;;  %s444_s30 = int_to_ptr.vmem [resolvable:$true] %s443_s30 }
  0x19   : > { %p2527_p3 = pnand %p1759_p0, %p430_p2  ;;  %s454_s17 = sshll.u32 %s2390_s0, 4  ;;  %s455_s17 = int_to_ptr.vmem [resolvable:$true] %s454_s17 }
  0x1a   : > { %s2391_s19 = smov [#allocation11]   ;;  %s2116_s16 = scalar_lea.vmem %s444_s30, 16 }
  0x1b   : > { %s2923_s28 = scalar_select %p2527_p3, 1, 0 }
  0x1c   : > { %p1968_p5 = pneg %p2527_p3  ;;  %s482_s20 = sshll.u32 %s2391_s19, 4  ;;  %s2540_s20 = int_to_ptr.vmem [resolvable:$true] %s482_s20 }
  0x1d   : > { %p2117_p8 = scmp.ne.s32.totalorder %s444_s30, %s2116_s16  ;;  %s2123_s0 = scalar_lea.vmem %s444_s30, 32 }
  0x1e   : > { %p2536_p6 = pnand %p1968_p5, %p2905_p1  ;;  %p2124_p11 = scmp.lt.s32.totalorder %s444_s30, %s444_s30 }
  0x1f   : > { %p2125_p12 = scmp.lt.s32.totalorder %s2123_s0, %s2116_s16 }
  0x20   : > { %p2544_p7 = pneg %p2536_p6 }
  0x21   : > { %p2126_p13 = por %p2125_p12, %p2124_p11 }
  0x22   : > { %p2119_p9 = pnand %p2117_p8, %p2544_p7 }
  0x24   : > { %p2120_p10 = pneg %p2119_p9 }
  0x26   : > { %p2127_p0 = pnand %p2126_p13, %p2120_p10 }
  0x28   : > { %2130 = shalt.err (!%p2127_p0)
}
  0x29   : > { %s2926_s2 = sld [smem:[#allocation28_spill]]  ;;  %s2142_s24 = scalar_lea.vmem %s455_s17, 16 }
  0x2a   : > { %p2143_p2 = scmp.ne.s32.totalorder %s455_s17, %s2142_s24  ;;  %s2149_s13 = scalar_lea.vmem %s455_s17, 32 }
  0x2b   : > { %p2150_p8 = scmp.lt.s32.totalorder %s455_s17, %s455_s17  ;;  %p2151_p9 = scmp.lt.s32.totalorder %s2149_s13, %s2142_s24 }
  0x2c   : > { %p2145_p5 = pnand %p2143_p2, %p2544_p7 }
  0x2d   : > { %p2152_p1 = por %p2151_p9, %p2150_p8 }
  0x2e   : > { %p2146_p4 = pneg %p2145_p5 }
  0x2f   : > { %1971 = dma.hbm_to_vmem [thread:$0]  (!%p2536_p6), %s2926_s2, 16, %s444_s30, [#allocation6]  }
  0x30   : > { %p2153_p3 = pnand %p2152_p1, %p2146_p4 }
  0x32   : > { %2156 = shalt.err (!%p2153_p3)
}
  0x33   : > { %s2927_s3 = sld [smem:[#allocation29_spill]]  ;;  %s2168_s15 = scalar_lea.vmem %s2540_s20, 16 }
  0x34   : > { %p2169_p10 = scmp.ne.s32.totalorder %s2540_s20, %s2168_s15  ;;  %s2175_s13 = scalar_lea.vmem %s2540_s20, 32 }
  0x35   : > { %p2176_p1 = scmp.lt.s32.totalorder %s2540_s20, %s2540_s20  ;;  %p2177_p3 = scmp.lt.s32.totalorder %s2175_s13, %s2168_s15 }
  0x36   : > { %p2171_p11 = pnand %p2169_p10, %p2544_p7 }
  0x37   : > { %p2178_p4 = por %p2177_p3, %p2176_p1 }
  0x38   : > { %p2172_p12 = pneg %p2171_p11 }
  0x39   : > { %1974 = dma.hbm_to_vmem [thread:$0]  (!%p2536_p6), %s2927_s3, 16, %s455_s17, [#allocation9]  }
  0x3a   : > { %p2179_p13 = pnand %p2178_p4, %p2172_p12 }
  0x3c   : > { %2182 = shalt.err (!%p2179_p13)
}
  0x3d   : > { %s2928_s7 = sld [smem:[#allocation31_spill]]  ;;  %s2392_s17 = smov [#allocation10]  }
  0x3e   : > { %s468_s19 = sshll.u32 %s2392_s17, 4  ;;  %s2393_s16 = smov [#allocation13]   ;;  %s469_s19 = int_to_ptr.vmem [resolvable:$true] %s468_s19 }
  0x3f   : > { %s496_s0 = sshll.u32 %s2393_s16, 4  ;;  %s2194_s2 = scalar_lea.vmem %s469_s19, 16  ;;  %s497_s0 = int_to_ptr.vmem [resolvable:$true] %s496_s0 }
  0x40   : > { %p2195_p0 = scmp.ne.s32.totalorder %s469_s19, %s2194_s2  ;;  %s2201_s15 = scalar_lea.vmem %s469_s19, 32 }
  0x41   : > { %p2202_p8 = scmp.lt.s32.totalorder %s469_s19, %s469_s19  ;;  %p2203_p9 = scmp.lt.s32.totalorder %s2201_s15, %s2194_s2 }
  0x42   : > { %p2197_p2 = pnand %p2195_p0, %p2544_p7 }
  0x43   : > { %1980 = dma.hbm_to_vmem [thread:$0]  (!%p2536_p6), %s2928_s7, 16, %s2540_s20, [#allocation12]  }
  0x44   : > { %p2198_p5 = pneg %p2197_p2  ;;  %p2204_p10 = por %p2203_p9, %p2202_p8 }
  0x46   : > { %p2205_p11 = pnand %p2204_p10, %p2198_p5 }
  0x48   : > { %2208 = shalt.err (!%p2205_p11)
}
  0x49   : > { %s2929_s5 = sld [smem:[#allocation30_spill]]  ;;  %s2220_s24 = scalar_lea.vmem %s497_s0, 16 }
  0x4a   : > { %p2221_p12 = scmp.ne.s32.totalorder %s497_s0, %s2220_s24  ;;  %s2227_s30 = scalar_lea.vmem %s497_s0, 32 }
  0x4b   : > { %p2228_p4 = scmp.lt.s32.totalorder %s497_s0, %s497_s0  ;;  %p2229_p13 = scmp.lt.s32.totalorder %s2227_s30, %s2220_s24 }
  0x4c   : > { %p2223_p1 = pnand %p2221_p12, %p2544_p7 }
  0x4d   : > { %p2230_p0 = por %p2229_p13, %p2228_p4 }
  0x4e   : > { %p2224_p3 = pneg %p2223_p1 }
  0x4f   : > { %1977 = dma.hbm_to_vmem [thread:$0]  (!%p2536_p6), %s2929_s5, 16, %s469_s19, [#allocation9]  }
  0x50   : > { %p2231_p2 = pnand %p2230_p0, %p2224_p3 }
  0x52   : > { %2234 = shalt.err (!%p2231_p2)
}
  0x53   : > { %s2930_s9 = sld [smem:[#allocation32_spill]]  ;;  %s1758_s29 = sadd.s32 4294967294, %s2387_s26  }
  0x54   : > { %s49_s19 = sadd.s32 1, %s2383_s25  ;;  %s58_s18 = sadd.s32 1, %s2375_s23 }
  0x55   : > { %p51_p7 = scmp.ge.s32.totalorder %s49_s19, 2  ;;  %p65_p5 = scmp.ne.s32.totalorder %s2375_s23, %s2371_s22 }
  0x56   : > { %p66_p8 = scmp.eq.s32.totalorder %s2387_s26, 0  ;;  %p71_p9 = scmp.ne.s32.totalorder %s2371_s22, %s2367_s21 }
  0x57   : > { %s2961_s19 = smov (%p51_p7, %s49_s19), 0  ;;  %p2933_p11 = scmp.eq.s32.totalorder %s2522_s27, 0 }
  0x58   : > { %2931 = sst [smem:[#allocation24_spill]] %s2961_s19  ;;  %p2599_p10 = por %p66_p8, %p65_p5 }
  0x59   : > { %1983 = dma.hbm_to_vmem [thread:$0]  (!%p2536_p6), %s2930_s9, 16, %s497_s0, [#allocation12]  }
  0x5a   : > { %p2605_p6 = por %p2933_p11, %p71_p9  ;;  %s53_s15 = ssub.s32 %s2383_s25, %s2961_s19 }
  0x5b   : > { %p417_p12 = scmp.eq.s32.totalorder %s2522_s27, 1  ;;  %p56_p1 = scmp.eq.s32.totalorder %s53_s15, 0 }
  0x5c   : > { %p423_p3 = scmp.eq.s32.totalorder %s1758_s29, 1  ;;  %p2000_p13 = scmp.lt.s32.totalorder %s2387_s26, 2 }
  0x5d   : > { %p2612_p4 = por %p417_p12, %p65_p5  ;;  %s525_s30 = sand.u32 1, %s2375_s23  }
  0x5e   : > { %s2618_s20 = scalar_select %p56_p1, %s2375_s23, %s58_s18  }
  0x5f   : > { %p2620_p0 = por %p423_p3, %p71_p9  ;;  %s1766_s2 = sshll.u32 %s525_s30, 2 }
  0x60   : > { %2936 = sst [smem:[#allocation25_spill]] %s2618_s20  ;;  %s1767_s17 = sshll.u32 %s2383_s25, 6 }
  0x61   : > { %s2937_s24 = scalar_select %p2620_p0, 1, 0 }
  0x62   : > { %s2939_s7 = sld [smem:[#allocation27_spill]]  ;;  %s529_s15 = scalar_lea.vmem [#allocation2], %s1766_s2 }
  0x63   : > { %2938 = sst [smem:[#allocation26_spill]] %s2937_s24  ;;  %s537_s29 = sshll.u32 %s529_s15, 4  ;;  %s538_s29 = int_to_ptr.vmem [resolvable:$true] %s537_s29 }
  0x64   : > { %p2631_p2 = pnand %p2000_p13, %p2599_p10  ;;  %s2638_s23 = scalar_lea.hbm %s2888_s1, %s1767_s17 }
  0x65   : > { %s544_s25 = sand.u32 1, %s2387_s26   ;;  %s526_s24 = scalar_lea.sflag [#allocation3], %s525_s30 }
  0x66   : > { %p2237_p7 = pneg %p2631_p2  ;;  %s2248_s3 = scalar_lea.vmem %s538_s29, 64 }
  0x67   : > { %p2249_p5 = scmp.ne.s32.totalorder %s538_s29, %s2248_s3  ;;  %s2394_s5 = smov [#allocation2]  }
  0x68   : > { %s535_s9 = scalar_lea.hbm %s2939_s7, %s1767_s17  ;;  %s2253_s7 = sshll.u32 %s2394_s5, 4  ;;  %s2254_s7 = int_to_ptr.vmem [resolvable:$false] %s2253_s7 }
  0x69   : > { %p2251_p8 = pnand %p2249_p5, %p2237_p7  ;;  %s2255_s16 = scalar_lea.vmem %s2254_s7, 128 }
  0x6a   : > { %p2256_p10 = scmp.lt.s32.totalorder %s538_s29, %s2254_s7  ;;  %p2257_p11 = scmp.lt.s32.totalorder %s2255_s16, %s2248_s3 }
  0x6b   : > { %p2252_p9 = pneg %p2251_p8 }
  0x6c   : > { %p2258_p12 = por %p2257_p11, %p2256_p10 }
  0x6e   : > { %p2259_p1 = pnand %p2258_p12, %p2252_p9 }
  0x70   : > { %2262 = shalt.err (!%p2259_p1)
}
  0x71   : > { %1987 = dma.hbm_to_vmem [thread:$0]  (!%p2631_p2), %s535_s9, 64, %s538_s29, %s526_s24  }
  0x72   : > { %s548_s20 = scalar_lea.vmem [#allocation5], %s1766_s2  ;;  %s545_s17 = scalar_lea.sflag [#allocation6], %s544_s25 }
  0x73   : > { %s555_s30 = sshll.u32 %s548_s20, 4  ;;  %s2395_s18 = smov [#allocation5]   ;;  %s556_s30 = int_to_ptr.vmem [resolvable:$true] %s555_s30 }
  0x74   : > { %s2276_s15 = scalar_lea.vmem %s556_s30, 64  ;;  %s2281_s5 = sshll.u32 %s2395_s18, 4  ;;  %s2282_s5 = int_to_ptr.vmem [resolvable:$false] %s2281_s5 }
  0x75   : > { %p2277_p3 = scmp.ne.s32.totalorder %s556_s30, %s2276_s15  ;;  %s2283_s3 = scalar_lea.vmem %s2282_s5, 128 }
  0x76   : > { %p2284_p8 = scmp.lt.s32.totalorder %s556_s30, %s2282_s5  ;;  %p2285_p9 = scmp.lt.s32.totalorder %s2283_s3, %s2276_s15 }
  0x77   : > { %p2279_p13 = pnand %p2277_p3, %p2237_p7 }
  0x78   : > { %p2286_p10 = por %p2285_p9, %p2284_p8 }
  0x79   : > { %p2280_p5 = pneg %p2279_p13 }
  0x7b   : > { %p2287_p11 = pnand %p2286_p10, %p2280_p5 }
  0x7d   : > { %2290 = shalt.err (!%p2287_p11)
}
  0x7e   : > { %1990 = dma.hbm_to_vmem [thread:$0]  (!%p2631_p2), %s2638_s23, 64, %s556_s30, %s545_s17  }
  0x7f   : > { %p2941_p12 = scmp.ne.s32.totalorder %s2923_s28, 0 }
  0x80   : > { %s2657_s9 = sand.u32 (!%p2941_p12), 1, %s2371_s22  }
  0x81   : > { %564 = sbr.rel (%p2941_p12) target bundleno = 2611 (0xa33), region = 84  ;;  %s2660_s25 = sshll.u32 (!%p2941_p12), %s2657_s9, 2 }
  0x82   : > { %s567_s24 = scalar_lea.sflag (!%p2941_p12), [#allocation3], %s2657_s9  ;;  %s570_s2 = scalar_lea.vmem (!%p2941_p12), [#allocation2], %s2660_s25 }
  0x86   : > { %2342 = dma.done.wait (%p2605_p6), %s567_s24, 64  }
  0x87   : > { %2344 = vsyncadd (%p2605_p6), %s567_s24, 4294967232  ;;  %s575_s23 = sand.u32 1, %s2522_s27   ;;  %s579_s19 = scalar_lea.vmem [#allocation5], %s2660_s25 }
  0x88   : > { %s576_s28 = scalar_lea.sflag [#allocation6], %s575_s23 }
  0x89   : > { %2346 = dma.done.wait (%p2605_p6), %s576_s28, 64  }
  0x8a   : > { %2348 = vsyncadd (%p2605_p6), %s576_s28, 4294967232  ;;  %p2942_p2 = scmp.eq.s32.totalorder %s2522_s27, 0 }
  0x8c   : > { %2350 = dma.done.wait (%p2942_p2), [#allocation6], 16   ;;  %p2943_p7 = pmov %p2942_p2 }
  0x8d   : > { %p2944_p1 = pmov %p2942_p2 }
  0x8e   : > { %2352 = vsyncadd (%p2943_p7), [#allocation6], 4294967280 }
  0x8f   : > { %2354 = dma.done.wait (%p2944_p1), [#allocation9], 32   ;;  %p2945_p3 = pmov %p2944_p1 }
  0x90   : > { %p2946_p13 = pmov %p2944_p1 }
  0x91   : > { %2356 = vsyncadd (%p2945_p3), [#allocation9], 4294967264 }
  0x92   : > { %2358 = dma.done.wait (%p2946_p13), [#allocation12], 32   ;;  %p2947_p5 = pmov %p2944_p1 }
  0x93   : > { %vm660_vm0 = vcmask 261120   ;;  %v654_v0 = vld [vmem:[%s570_s2] sm:$0xf]  ;;  %v656_v1 = vld [vmem:[%s579_s19] sm:$0xf]  ;;  %v2396_v17 = vmov 0.0  }
  0x94   : > { %2360 = vsyncadd (%p2947_p5), [#allocation12], 4294967264  ;;  %v655_v2 = vunpack.c.l.bf16 %v654_v0  ;;  %v657_v3 = vunpack.c.l.bf16 %v656_v1  ;;  %v2069_v16 = vld [vmem:[%s2891_s4 + $0x8] sm:$0xff]   ;;  %1850 = vmatprep.subr.bf16.mxu1 %v2396_v17  ;;  %vm2397_vm1 = vmmov 0   ;;  %v2070_v18 = vld [vmem:[%s2891_s4] sm:$0xff]   ;;  %1866 = vmatprep.subr.bf16.mxu0 %v2396_v17  ;;  %s2398_s15 = smov 120  }
  0x95   : > { %1854 = vmatprep.mubr.msk.bf16.mxu1 %vm2397_vm1, %v2396_v17  ;;  %1851 = vmatpush3.bf16.msra.mxu1 %v2069_v16  ;;  %v1779_v26 = vld [vmem:[#allocation7] ss:$0 sm:$0xff]  ;;  %v1780_v28 = vld [vmem:[#allocation8] ss:$0 sm:$0xff]  ;;  %v2071_v33 = vld [vmem:[%s2893_s6 + $0x8] sm:$0xff]   ;;  %vm874_vm2 = vcmask 64512  }
  0x96   : > { %v661_v4 = vsel %vm660_vm0, %v655_v2, 0.0  ;;  %v689_v5 = vsel %vm660_vm0, %v657_v3, 0.0  ;;  %1852 = vmatprep.subr.bf16.mxu1 %v2396_v17  ;;  %1868 = vmatprep.mubr.msk.bf16.mxu0 %vm2397_vm1, %v2396_v17  ;;  %v2072_v36 = vld [vmem:[%s2893_s6] sm:$0xff]   ;;  %v1781_v39 = vld [vmem:[#allocation10] ss:$0 sm:$0xff]  ;;  %s2399_s18 = smov 112  }
  0x97   : > { %662 = vadd.xlane.f32.xlu0 %v661_v4  ;;  %v1785_v45 = vld [vmem:[#allocation11] ss:$0 sm:$0xff]  ;;  %s2400_s5 = smov 104   ;;  %s2401_s3 = smov 96   ;;  %vm1123_vm4 = vcmask 1043456   ;;  %vm1327_vm5 = vcmask 130048  }
  0x98   : > { %s2402_s23 = smov 16   ;;  %s2403_s28 = smov 8   ;;  %vm1329_vm6 = vcmask 195584   ;;  %vm1544_vm7 = vcmask 523264   ;;  %vm1590_vm8 = vcmask 257024  }
  0x99   : > { %1853 = vmatpush3.bf16.msra.mxu1 %v2070_v18  ;;  %s2404_s0 = smov 24   ;;  %s2948_s7 = sld [smem:[#allocation33_spill]] }
  0x9a   : > { %1858 = vmatprep.subr.bf16.mxu1 %v2396_v17  ;;  %s2949_s16 = sld [smem:[#allocation22_spill]] }
  0x9b   : > { %690 = vadd.xlane.f32.xlu0 %v689_v5  ;;  %v867_v5 = vlaneseq  ;;  %s2950_s17 = sld [smem:[#allocation34_spill]] }
  0x9c   : > { %s2951_s2 = sld [smem:[#allocation35_spill]] }
 0x120   : > { %v663_v6 = vpop.xlane.xlu0 %662 }
 0x121   : > { %v665_v7 = vmul.f32 0.03125, %v663_v6  ;;  %v868_v6 = vshrl.u32 %v867_v5, 7 }
 0x123   : > { %v666_v8 = vsub.f32 %v655_v2, %v665_v7  ;;  %v872_v7 = vand.u32 127, %v867_v5 }
 0x124   : > { %v691_v9 = vpop.xlane.xlu0 %690 }
 0x125   : > { %v692_v10 = vmul.f32 0.03125, %v691_v9  ;;  %v667_v11 = vmul.f32 %v666_v8, %v666_v8  ;;  %vm873_vm3 = vcmp.le.s32.totalorder %v872_v7, %v868_v6 }
 0x127   : > { %v693_v12 = vsub.f32 %v657_v3, %v692_v10  ;;  %v668_v13 = vsel %vm660_vm0, %v667_v11, 0.0 }
 0x128   : > { %669 = vadd.xlane.f32.xlu1 %v668_v13 }
 0x129   : > { %v694_v14 = vmul.f32 %v693_v12, %v693_v12 }
 0x12b   : > { %v695_v15 = vsel %vm660_vm0, %v694_v14, 0.0 }
 0x12c   : > { %696 = vadd.xlane.f32.xlu1 %v695_v15 }
 0x1b1   : > { %v670_v19 = vpop.xlane.xlu1 %669 }
 0x1b2   : > { %v671_v20 = vmul.f32 0.03125, %v670_v19 }
 0x1b4   : > { %v672_v21 = vadd.f32 1e-06, %v671_v20 }
 0x1b5   : > { %v697_v22 = vpop.xlane.xlu1 %696 }
 0x1b6   : > { %2081 = vrsqrt.f32 %v672_v21  ;;  %v698_v23 = vmul.f32 0.03125, %v697_v22 }
 0x1b8   : > { %v699_v24 = vadd.f32 1e-06, %v698_v23 }
 0x1ba   : > { %2083 = vrsqrt.f32 %v699_v24 }
 0x1c3   : > { %v2082_v25 = vpop.eup %2081 }
 0x1c4   : > { %v674_v27 = vmul.f32 %v2082_v25, %v666_v8 }
 0x1c6   : > { %v681_v29 = vmul.f32 %v1779_v26, %v674_v27 }
 0x1c7   : > { %v2084_v30 = vpop.eup %2083 }
 0x1c8   : > { %v2704_v31 = vadd.f32 %v1780_v28, %v681_v29  ;;  %v701_v32 = vmul.f32 %v2084_v30, %v693_v12 }
 0x1ca   : > { %v702_v34 = vmul.f32 %v1779_v26, %v701_v32  ;;  %v704_v35 = vpack.c.bf16 %v2704_v31, %v2704_v31 }
 0x1cc   : > { %1855 = vmatmul.mubr.msk.bf16.vlgmr.msra.gmra.mxu1 %vm660_vm0, %v704_v35  ;;  %v703_v37 = vadd.f32 %v1780_v28, %v702_v34 }
 0x1cd   : > { %1859 = vmatpush3.bf16.msra.mxu1 %v2071_v33  ;;  %1862 = vmatprep.mubr.msk.bf16.mxu1 %vm2397_vm1, %v2396_v17 }
 0x1ce   : > { %1860 = vmatprep.subr.bf16.mxu1 %v2396_v17  ;;  %v771_v38 = vpack.c.bf16 %v703_v37, %v703_v37 }
 0x1d1   : > { %1861 = vmatpush3.bf16.msra.mxu1 %v2072_v36 }
 0x1d2   : > { %1872 = vmatprep.subr.bf16.mxu1 %v2396_v17 }
 0x1d4   : > { %1863 = vmatmul.mubr.msk.bf16.vlgmr.msra.gmra.mxu1 %vm660_vm0, %v771_v38 }
 0x1d5   : > { %1874 = vmatprep.mubr.msk.bf16.mxu1 %vm2397_vm1, %v2396_v17 }
 0x28c   : > { %v765_v40 = vpop.f32.mrf.mxu1 }
 0x28d   : > { %v766_v41 = vadd.f32 %v1781_v39, %v765_v40 }
 0x28e   : > { %v1856_v42 = vpop.f32.mrf.mxu1 }
 0x28f   : > { %839 = vrot.lane.b32.xlu1 %v766_v41, %s2398_s15  ;;  %v848_v53 = vpack.c.bf16 %v766_v41, %v766_v41 }
 0x290   : > { %v768_v43 = vpop.f32.mrf.mxu1 }
 0x292   : > { %v1857_v44 = vpop.f32.mrf.mxu1 }
 0x294   : > { %v832_v46 = vpop.f32.mrf.mxu1 }
 0x295   : > { %v833_v47 = vadd.f32 %v1785_v45, %v832_v46 }
 0x296   : > { %v1864_v48 = vpop.f32.mrf.mxu1 }
 0x297   : > { %856 = vrot.lane.b32.xlu1 %v833_v47, %s2399_s18  ;;  %853 = vrot.lane.b32.xlu0 %v833_v47, %s2398_s15  ;;  %v2722_v49 = vpack.c.bf16 %v833_v47, %v833_v47  ;;  %s1814_s15 = sshll.u32 %s2949_s16, 6 }
 0x298   : > { %v835_v50 = vpop.f32.mrf.mxu1 }
 0x299   : > { %v879_v51 = vsel %vm874_vm2, %v2722_v49, 0 }
 0x29a   : > { %v1865_v52 = vpop.f32.mrf.mxu1  ;;  %1867 = vmatpush3.bf16.xpose.msra.mxu0 %v879_v51 }
 0x29b   : > { %859 = vrot.lane.b32.xlu1 %v833_v47, %s2400_s5  ;;  %842 = vrot.lane.b32.xlu0 %v766_v41, %s2399_s18  ;;  %s652_s18 = scalar_lea.vmem [#allocation14], %s2660_s25  ;;  %s2405_s25 = smov [#allocation14]  }
 0x29c   : > { %1878 = vmatprep.subr.bf16.mxu0 %v2396_v17  ;;  %s2295_s27 = sshll.u32 %s2405_s25, 4  ;;  %s2296_s27 = int_to_ptr.vmem [resolvable:$false] %s2295_s27 }
 0x29f   : > { %845 = vrot.lane.b32.xlu1 %v766_v41, %s2400_s5  ;;  %s1607_s5 = sshll.u32 %s652_s18, 4  ;;  %s1608_s5 = int_to_ptr.vmem [resolvable:$true] %s1607_s5 }
 0x2a0   : > { %s2291_s19 = scalar_lea.vmem %s1608_s5, 64  ;;  %p2298_p10 = scmp.lt.s32.totalorder %s1608_s5, %s2296_s27 }
 0x2a1   : > { %1869 = vmatmul.mubr.msk.bf16.vlgmr.msra.gmra.mxu0 %vm874_vm2, %v848_v53  ;;  %p2292_p6 = scmp.ne.s32.totalorder %s1608_s5, %s2291_s19 }
 0x2a2   : > { %1880 = vmatprep.mubr.msk.bf16.mxu0 %vm2397_vm1, %v2396_v17 }
 0x2a3   : > { %p2293_p8 = pnand %p2292_p6, %p2612_p4 }
 0x2a5   : > { %p2294_p9 = pneg %p2293_p8 }
 0x301   : > { %v840_v54 = vpop.permute.xlu1 %839 }
 0x302   : > { %v849_v0 = vpack.c.bf16 %v840_v54, %v840_v54 }
 0x309   : > { %v854_v55 = vpop.permute.xlu0 %853  ;;  %v857_v56 = vpop.permute.xlu1 %856 }
 0x30a   : > { %v2730_v57 = vpack.c.bf16 %v854_v55, %v854_v55  ;;  %v2732_v58 = vpack.c.bf16 %v857_v56, %v857_v56 }
 0x30c   : > { %v925_v59 = vsel %vm874_vm2, %v2730_v57, 0  ;;  %v971_v60 = vsel %vm874_vm2, %v2732_v58, 0 }
 0x30d   : > { %1873 = vmatpush3.bf16.xpose.msra.mxu1 %v925_v59  ;;  %1879 = vmatpush3.bf16.xpose.msra.mxu0 %v971_v60  ;;  %v860_v61 = vpop.permute.xlu1 %859  ;;  %v843_v62 = vpop.permute.xlu0 %842 }
 0x30e   : > { %1884 = vmatprep.subr.bf16.mxu1 %v2396_v17  ;;  %1890 = vmatprep.subr.bf16.mxu0 %v2396_v17  ;;  %v2740_v63 = vpack.c.bf16 %v860_v61, %v860_v61  ;;  %v850_v1 = vpack.c.bf16 %v843_v62, %v843_v62 }
 0x310   : > { %v1017_v2 = vsel %vm874_vm2, %v2740_v63, 0 }
 0x311   : > { %v846_v3 = vpop.permute.xlu1 %845 }
 0x312   : > { %v851_v4 = vpack.c.bf16 %v846_v3, %v846_v3 }
 0x314   : > { %1875 = vmatmul.mubr.msk.bf16.vlgmr.msra.gmra.mxu1 %vm874_vm2, %v849_v0  ;;  %1881 = vmatmul.mubr.msk.bf16.vlgmr.msra.gmra.mxu0 %vm874_vm2, %v850_v1 }
 0x315   : > { %1885 = vmatpush3.bf16.xpose.msra.mxu1 %v1017_v2  ;;  %1886 = vmatprep.mubr.msk.bf16.mxu1 %vm2397_vm1, %v2396_v17 }
 0x316   : > { %1896 = vmatprep.subr.bf16.mxu1 %v2396_v17  ;;  %1892 = vmatprep.mubr.msk.bf16.mxu0 %vm2397_vm1, %v2396_v17 }
 0x31c   : > { %1887 = vmatmul.mubr.msk.bf16.vlgmr.msra.gmra.mxu1 %vm874_vm2, %v851_v4 }
 0x31d   : > { %1898 = vmatprep.mubr.msk.bf16.mxu1 %vm2397_vm1, %v2396_v17 }
 0x361   : > { %v915_v8 = vpop.f32.mrf.mxu0 }
 0x362   : > { %v1059_v9 = vmul.f32 0.35355338, %v915_v8 }
 0x363   : > { %v1870_v10 = vpop.f32.mrf.mxu0 }
 0x364   : > { %v1065_v11 = vsel %vm873_vm3, %v1059_v9, -1e+30 }
 0x365   : > { %v918_v12 = vpop.f32.mrf.mxu0  ;;  %v1069_v13 = vsel %vm874_vm2, %v1065_v11, -inf }
 0x366   : > { %1070 = vmax.xlane.f32.xlu0 %v1069_v13 }
 0x367   : > { %v1871_v14 = vpop.f32.mrf.mxu0 }
 0x3d4   : > { %v961_v15 = vpop.f32.mrf.mxu1  ;;  %v1007_v16 = vpop.f32.mrf.mxu0 }
 0x3d5   : > { %v1060_v18 = vmul.f32 0.35355338, %v961_v15  ;;  %v1061_v19 = vmul.f32 0.35355338, %v1007_v16 }
 0x3d6   : > { %v1876_v20 = vpop.f32.mrf.mxu1  ;;  %v1882_v21 = vpop.f32.mrf.mxu0 }
 0x3d7   : > { %v1066_v22 = vsel %vm873_vm3, %v1060_v18, -1e+30  ;;  %v1067_v23 = vsel %vm873_vm3, %v1061_v19, -1e+30  ;;  %v2073_v20 = vld [vmem:[%s2895_s8 + $0x8] sm:$0xff]  }
 0x3d8   : > { %v964_v24 = vpop.f32.mrf.mxu1  ;;  %v1010_v25 = vpop.f32.mrf.mxu0  ;;  %v1072_v26 = vsel %vm874_vm2, %v1066_v22, -inf  ;;  %v1075_v27 = vsel %vm874_vm2, %v1067_v23, -inf }
 0x3d9   : > { %1073 = vmax.xlane.f32.xlu1 %v1072_v26  ;;  %1076 = vmax.xlane.f32.xlu0 %v1075_v27 }
 0x3da   : > { %v1877_v28 = vpop.f32.mrf.mxu1  ;;  %v1883_v29 = vpop.f32.mrf.mxu0 }
 0x3dc   : > { %v1053_v30 = vpop.f32.mrf.mxu1 }
 0x3dd   : > { %v1062_v32 = vmul.f32 0.35355338, %v1053_v30 }
 0x3de   : > { %v1888_v33 = vpop.f32.mrf.mxu1 }
 0x3df   : > { %v1068_v34 = vsel %vm873_vm3, %v1062_v32, -1e+30  ;;  %v2074_v33 = vld [vmem:[%s2895_s8] sm:$0xff]  }
 0x3e0   : > { %v1056_v35 = vpop.f32.mrf.mxu1  ;;  %v1078_v36 = vsel %vm874_vm2, %v1068_v34, -inf }
 0x3e1   : > { %1079 = vmax.xlane.f32.xlu0 %v1078_v36 }
 0x3e2   : > { %v1889_v37 = vpop.f32.mrf.mxu1 }
 0x3ef   : > { %v1071_v38 = vpop.xlane.xlu0 %1070 }
 0x3f0   : > { %v1081_v39 = vsub.f32 %v1065_v11, %v1071_v38 }
 0x3f2   : > { %v1085_v40 = vmul.f32 1.442695, %v1081_v39 }
 0x3f4   : > { %2085 = vpow2.f32 %v1085_v40 }
 0x401   : > { %v2086_v41 = vpop.eup %2085 }
 0x402   : > { %v1093_v42 = vsel %vm874_vm2, %v2086_v41, 0.0 }
 0x403   : > { %1094 = vadd.xlane.f32.xlu0 %v1093_v42 }
 0x462   : > { %v1077_v43 = vpop.xlane.xlu0 %1076  ;;  %v1074_v44 = vpop.xlane.xlu1 %1073 }
 0x463   : > { %v1083_v45 = vsub.f32 %v1067_v23, %v1077_v43  ;;  %v1082_v46 = vsub.f32 %v1066_v22, %v1074_v44 }
 0x465   : > { %v1089_v47 = vmul.f32 1.442695, %v1083_v45  ;;  %v1087_v48 = vmul.f32 1.442695, %v1082_v46  ;;  %v1797_v45 = vld [vmem:[#allocation13] ss:$0 sm:$0xff] }
 0x467   : > { %2087 = vpow2.f32 %v1089_v47 }
 0x468   : > { %2089 = vpow2.f32 %v1087_v48 }
 0x46a   : > { %v1080_v54 = vpop.xlane.xlu0 %1079 }
 0x46b   : > { %v1084_v55 = vsub.f32 %v1068_v34, %v1080_v54 }
 0x46d   : > { %v1091_v56 = vmul.f32 1.442695, %v1084_v55 }
 0x46f   : > { %2091 = vpow2.f32 %v1091_v56 }
 0x474   : > { %v2088_v50 = vpop.eup %2087 }
 0x475   : > { %v2090_v51 = vpop.eup %2089  ;;  %v1099_v52 = vsel %vm874_vm2, %v2088_v50, 0.0 }
 0x476   : > { %1100 = vadd.xlane.f32.xlu0 %v1099_v52  ;;  %v1096_v53 = vsel %vm874_vm2, %v2090_v51, 0.0 }
 0x477   : > { %1097 = vadd.xlane.f32.xlu1 %v1096_v53 }
 0x47c   : > { %v2092_v59 = vpop.eup %2091 }
 0x47d   : > { %v1102_v60 = vsel %vm874_vm2, %v2092_v59, 0.0 }
 0x488   : > { %1168 = vrot.lane.b32.xlu1 %v2730_v57, %s2401_s3 }
 0x48c   : > { %1217 = vrot.lane.b32.xlu1 %v2732_v58, %s2401_s3  ;;  %1118 = vrot.lane.b32.xlu0 %v2722_v49, %s2401_s3  ;;  %v1095_v61 = vpop.xlane.xlu0 %1094 }
 0x48d   : > { %2093 = vrcp.f32 %v1095_v61  ;;  %v2075_v61 = vld [vmem:[%s2899_s12 + $0x8] sm:$0xff]  }
 0x49a   : > { %v2094_v62 = vpop.eup %2093 }
 0x49b   : > { %v1109_v58 = vmul.f32 %v2094_v62, %v2086_v41 }
 0x49d   : > { %v1113_v4 = vpack.c.bf16 %v1109_v58, %v1109_v58 }
 0x4b0   : > { %1103 = vadd.xlane.f32.xlu1 %v1102_v60 }
 0x4c1   : > { %1266 = vrot.lane.b32.xlu1 %v2740_v63, %s2401_s3 }
 0x4ff   : > { %v1101_v0 = vpop.xlane.xlu0 %1100 }
 0x500   : > { %2095 = vrcp.f32 %v1101_v0  ;;  %v1098_v57 = vpop.xlane.xlu1 %1097 }
 0x501   : > { %2097 = vrcp.f32 %v1098_v57 }
 0x503   : > { %v1119_v49 = vpop.permute.xlu0 %1118 }
 0x504   : > { %v1125_v1 = vsel %vm1123_vm4, %v1119_v49, 0  ;;  %v1169_v2 = vpop.permute.xlu1 %1168  ;;  %v1801_v49 = vld [vmem:[%s2897_s10] ss:$0 sm:$0xff] }
 0x505   : > { %v1174_v3 = vsel %vm1123_vm4, %v1169_v2, 0  ;;  %1891 = vmatpush3.bf16.msra.mxu0 %v1125_v1  ;;  %v1802_v2 = vld [vmem:[%s2898_s11] ss:$0 sm:$0xff] }
 0x506   : > { %1897 = vmatpush3.bf16.msra.mxu1 %v1174_v3  ;;  %1902 = vmatprep.subr.bf16.mxu0 %v2396_v17 }
 0x507   : > { %1908 = vmatprep.subr.bf16.mxu1 %v2396_v17 }
 0x508   : > { %v1218_v63 = vpop.permute.xlu1 %1217  ;;  %1893 = vmatmul.mubr.msk.bf16.vlgmr.msra.gmra.mxu0 %vm874_vm2, %v1113_v4 }
 0x509   : > { %v1223_v5 = vsel %vm1123_vm4, %v1218_v63, 0  ;;  %1904 = vmatprep.mubr.msk.bf16.mxu0 %vm2397_vm1, %v2396_v17 }
 0x50a   : > { %1903 = vmatpush3.bf16.msra.mxu0 %v1223_v5  ;;  %v2077_v5 = vld [vmem:[%s2901_s14 + $0x18] sm:$0xff]  }
 0x50b   : > { %1914 = vmatprep.subr.bf16.mxu0 %v2396_v17 }
 0x50d   : > { %v2096_v6 = vpop.eup %2095 }
 0x50e   : > { %v2098_v7 = vpop.eup %2097  ;;  %v1111_v8 = vmul.f32 %v2096_v6, %v2088_v50  ;;  %v2078_v6 = vld [vmem:[%s2901_s14 + $0x10] sm:$0xff]  }
 0x50f   : > { %v1110_v9 = vmul.f32 %v2098_v7, %v2090_v51  ;;  %v2079_v7 = vld [vmem:[%s2901_s14 + $0x8] sm:$0xff]  }
 0x510   : > { %v1115_v10 = vpack.c.bf16 %v1111_v8, %v1111_v8  ;;  %v2080_v8 = vld [vmem:[%s2901_s14] sm:$0xff]  }
 0x511   : > { %v1114_v11 = vpack.c.bf16 %v1110_v9, %v1110_v9  ;;  %v1803_v9 = vld [vmem:[%s2948_s7] ss:$0 sm:$0xff] }
 0x512   : > { %1905 = vmatmul.mubr.msk.bf16.vlgmr.msra.gmra.mxu0 %vm874_vm2, %v1115_v10 }
 0x513   : > { %1899 = vmatmul.mubr.msk.bf16.vlgmr.msra.gmra.mxu1 %vm874_vm2, %v1114_v11  ;;  %1918 = vmatprep.mubr.msk.bf16.mxu0 %vm2397_vm1, %v2396_v17 }
 0x514   : > { %1910 = vmatprep.mubr.msk.bf16.mxu1 %vm2397_vm1, %v2396_v17  ;;  %1915 = vmatpush3.bf16.msra.mxu0 %v2073_v20 }
 0x515   : > { %1916 = vmatprep.subr.bf16.mxu0 %v2396_v17 }
 0x518   : > { %1917 = vmatpush3.bf16.msra.mxu0 %v2074_v33 }
 0x519   : > { %1930 = vmatprep.subr.bf16.mxu0 %v2396_v17 }
 0x539   : > { %v1104_v12 = vpop.xlane.xlu1 %1103 }
 0x53a   : > { %2099 = vrcp.f32 %v1104_v12 }
 0x53d   : > { %v1267_v13 = vpop.permute.xlu1 %1266 }
 0x53e   : > { %v1272_v14 = vsel %vm1123_vm4, %v1267_v13, 0 }
 0x53f   : > { %1909 = vmatpush3.bf16.msra.mxu1 %v1272_v14 }
 0x540   : > { %1922 = vmatprep.subr.bf16.mxu1 %v2396_v17 }
 0x547   : > { %v2100_v15 = vpop.eup %2099 }
 0x548   : > { %v1112_v16 = vmul.f32 %v2100_v15, %v2092_v59 }
 0x54a   : > { %v1116_v18 = vpack.c.bf16 %v1112_v16, %v1112_v16 }
 0x54c   : > { %1911 = vmatmul.mubr.msk.bf16.vlgmr.msra.gmra.mxu1 %vm874_vm2, %v1116_v18 }
 0x54d   : > { %1926 = vmatprep.mubr.msk.bf16.mxu1 %vm2397_vm1, %v2396_v17  ;;  %1923 = vmatpush3.bf16.msra.mxu1 %v2075_v61 }
 0x54e   : > { %1924 = vmatprep.subr.bf16.mxu1 %v2396_v17 }
 0x5c8   : > { %v1161_v19 = vpop.f32.mrf.mxu0 }
 0x5ca   : > { %v1894_v21 = vpop.f32.mrf.mxu0 }
 0x5cc   : > { %v1164_v22 = vpop.f32.mrf.mxu0 }
 0x5ce   : > { %v1895_v23 = vpop.f32.mrf.mxu0 }
 0x5d2   : > { %v1259_v24 = vpop.f32.mrf.mxu0 }
 0x5d3   : > { %v1210_v25 = vpop.f32.mrf.mxu1  ;;  %1319 = vrot.lane.b32.xlu1 %v1259_v24, %s2402_s23  ;;  %s2845_s23 = scalar_lea.hbm %s2951_s2, %s1814_s15 }
 0x5d4   : > { %1315 = vrot.lane.b32.xlu0 %v1210_v25, %s2403_s28  ;;  %v1906_v26 = vpop.f32.mrf.mxu0  ;;  %v1807_v25 = vld [vmem:[%s2950_s17] ss:$0 sm:$0xff]  ;;  %s1593_s28 = scalar_lea.sflag [#allocation4], %s2657_s9 }
 0x5d5   : > { %v1900_v27 = vpop.f32.mrf.mxu1 }
 0x5d6   : > { %v1262_v28 = vpop.f32.mrf.mxu0 }
 0x5d7   : > { %v1213_v29 = vpop.f32.mrf.mxu1 }
 0x5d8   : > { %v1907_v30 = vpop.f32.mrf.mxu0 }
 0x5d9   : > { %v1901_v32 = vpop.f32.mrf.mxu1 }
 0x60c   : > { %v1308_v34 = vpop.f32.mrf.mxu1 }
 0x60d   : > { %1323 = vrot.lane.b32.xlu0 %v1308_v34, %s2404_s0  ;;  %s2297_s0 = scalar_lea.vmem %s2296_s27, 128 }
 0x60e   : > { %v1912_v35 = vpop.f32.mrf.mxu1  ;;  %p2299_p11 = scmp.lt.s32.totalorder %s2297_s0, %s2291_s19 }
 0x610   : > { %v1311_v36 = vpop.f32.mrf.mxu1  ;;  %p2300_p12 = por %p2299_p11, %p2298_p10 }
 0x612   : > { %v1913_v37 = vpop.f32.mrf.mxu1  ;;  %p2301_p2 = pnand %p2300_p12, %p2294_p9 }
 0x645   : > { %v1320_v40 = vpop.permute.xlu1 %1319 }
 0x646   : > { %v1316_v38 = vpop.permute.xlu0 %1315 }
 0x647   : > { %v1326_v39 = vsel %vm874_vm2, %v1161_v19, %v1316_v38 }
 0x648   : > { %v1328_v41 = vsel %vm1327_vm5, %v1326_v39, %v1320_v40 }
 0x67f   : > { %v1324_v42 = vpop.permute.xlu0 %1323 }
 0x680   : > { %v1330_v43 = vsel %vm1329_vm6, %v1328_v41, %v1324_v42 }
 0x681   : > { %v1331_v44 = vpack.c.bf16 %v1330_v43, %v1330_v43 }
 0x683   : > { %1919 = vmatmul.mubr.msk.bf16.vlgmr.msra.gmra.mxu0 %vm660_vm0, %v1331_v44 }
 0x684   : > { %1938 = vmatprep.mubr.msk.bf16.mxu0 %vm2397_vm1, %v2396_v17  ;;  %1931 = vmatpush3.bf16.msra.mxu0 %v2077_v5 }
 0x685   : > { %1932 = vmatprep.subr.bf16.mxu0 %v2396_v17 }
 0x688   : > { %1933 = vmatpush3.bf16.msra.mxu0 %v2078_v6 }
 0x689   : > { %1934 = vmatprep.subr.bf16.mxu0 %v2396_v17 }
 0x68c   : > { %1935 = vmatpush3.bf16.msra.mxu0 %v2079_v7 }
 0x68d   : > { %1936 = vmatprep.subr.bf16.mxu0 %v2396_v17 }
 0x690   : > { %1937 = vmatpush3.bf16.msra.mxu0 %v2080_v8 }
 0x743   : > { %v1392_v46 = vpop.f32.mrf.mxu0 }
 0x744   : > { %v1393_v47 = vadd.f32 %v1797_v45, %v1392_v46 }
 0x745   : > { %v1920_v48 = vpop.f32.mrf.mxu0 }
 0x746   : > { %v1398_v50 = vadd.f32 %v1393_v47, %v2704_v31  ;;  %v2076_v31 = vld [vmem:[%s2899_s12] sm:$0xff]  }
 0x747   : > { %v1395_v51 = vpop.f32.mrf.mxu0  ;;  %1925 = vmatpush3.bf16.msra.mxu1 %v2076_v31 }
 0x748   : > { %v1401_v52 = vsel %vm660_vm0, %v1398_v50, 0.0 }
 0x749   : > { %1402 = vadd.xlane.f32.xlu1 %v1401_v52  ;;  %v1921_v53 = vpop.f32.mrf.mxu0 }
 0x7d2   : > { %v1403_v54 = vpop.xlane.xlu1 %1402 }
 0x7d3   : > { %v1404_v55 = vmul.f32 0.03125, %v1403_v54 }
 0x7d5   : > { %v1405_v56 = vsub.f32 %v1398_v50, %v1404_v55 }
 0x7d7   : > { %v1406_v59 = vmul.f32 %v1405_v56, %v1405_v56 }
 0x7d9   : > { %v1407_v60 = vsel %vm660_vm0, %v1406_v59, 0.0 }
 0x7da   : > { %1408 = vadd.xlane.f32.xlu0 %v1407_v60 }
 0x863   : > { %v1409_v62 = vpop.xlane.xlu0 %1408 }
 0x864   : > { %v1410_v0 = vmul.f32 0.03125, %v1409_v62 }
 0x866   : > { %v1411_v57 = vadd.f32 1e-06, %v1410_v0 }
 0x868   : > { %2101 = vrsqrt.f32 %v1411_v57 }
 0x875   : > { %v2102_v58 = vpop.eup %2101 }
 0x876   : > { %v1413_v1 = vmul.f32 %v2102_v58, %v1405_v56 }
 0x878   : > { %v1420_v3 = vmul.f32 %v1801_v49, %v1413_v1 }
 0x87a   : > { %v1427_v4 = vadd.f32 %v1802_v2, %v1420_v3 }
 0x87c   : > { %v1428_v63 = vpack.c.bf16 %v1427_v4, %v1427_v4 }
 0x87e   : > { %1927 = vmatmul.mubr.msk.bf16.vlgmr.msra.gmra.mxu1 %vm660_vm0, %v1428_v63 }
 0x93e   : > { %v1489_v10 = vpop.f32.mrf.mxu1 }
 0x93f   : > { %v1490_v11 = vadd.f32 %v1803_v9, %v1489_v10 }
 0x940   : > { %v1928_v12 = vpop.f32.mrf.mxu1 }
 0x941   : > { %v1496_v13 = vmul.f32 0.044715, %v1490_v11  ;;  %v1495_v17 = vmul.f32 0.5, %v1490_v11 }
 0x942   : > { %v1492_v14 = vpop.f32.mrf.mxu1 }
 0x943   : > { %v1497_v15 = vmul.f32 %v1496_v13, %v1490_v11 }
 0x944   : > { %v1929_v16 = vpop.f32.mrf.mxu1 }
 0x945   : > { %v1498_v18 = vmul.f32 %v1497_v15, %v1490_v11 }
 0x947   : > { %v1499_v19 = vadd.f32 %v1498_v18, %v1490_v11 }
 0x949   : > { %v1500_v20 = vmul.f32 0.7978846, %v1499_v19 }
 0x94b   : > { %2103 = vtanh.f32 %v1500_v20 }
 0x958   : > { %v2104_v21 = vpop.eup %2103 }
 0x959   : > { %v1502_v22 = vadd.f32 1.0, %v2104_v21 }
 0x95b   : > { %v1503_v23 = vmul.f32 %v1502_v22, %v1495_v17 }
 0x95d   : > { %v1504_v24 = vpack.c.bf16 %v1503_v23, %v1503_v23 }
 0x95f   : > { %1939 = vmatmul.mubr.msk.bf16.vlgmr.msra.gmra.mxu0 %vm1544_vm7, %v1504_v24 }
 0xa1f   : > { %v1582_v26 = vpop.f32.mrf.mxu0 }
 0xa20   : > { %v1583_v27 = vadd.f32 %v1807_v25, %v1582_v26 }
 0xa21   : > { %v1940_v28 = vpop.f32.mrf.mxu0 }
 0xa22   : > { %v1588_v29 = vadd.f32 %v1583_v27, %v1427_v4 }
 0xa23   : > { %v1585_v30 = vpop.f32.mrf.mxu0 }
 0xa24   : > { %v1589_v32 = vpack.c.bf16 %v1588_v29, %v1588_v29 }
 0xa25   : > { %v1941_v33 = vpop.f32.mrf.mxu0 }
 0xa26   : > { %1591 = vst.msk [vmem:[%s652_s18] sm:$0xf] %vm1590_vm8, %v1589_v32 }
 0xa27   : > { %2304 = shalt.err (!%p2301_p2)
}
 0xa28   : > { %s2305_s29 = scalar_lea.hbm %s2845_s23, 64  ;;  %s2309_s16 = scalar_lea.hbm %s2951_s2, 128 }
 0xa29   : > { %p2306_p7 = scmp.ne.s32.totalorder %s2845_s23, %s2305_s29  ;;  %p2310_p13 = scmp.lt.s32.totalorder %s2845_s23, %s2951_s2 }
 0xa2a   : > { %p2311_p5 = scmp.lt.s32.totalorder %s2309_s16, %s2305_s29 }
 0xa2b   : > { %p2307_p1 = pnand %p2306_p7, %p2612_p4 }
 0xa2c   : > { %p2312_p6 = por %p2311_p5, %p2310_p13 }
 0xa2d   : > { %p2308_p3 = pneg %p2307_p1 }
 0xa2f   : > { %p2313_p8 = pnand %p2312_p6, %p2308_p3 }
 0xa31   : > { %2316 = shalt.err (!%p2313_p8)
}
 0xa32   : > { %1966 = dma.vmem_to_hbm [thread:$0]  (%p2612_p4), %s1608_s5, 64, %s2845_s23, %s1593_s28  }
 0xa33 PF: > { %s1619_s15 = sand.u32 1, %s2367_s21   ;;  %p2953_p9 = scmp.ge.s32.totalorder %s2387_s26, 2 }
 0xa34   : > { %s1620_s18 = scalar_lea.sflag [#allocation4], %s1619_s15 }
 0xa35   : > { %p1992_p10 = pnand %p2953_p9, %p2620_p0 }
 0xa37   : > { %p1993_p11 = pneg %p1992_p10 }
 0xa39   : > { %2362 = dma.done.wait (%p1993_p11), %s1620_s18, 64  }
 0xa3a   : > { %2364 = vsyncadd (%p1993_p11), %s1620_s18, 4294967232  ;;  %s37_s26 = sadd.s32 1, %s2387_s26   ;;  %s2954_s3 = sld [smem:[#allocation21_spill]] }
 0xa3b   : > { %p34_p12 = scmp.ge.s32.totalorder %s37_s26, 4   ;;  %s2955_s23 = sld [smem:[#allocation25_spill]] }
 0xa3c   : > { %s2956_s24 = sld [smem:[#allocation23_spill]]  ;;  %s2958_s21 = smov %s2371_s22 }
 0xa3d   : > { %s2957_s25 = sld [smem:[#allocation24_spill]]  ;;  %36 = sbr.rel (!%p34_p12) target bundleno = 20 (0x14), region = 162 }
 0xa40   : > { %s2959_s22 = smov %s2954_s3 }
 0xa42   :  { %1625 = vsyncpa [#allocation3], 1 }
 0xa43   :  { %1627 = vsyncpa [#allocation3 + $0x1], 1 }
 0xa44   :  { %1628 = vsyncpa [#allocation6], 1 }
 0xa45   :  { %1630 = vsyncpa [#allocation6 + $0x1], 1 }
 0xa46   :  { %1631 = vsyncpa [#allocation9], 1 }
 0xa47   :  { %1632 = vsyncpa [#allocation12], 1 }
 0xa48   :  { %1633 = vsyncpa [#allocation4], 1 }
 0xa49   :  { %1635 = vsyncpa [#allocation4 + $0x1], 1 }

// kernel: tpu_custom_call.1
= control target key start
LH: loop header
LB: loop body
LE: loop exit
PB: predicated region body
PF: predicated region fallthrough
CT: control target
= control target key end

     0   :  { %s2887_s0 = inlined_call_operand.hbm [shape: bf16[2,8,32], index: 0, kind: input, shape index: {}]   ;;  %s2888_s1 = inlined_call_operand.hbm [shape: bf16[2,8,32], index: 1, kind: input, shape index: {}]   ;;  %s2889_s2 = inlined_call_operand.hbm [shape: f32[1,32], index: 2, kind: input, shape index: {}]   ;;  %s2890_s3 = inlined_call_operand.hbm [shape: f32[1,32], index: 3, kind: input, shape index: {}]   ;;  %s2891_s4 = inlined_call_operand.vmem [shape: bf16[32,32], index: 4, kind: input, shape index: {}]   ;;  %s2892_s5 = inlined_call_operand.hbm [shape: f32[1,32], index: 5, kind: input, shape index: {}]   ;;  %s2893_s6 = inlined_call_operand.vmem [shape: bf16[32,64], index: 6, kind: input, shape index: {}]   ;;  %s2894_s7 = inlined_call_operand.hbm [shape: f32[1,64], index: 7, kind: input, shape index: {}]   ;;  %s2895_s8 = inlined_call_operand.vmem [shape: bf16[32,32], index: 8, kind: input, shape index: {}]   ;;  %s2896_s9 = inlined_call_operand.hbm [shape: f32[1,32], index: 9, kind: input, shape index: {}]   ;;  %s2897_s10 = inlined_call_operand.vmem [shape: f32[1,32], index: 10, kind: input, shape index: {}]   ;;  %s2898_s11 = inlined_call_operand.vmem [shape: f32[1,32], index: 11, kind: input, shape index: {}]   ;;  %s2899_s12 = inlined_call_operand.vmem [shape: bf16[32,64], index: 12, kind: input, shape index: {}]   ;;  %s2900_s13 = inlined_call_operand.vmem [shape: f32[1,64], index: 13, kind: input, shape index: {}]   ;;  %s2901_s14 = inlined_call_operand.vmem [shape: bf16[64,32], index: 14, kind: input, shape index: {}]   ;;  %s2902_s15 = inlined_call_operand.vmem [shape: f32[1,32], index: 15, kind: input, shape index: {}]   ;;  %s2903_s16 = inlined_call_operand.hbm [shape: bf16[2,8,32], index: 16, kind: output, shape index: {}]  }
   0x1   :  { %2911 = sst [smem:[#allocation27_spill]] %s2887_s0 }
   0x2   :  { %2912 = sst [smem:[#allocation28_spill]] %s2889_s2 }
   0x3   :  { %2913 = sst [smem:[#allocation29_spill]] %s2890_s3 }
   0x4   :  { %2914 = sst [smem:[#allocation30_spill]] %s2892_s5 }
   0x5   :  { %2915 = sst [smem:[#allocation31_spill]] %s2894_s7 }
   0x6   :  { %2916 = sst [smem:[#allocation32_spill]] %s2896_s9 }
   0x7   :  { %2917 = sst [smem:[#allocation33_spill]] %s2900_s13 }
   0x8   :  { %2918 = sst [smem:[#allocation34_spill]] %s2902_s15 }
   0x9   :  { %2919 = sst [smem:[#allocation35_spill]] %s2903_s16 }
   0xa   :  { %21 = vsyncpa [#allocation3], 0 }
   0xb   :  { %23 = vsyncpa [#allocation3 + $0x1], 0 }
   0xc   :  { %24 = vsyncpa [#allocation6], 0 }
   0xd   :  { %26 = vsyncpa [#allocation6 + $0x1], 0 }
   0xe   :  { %27 = vsyncpa [#allocation9], 0 }
   0xf   :  { %28 = vsyncpa [#allocation12], 0 }
  0x10   :  { %29 = vsyncpa [#allocation4], 0 }
  0x11   :  { %31 = vsyncpa [#allocation4 + $0x1], 0  ;;  %s2491_s21 = smov 0   ;;  %s2493_s22 = smov 0  }
  0x12   :  { %s2495_s23 = smov 0   ;;  %s2497_s24 = smov 0  }
  0x13   :  { %s2499_s25 = smov 0   ;;  %s2501_s26 = smov 0  }
  0x14 LB: > { %2920 = sst [smem:[#allocation21_spill]] %s2375_s23  ;;  %s2522_s27 = sadd.s32 4294967295, %s2387_s26   ;;  %s2387_s26 = sphi %s2501_s26, %s37_s26   ;;  %s2383_s25 = sphi %s2499_s25, %s2957_s25   ;;  %s2379_s24 = sphi %s2497_s24, %s2956_s24   ;;  %s2375_s23 = sphi %s2495_s23, %s2955_s23   ;;  %s2371_s22 = sphi %s2493_s22, %s2959_s22   ;;  %s2367_s21 = sphi %s2491_s21, %s2958_s21  }
  0x15   : > { %2921 = sst [smem:[#allocation22_spill]] %s2379_s24  ;;  %p1759_p0 = scmp.ge.s32.totalorder %s2387_s26, 1 }
  0x16   : > { %2922 = sst [smem:[#allocation23_spill]] %s2383_s25  ;;  %p2905_p1 = scmp.eq.s32.totalorder %s2522_s27, 0 }
  0x17   : > { %p430_p2 = scmp.lt.s32.totalorder %s2387_s26, 3  ;;  %s2389_s29 = smov [#allocation7]  }
  0x18   : > { %s443_s30 = sshll.u32 %s2389_s29, 4  ;;  %s2390_s0 = smov [#allocation8]   ;;  %s444_s30 = int_to_ptr.vmem [resolvable:$true] %s443_s30 }
  0x19   : > { %p2527_p3 = pnand %p1759_p0, %p430_p2  ;;  %s454_s17 = sshll.u32 %s2390_s0, 4  ;;  %s455_s17 = int_to_ptr.vmem [resolvable:$true] %s454_s17 }
  0x1a   : > { %s2391_s19 = smov [#allocation11]   ;;  %s2116_s16 = scalar_lea.vmem %s444_s30, 16 }
  0x1b   : > { %s2923_s28 = scalar_select %p2527_p3, 1, 0 }
  0x1c   : > { %p1968_p5 = pneg %p2527_p3  ;;  %s482_s20 = sshll.u32 %s2391_s19, 4  ;;  %s2540_s20 = int_to_ptr.vmem [resolvable:$true] %s482_s20 }
  0x1d   : > { %p2117_p8 = scmp.ne.s32.totalorder %s444_s30, %s2116_s16  ;;  %s2123_s0 = scalar_lea.vmem %s444_s30, 32 }
  0x1e   : > { %p2536_p6 = pnand %p1968_p5, %p2905_p1  ;;  %p2124_p11 = scmp.lt.s32.totalorder %s444_s30, %s444_s30 }
  0x1f   : > { %p2125_p12 = scmp.lt.s32.totalorder %s2123_s0, %s2116_s16 }
  0x20   : > { %p2544_p7 = pneg %p2536_p6 }
  0x21   : > { %p2126_p13 = por %p2125_p12, %p2124_p11 }
  0x22   : > { %p2119_p9 = pnand %p2117_p8, %p2544_p7 }
  0x24   : > { %p2120_p10 = pneg %p2119_p9 }
  0x26   : > { %p2127_p0 = pnand %p2126_p13, %p2120_p10 }
  0x28   : > { %2130 = shalt.err (!%p2127_p0)
}
  0x29   : > { %s2926_s2 = sld [smem:[#allocation28_spill]]  ;;  %s2142_s24 = scalar_lea.vmem %s455_s17, 16 }
  0x2a   : > { %p2143_p2 = scmp.ne.s32.totalorder %s455_s17, %s2142_s24  ;;  %s2149_s13 = scalar_lea.vmem %s455_s17, 32 }
  0x2b   : > { %p2150_p8 = scmp.lt.s32.totalorder %s455_s17, %s455_s17  ;;  %p2151_p9 = scmp.lt.s32.totalorder %s2149_s13, %s2142_s24 }
  0x2c   : > { %p2145_p5 = pnand %p2143_p2, %p2544_p7 }
  0x2d   : > { %p2152_p1 = por %p2151_p9, %p2150_p8 }
  0x2e   : > { %p2146_p4 = pneg %p2145_p5 }
  0x2f   : > { %1971 = dma.hbm_to_vmem [thread:$0]  (!%p2536_p6), %s2926_s2, 16, %s444_s30, [#allocation6]  }
  0x30   : > { %p2153_p3 = pnand %p2152_p1, %p2146_p4 }
  0x32   : > { %2156 = shalt.err (!%p2153_p3)
}
  0x33   : > { %s2927_s3 = sld [smem:[#allocation29_spill]]  ;;  %s2168_s15 = scalar_lea.vmem %s2540_s20, 16 }
  0x34   : > { %p2169_p10 = scmp.ne.s32.totalorder %s2540_s20, %s2168_s15  ;;  %s2175_s13 = scalar_lea.vmem %s2540_s20, 32 }
  0x35   : > { %p2176_p1 = scmp.lt.s32.totalorder %s2540_s20, %s2540_s20  ;;  %p2177_p3 = scmp.lt.s32.totalorder %s2175_s13, %s2168_s15 }
  0x36   : > { %p2171_p11 = pnand %p2169_p10, %p2544_p7 }
  0x37   : > { %p2178_p4 = por %p2177_p3, %p2176_p1 }
  0x38   : > { %p2172_p12 = pneg %p2171_p11 }
  0x39   : > { %1974 = dma.hbm_to_vmem [thread:$0]  (!%p2536_p6), %s2927_s3, 16, %s455_s17, [#allocation9]  }
  0x3a   : > { %p2179_p13 = pnand %p2178_p4, %p2172_p12 }
  0x3c   : > { %2182 = shalt.err (!%p2179_p13)
}
  0x3d   : > { %s2928_s7 = sld [smem:[#allocation31_spill]]  ;;  %s2392_s17 = smov [#allocation10]  }
  0x3e   : > { %s468_s19 = sshll.u32 %s2392_s17, 4  ;;  %s2393_s16 = smov [#allocation13]   ;;  %s469_s19 = int_to_ptr.vmem [resolvable:$true] %s468_s19 }
  0x3f   : > { %s496_s0 = sshll.u32 %s2393_s16, 4  ;;  %s2194_s2 = scalar_lea.vmem %s469_s19, 16  ;;  %s497_s0 = int_to_ptr.vmem [resolvable:$true] %s496_s0 }
  0x40   : > { %p2195_p0 = scmp.ne.s32.totalorder %s469_s19, %s2194_s2  ;;  %s2201_s15 = scalar_lea.vmem %s469_s19, 32 }
  0x41   : > { %p2202_p8 = scmp.lt.s32.totalorder %s469_s19, %s469_s19  ;;  %p2203_p9 = scmp.lt.s32.totalorder %s2201_s15, %s2194_s2 }
  0x42   : > { %p2197_p2 = pnand %p2195_p0, %p2544_p7 }
  0x43   : > { %1980 = dma.hbm_to_vmem [thread:$0]  (!%p2536_p6), %s2928_s7, 16, %s2540_s20, [#allocation12]  }
  0x44   : > { %p2198_p5 = pneg %p2197_p2  ;;  %p2204_p10 = por %p2203_p9, %p2202_p8 }
  0x46   : > { %p2205_p11 = pnand %p2204_p10, %p2198_p5 }
  0x48   : > { %2208 = shalt.err (!%p2205_p11)
}
  0x49   : > { %s2929_s5 = sld [smem:[#allocation30_spill]]  ;;  %s2220_s24 = scalar_lea.vmem %s497_s0, 16 }
  0x4a   : > { %p2221_p12 = scmp.ne.s32.totalorder %s497_s0, %s2220_s24  ;;  %s2227_s30 = scalar_lea.vmem %s497_s0, 32 }
  0x4b   : > { %p2228_p4 = scmp.lt.s32.totalorder %s497_s0, %s497_s0  ;;  %p2229_p13 = scmp.lt.s32.totalorder %s2227_s30, %s2220_s24 }
  0x4c   : > { %p2223_p1 = pnand %p2221_p12, %p2544_p7 }
  0x4d   : > { %p2230_p0 = por %p2229_p13, %p2228_p4 }
  0x4e   : > { %p2224_p3 = pneg %p2223_p1 }
  0x4f   : > { %1977 = dma.hbm_to_vmem [thread:$0]  (!%p2536_p6), %s2929_s5, 16, %s469_s19, [#allocation9]  }
  0x50   : > { %p2231_p2 = pnand %p2230_p0, %p2224_p3 }
  0x52   : > { %2234 = shalt.err (!%p2231_p2)
}
  0x53   : > { %s2930_s9 = sld [smem:[#allocation32_spill]]  ;;  %s1758_s29 = sadd.s32 4294967294, %s2387_s26  }
  0x54   : > { %s49_s19 = sadd.s32 1, %s2383_s25  ;;  %s58_s18 = sadd.s32 1, %s2375_s23 }
  0x55   : > { %p51_p7 = scmp.ge.s32.totalorder %s49_s19, 2  ;;  %p65_p5 = scmp.ne.s32.totalorder %s2375_s23, %s2371_s22 }
  0x56   : > { %p66_p8 = scmp.eq.s32.totalorder %s2387_s26, 0  ;;  %p71_p9 = scmp.ne.s32.totalorder %s2371_s22, %s2367_s21 }
  0x57   : > { %s2961_s19 = smov (%p51_p7, %s49_s19), 0  ;;  %p2933_p11 = scmp.eq.s32.totalorder %s2522_s27, 0 }
  0x58   : > { %2931 = sst [smem:[#allocation24_spill]] %s2961_s19  ;;  %p2599_p10 = por %p66_p8, %p65_p5 }
  0x59   : > { %1983 = dma.hbm_to_vmem [thread:$0]  (!%p2536_p6), %s2930_s9, 16, %s497_s0, [#allocation12]  }
  0x5a   : > { %p2605_p6 = por %p2933_p11, %p71_p9  ;;  %s53_s15 = ssub.s32 %s2383_s25, %s2961_s19 }
  0x5b   : > { %p417_p12 = scmp.eq.s32.totalorder %s2522_s27, 1  ;;  %p56_p1 = scmp.eq.s32.totalorder %s53_s15, 0 }
  0x5c   : > { %p423_p3 = scmp.eq.s32.totalorder %s1758_s29, 1  ;;  %p2000_p13 = scmp.lt.s32.totalorder %s2387_s26, 2 }
  0x5d   : > { %p2612_p4 = por %p417_p12, %p65_p5  ;;  %s525_s30 = sand.u32 1, %s2375_s23  }
  0x5e   : > { %s2618_s20 = scalar_select %p56_p1, %s2375_s23, %s58_s18  }
  0x5f   : > { %p2620_p0 = por %p423_p3, %p71_p9  ;;  %s1766_s2 = sshll.u32 %s525_s30, 2 }
  0x60   : > { %2936 = sst [smem:[#allocation25_spill]] %s2618_s20  ;;  %s1767_s17 = sshll.u32 %s2383_s25, 6 }
  0x61   : > { %s2937_s24 = scalar_select %p2620_p0, 1, 0 }
  0x62   : > { %s2939_s7 = sld [smem:[#allocation27_spill]]  ;;  %s529_s15 = scalar_lea.vmem [#allocation2], %s1766_s2 }
  0x63   : > { %2938 = sst [smem:[#allocation26_spill]] %s2937_s24  ;;  %s537_s29 = sshll.u32 %s529_s15, 4  ;;  %s538_s29 = int_to_ptr.vmem [resolvable:$true] %s537_s29 }
  0x64   : > { %p2631_p2 = pnand %p2000_p13, %p2599_p10  ;;  %s2638_s23 = scalar_lea.hbm %s2888_s1, %s1767_s17 }
  0x65   : > { %s544_s25 = sand.u32 1, %s2387_s26   ;;  %s526_s24 = scalar_lea.sflag [#allocation3], %s525_s30 }
  0x66   : > { %p2237_p7 = pneg %p2631_p2  ;;  %s2248_s3 = scalar_lea.vmem %s538_s29, 64 }
  0x67   : > { %p2249_p5 = scmp.ne.s32.totalorder %s538_s29, %s2248_s3  ;;  %s2394_s5 = smov [#allocation2]  }
  0x68   : > { %s535_s9 = scalar_lea.hbm %s2939_s7, %s1767_s17  ;;  %s2253_s7 = sshll.u32 %s2394_s5, 4  ;;  %s2254_s7 = int_to_ptr.vmem [resolvable:$false] %s2253_s7 }
  0x69   : > { %p2251_p8 = pnand %p2249_p5, %p2237_p7  ;;  %s2255_s16 = scalar_lea.vmem %s2254_s7, 128 }
  0x6a   : > { %p2256_p10 = scmp.lt.s32.totalorder %s538_s29, %s2254_s7  ;;  %p2257_p11 = scmp.lt.s32.totalorder %s2255_s16, %s2248_s3 }
  0x6b   : > { %p2252_p9 = pneg %p2251_p8 }
  0x6c   : > { %p2258_p12 = por %p2257_p11, %p2256_p10 }
  0x6e   : > { %p2259_p1 = pnand %p2258_p12, %p2252_p9 }
  0x70   : > { %2262 = shalt.err (!%p2259_p1)
}
  0x71   : > { %1987 = dma.hbm_to_vmem [thread:$0]  (!%p2631_p2), %s535_s9, 64, %s538_s29, %s526_s24  }
  0x72   : > { %s548_s20 = scalar_lea.vmem [#allocation5], %s1766_s2  ;;  %s545_s17 = scalar_lea.sflag [#allocation6], %s544_s25 }
  0x73   : > { %s555_s30 = sshll.u32 %s548_s20, 4  ;;  %s2395_s18 = smov [#allocation5]   ;;  %s556_s30 = int_to_ptr.vmem [resolvable:$true] %s555_s30 }
  0x74   : > { %s2276_s15 = scalar_lea.vmem %s556_s30, 64  ;;  %s2281_s5 = sshll.u32 %s2395_s18, 4  ;;  %s2282_s5 = int_to_ptr.vmem [resolvable:$false] %s2281_s5 }
  0x75   : > { %p2277_p3 = scmp.ne.s32.totalorder %s556_s30, %s2276_s15  ;;  %s2283_s3 = scalar_lea.vmem %s2282_s5, 128 }
  0x76   : > { %p2284_p8 = scmp.lt.s32.totalorder %s556_s30, %s2282_s5  ;;  %p2285_p9 = scmp.lt.s32.totalorder %s2283_s3, %s2276_s15 }
  0x77   : > { %p2279_p13 = pnand %p2277_p3, %p2237_p7 }
  0x78   : > { %p2286_p10 = por %p2285_p9, %p2284_p8 }
  0x79   : > { %p2280_p5 = pneg %p2279_p13 }
  0x7b   : > { %p2287_p11 = pnand %p2286_p10, %p2280_p5 }
  0x7d   : > { %2290 = shalt.err (!%p2287_p11)
}
  0x7e   : > { %1990 = dma.hbm_to_vmem [thread:$0]  (!%p2631_p2), %s2638_s23, 64, %s556_s30, %s545_s17  }
  0x7f   : > { %p2941_p12 = scmp.ne.s32.totalorder %s2923_s28, 0 }
  0x80   : > { %s2657_s9 = sand.u32 (!%p2941_p12), 1, %s2371_s22  }
  0x81   : > { %564 = sbr.rel (%p2941_p12) target bundleno = 2611 (0xa33), region = 84  ;;  %s2660_s25 = sshll.u32 (!%p2941_p12), %s2657_s9, 2 }
  0x82   : > { %s567_s24 = scalar_lea.sflag (!%p2941_p12), [#allocation3], %s2657_s9  ;;  %s570_s2 = scalar_lea.vmem (!%p2941_p12), [#allocation2], %s2660_s25 }
  0x86   : > { %2342 = dma.done.wait (%p2605_p6), %s567_s24, 64  }
  0x87   : > { %2344 = vsyncadd (%p2605_p6), %s567_s24, 4294967232  ;;  %s575_s23 = sand.u32 1, %s2522_s27   ;;  %s579_s19 = scalar_lea.vmem [#allocation5], %s2660_s25 }
  0x88   : > { %s576_s28 = scalar_lea.sflag [#allocation6], %s575_s23 }
  0x89   : > { %2346 = dma.done.wait (%p2605_p6), %s576_s28, 64  }
  0x8a   : > { %2348 = vsyncadd (%p2605_p6), %s576_s28, 4294967232  ;;  %p2942_p2 = scmp.eq.s32.totalorder %s2522_s27, 0 }
  0x8c   : > { %2350 = dma.done.wait (%p2942_p2), [#allocation6], 16   ;;  %p2943_p7 = pmov %p2942_p2 }
  0x8d   : > { %p2944_p1 = pmov %p2942_p2 }
  0x8e   : > { %2352 = vsyncadd (%p2943_p7), [#allocation6], 4294967280 }
  0x8f   : > { %2354 = dma.done.wait (%p2944_p1), [#allocation9], 32   ;;  %p2945_p3 = pmov %p2944_p1 }
  0x90   : > { %p2946_p13 = pmov %p2944_p1 }
  0x91   : > { %2356 = vsyncadd (%p2945_p3), [#allocation9], 4294967264 }
  0x92   : > { %2358 = dma.done.wait (%p2946_p13), [#allocation12], 32   ;;  %p2947_p5 = pmov %p2944_p1 }
  0x93   : > { %vm660_vm0 = vcmask 261120   ;;  %v654_v0 = vld [vmem:[%s570_s2] sm:$0xf]  ;;  %v656_v1 = vld [vmem:[%s579_s19] sm:$0xf]  ;;  %v2396_v17 = vmov 0.0  }
  0x94   : > { %2360 = vsyncadd (%p2947_p5), [#allocation12], 4294967264  ;;  %v655_v2 = vunpack.c.l.bf16 %v654_v0  ;;  %v657_v3 = vunpack.c.l.bf16 %v656_v1  ;;  %v2069_v16 = vld [vmem:[%s2891_s4 + $0x8] sm:$0xff]   ;;  %1850 = vmatprep.subr.bf16.mxu1 %v2396_v17  ;;  %vm2397_vm1 = vmmov 0   ;;  %v2070_v18 = vld [vmem:[%s2891_s4] sm:$0xff]   ;;  %1866 = vmatprep.subr.bf16.mxu0 %v2396_v17  ;;  %s2398_s15 = smov 120  }
  0x95   : > { %1854 = vmatprep.mubr.msk.bf16.mxu1 %vm2397_vm1, %v2396_v17  ;;  %1851 = vmatpush3.bf16.msra.mxu1 %v2069_v16  ;;  %v1779_v26 = vld [vmem:[#allocation7] ss:$0 sm:$0xff]  ;;  %v1780_v28 = vld [vmem:[#allocation8] ss:$0 sm:$0xff]  ;;  %v2071_v33 = vld [vmem:[%s2893_s6 + $0x8] sm:$0xff]   ;;  %vm874_vm2 = vcmask 64512  }
  0x96   : > { %v661_v4 = vsel %vm660_vm0, %v655_v2, 0.0  ;;  %v689_v5 = vsel %vm660_vm0, %v657_v3, 0.0  ;;  %1852 = vmatprep.subr.bf16.mxu1 %v2396_v17  ;;  %1868 = vmatprep.mubr.msk.bf16.mxu0 %vm2397_vm1, %v2396_v17  ;;  %v2072_v36 = vld [vmem:[%s2893_s6] sm:$0xff]   ;;  %v1781_v39 = vld [vmem:[#allocation10] ss:$0 sm:$0xff]  ;;  %s2399_s18 = smov 112  }
  0x97   : > { %662 = vadd.xlane.f32.xlu0 %v661_v4  ;;  %v1785_v45 = vld [vmem:[#allocation11] ss:$0 sm:$0xff]  ;;  %s2400_s5 = smov 104   ;;  %s2401_s3 = smov 96   ;;  %vm1123_vm4 = vcmask 1043456   ;;  %vm1327_vm5 = vcmask 130048  }
  0x98   : > { %s2402_s23 = smov 16   ;;  %s2403_s28 = smov 8   ;;  %vm1329_vm6 = vcmask 195584   ;;  %vm1544_vm7 = vcmask 523264   ;;  %vm1590_vm8 = vcmask 257024  }
  0x99   : > { %1853 = vmatpush3.bf16.msra.mxu1 %v2070_v18  ;;  %s2404_s0 = smov 24   ;;  %s2948_s7 = sld [smem:[#allocation33_spill]] }
  0x9a   : > { %1858 = vmatprep.subr.bf16.mxu1 %v2396_v17  ;;  %s2949_s16 = sld [smem:[#allocation22_spill]] }
  0x9b   : > { %690 = vadd.xlane.f32.xlu0 %v689_v5  ;;  %v867_v5 = vlaneseq  ;;  %s2950_s17 = sld [smem:[#allocation34_spill]] }
  0x9c   : > { %s2951_s2 = sld [smem:[#allocation35_spill]] }
 0x120   : > { %v663_v6 = vpop.xlane.xlu0 %662 }
 0x121   : > { %v665_v7 = vmul.f32 0.03125, %v663_v6  ;;  %v868_v6 = vshrl.u32 %v867_v5, 7 }
 0x123   : > { %v666_v8 = vsub.f32 %v655_v2, %v665_v7  ;;  %v872_v7 = vand.u32 127, %v867_v5 }
 0x124   : > { %v691_v9 = vpop.xlane.xlu0 %690 }
 0x125   : > { %v692_v10 = vmul.f32 0.03125, %v691_v9  ;;  %v667_v11 = vmul.f32 %v666_v8, %v666_v8  ;;  %vm873_vm3 = vcmp.le.s32.totalorder %v872_v7, %v868_v6 }
 0x127   : > { %v693_v12 = vsub.f32 %v657_v3, %v692_v10  ;;  %v668_v13 = vsel %vm660_vm0, %v667_v11, 0.0 }
 0x128   : > { %669 = vadd.xlane.f32.xlu1 %v668_v13 }
 0x129   : > { %v694_v14 = vmul.f32 %v693_v12, %v693_v12 }
 0x12b   : > { %v695_v15 = vsel %vm660_vm0, %v694_v14, 0.0 }
 0x12c   : > { %696 = vadd.xlane.f32.xlu1 %v695_v15 }
 0x1b1   : > { %v670_v19 = vpop.xlane.xlu1 %669 }
 0x1b2   : > { %v671_v20 = vmul.f32 0.03125, %v670_v19 }
 0x1b4   : > { %v672_v21 = vadd.f32 1e-06, %v671_v20 }
 0x1b5   : > { %v697_v22 = vpop.xlane.xlu1 %696 }
 0x1b6   : > { %2081 = vrsqrt.f32 %v672_v21  ;;  %v698_v23 = vmul.f32 0.03125, %v697_v22 }
 0x1b8   : > { %v699_v24 = vadd.f32 1e-06, %v698_v23 }
 0x1ba   : > { %2083 = vrsqrt.f32 %v699_v24 }
 0x1c3   : > { %v2082_v25 = vpop.eup %2081 }
 0x1c4   : > { %v674_v27 = vmul.f32 %v2082_v25, %v666_v8 }
 0x1c6   : > { %v681_v29 = vmul.f32 %v1779_v26, %v674_v27 }
 0x1c7   : > { %v2084_v30 = vpop.eup %2083 }
 0x1c8   : > { %v2704_v31 = vadd.f32 %v1780_v28, %v681_v29  ;;  %v701_v32 = vmul.f32 %v2084_v30, %v693_v12 }
 0x1ca   : > { %v702_v34 = vmul.f32 %v1779_v26, %v701_v32  ;;  %v704_v35 = vpack.c.bf16 %v2704_v31, %v2704_v31 }
 0x1cc   : > { %1855 = vmatmul.mubr.msk.bf16.vlgmr.msra.gmra.mxu1 %vm660_vm0, %v704_v35  ;;  %v703_v37 = vadd.f32 %v1780_v28, %v702_v34 }
 0x1cd   : > { %1859 = vmatpush3.bf16.msra.mxu1 %v2071_v33  ;;  %1862 = vmatprep.mubr.msk.bf16.mxu1 %vm2397_vm1, %v2396_v17 }
 0x1ce   : > { %1860 = vmatprep.subr.bf16.mxu1 %v2396_v17  ;;  %v771_v38 = vpack.c.bf16 %v703_v37, %v703_v37 }
 0x1d1   : > { %1861 = vmatpush3.bf16.msra.mxu1 %v2072_v36 }
 0x1d2   : > { %1872 = vmatprep.subr.bf16.mxu1 %v2396_v17 }
 0x1d4   : > { %1863 = vmatmul.mubr.msk.bf16.vlgmr.msra.gmra.mxu1 %vm660_vm0, %v771_v38 }
 0x1d5   : > { %1874 = vmatprep.mubr.msk.bf16.mxu1 %vm2397_vm1, %v2396_v17 }
 0x28c   : > { %v765_v40 = vpop.f32.mrf.mxu1 }
 0x28d   : > { %v766_v41 = vadd.f32 %v1781_v39, %v765_v40 }
 0x28e   : > { %v1856_v42 = vpop.f32.mrf.mxu1 }
 0x28f   : > { %839 = vrot.lane.b32.xlu1 %v766_v41, %s2398_s15  ;;  %v848_v53 = vpack.c.bf16 %v766_v41, %v766_v41 }
 0x290   : > { %v768_v43 = vpop.f32.mrf.mxu1 }
 0x292   : > { %v1857_v44 = vpop.f32.mrf.mxu1 }
 0x294   : > { %v832_v46 = vpop.f32.mrf.mxu1 }
 0x295   : > { %v833_v47 = vadd.f32 %v1785_v45, %v832_v46 }
 0x296   : > { %v1864_v48 = vpop.f32.mrf.mxu1 }
 0x297   : > { %856 = vrot.lane.b32.xlu1 %v833_v47, %s2399_s18  ;;  %853 = vrot.lane.b32.xlu0 %v833_v47, %s2398_s15  ;;  %v2722_v49 = vpack.c.bf16 %v833_v47, %v833_v47  ;;  %s1814_s15 = sshll.u32 %s2949_s16, 6 }
 0x298   : > { %v835_v50 = vpop.f32.mrf.mxu1 }
 0x299   : > { %v879_v51 = vsel %vm874_vm2, %v2722_v49, 0 }
 0x29a   : > { %v1865_v52 = vpop.f32.mrf.mxu1  ;;  %1867 = vmatpush3.bf16.xpose.msra.mxu0 %v879_v51 }
 0x29b   : > { %859 = vrot.lane.b32.xlu1 %v833_v47, %s2400_s5  ;;  %842 = vrot.lane.b32.xlu0 %v766_v41, %s2399_s18  ;;  %s652_s18 = scalar_lea.vmem [#allocation14], %s2660_s25  ;;  %s2405_s25 = smov [#allocation14]  }
 0x29c   : > { %1878 = vmatprep.subr.bf16.mxu0 %v2396_v17  ;;  %s2295_s27 = sshll.u32 %s2405_s25, 4  ;;  %s2296_s27 = int_to_ptr.vmem [resolvable:$false] %s2295_s27 }
 0x29f   : > { %845 = vrot.lane.b32.xlu1 %v766_v41, %s2400_s5  ;;  %s1607_s5 = sshll.u32 %s652_s18, 4  ;;  %s1608_s5 = int_to_ptr.vmem [resolvable:$true] %s1607_s5 }
 0x2a0   : > { %s2291_s19 = scalar_lea.vmem %s1608_s5, 64  ;;  %p2298_p10 = scmp.lt.s32.totalorder %s1608_s5, %s2296_s27 }
 0x2a1   : > { %1869 = vmatmul.mubr.msk.bf16.vlgmr.msra.gmra.mxu0 %vm874_vm2, %v848_v53  ;;  %p2292_p6 = scmp.ne.s32.totalorder %s1608_s5, %s2291_s19 }
 0x2a2   : > { %1880 = vmatprep.mubr.msk.bf16.mxu0 %vm2397_vm1, %v2396_v17 }
 0x2a3   : > { %p2293_p8 = pnand %p2292_p6, %p2612_p4 }
 0x2a5   : > { %p2294_p9 = pneg %p2293_p8 }
 0x301   : > { %v840_v54 = vpop.permute.xlu1 %839 }
 0x302   : > { %v849_v0 = vpack.c.bf16 %v840_v54, %v840_v54 }
 0x309   : > { %v854_v55 = vpop.permute.xlu0 %853  ;;  %v857_v56 = vpop.permute.xlu1 %856 }
 0x30a   : > { %v2730_v57 = vpack.c.bf16 %v854_v55, %v854_v55  ;;  %v2732_v58 = vpack.c.bf16 %v857_v56, %v857_v56 }
 0x30c   : > { %v925_v59 = vsel %vm874_vm2, %v2730_v57, 0  ;;  %v971_v60 = vsel %vm874_vm2, %v2732_v58, 0 }
 0x30d   : > { %1873 = vmatpush3.bf16.xpose.msra.mxu1 %v925_v59  ;;  %1879 = vmatpush3.bf16.xpose.msra.mxu0 %v971_v60  ;;  %v860_v61 = vpop.permute.xlu1 %859  ;;  %v843_v62 = vpop.permute.xlu0 %842 }
 0x30e   : > { %1884 = vmatprep.subr.bf16.mxu1 %v2396_v17  ;;  %1890 = vmatprep.subr.bf16.mxu0 %v2396_v17  ;;  %v2740_v63 = vpack.c.bf16 %v860_v61, %v860_v61  ;;  %v850_v1 = vpack.c.bf16 %v843_v62, %v843_v62 }
 0x310   : > { %v1017_v2 = vsel %vm874_vm2, %v2740_v63, 0 }
 0x311   : > { %v846_v3 = vpop.permute.xlu1 %845 }
 0x312   : > { %v851_v4 = vpack.c.bf16 %v846_v3, %v846_v3 }
 0x314   : > { %1875 = vmatmul.mubr.msk.bf16.vlgmr.msra.gmra.mxu1 %vm874_vm2, %v849_v0  ;;  %1881 = vmatmul.mubr.msk.bf16.vlgmr.msra.gmra.mxu0 %vm874_vm2, %v850_v1 }
 0x315   : > { %1885 = vmatpush3.bf16.xpose.msra.mxu1 %v1017_v2  ;;  %1886 = vmatprep.mubr.msk.bf16.mxu1 %vm2397_vm1, %v2396_v17 }
 0x316   : > { %1896 = vmatprep.subr.bf16.mxu1 %v2396_v17  ;;  %1892 = vmatprep.mubr.msk.bf16.mxu0 %vm2397_vm1, %v2396_v17 }
 0x31c   : > { %1887 = vmatmul.mubr.msk.bf16.vlgmr.msra.gmra.mxu1 %vm874_vm2, %v851_v4 }
 0x31d   : > { %1898 = vmatprep.mubr.msk.bf16.mxu1 %vm2397_vm1, %v2396_v17 }
 0x361   : > { %v915_v8 = vpop.f32.mrf.mxu0 }
 0x362   : > { %v1059_v9 = vmul.f32 0.35355338, %v915_v8 }
 0x363   : > { %v1870_v10 = vpop.f32.mrf.mxu0 }
 0x364   : > { %v1065_v11 = vsel %vm873_vm3, %v1059_v9, -1e+30 }
 0x365   : > { %v918_v12 = vpop.f32.mrf.mxu0  ;;  %v1069_v13 = vsel %vm874_vm2, %v1065_v11, -inf }
 0x366   : > { %1070 = vmax.xlane.f32.xlu0 %v1069_v13 }
 0x367   : > { %v1871_v14 = vpop.f32.mrf.mxu0 }
 0x3d4   : > { %v961_v15 = vpop.f32.mrf.mxu1  ;;  %v1007_v16 = vpop.f32.mrf.mxu0 }
 0x3d5   : > { %v1060_v18 = vmul.f32 0.35355338, %v961_v15  ;;  %v1061_v19 = vmul.f32 0.35355338, %v1007_v16 }
 0x3d6   : > { %v1876_v20 = vpop.f32.mrf.mxu1  ;;  %v1882_v21 = vpop.f32.mrf.mxu0 }
 0x3d7   : > { %v1066_v22 = vsel %vm873_vm3, %v1060_v18, -1e+30  ;;  %v1067_v23 = vsel %vm873_vm3, %v1061_v19, -1e+30  ;;  %v2073_v20 = vld [vmem:[%s2895_s8 + $0x8] sm:$0xff]  }
 0x3d8   : > { %v964_v24 = vpop.f32.mrf.mxu1  ;;  %v1010_v25 = vpop.f32.mrf.mxu0  ;;  %v1072_v26 = vsel %vm874_vm2, %v1066_v22, -inf  ;;  %v1075_v27 = vsel %vm874_vm2, %v1067_v23, -inf }
 0x3d9   : > { %1073 = vmax.xlane.f32.xlu1 %v1072_v26  ;;  %1076 = vmax.xlane.f32.xlu0 %v1075_v27 }
 0x3da   : > { %v1877_v28 = vpop.f32.mrf.mxu1  ;;  %v1883_v29 = vpop.f32.mrf.mxu0 }
 0x3dc   : > { %v1053_v30 = vpop.f32.mrf.mxu1 }
 0x3dd   : > { %v1062_v32 = vmul.f32 0.35355338, %v1053_v30 }
 0x3de   : > { %v1888_v33 = vpop.f32.mrf.mxu1 }
 0x3df   : > { %v1068_v34 = vsel %vm873_vm3, %v1062_v32, -1e+30  ;;  %v2074_v33 = vld [vmem:[%s2895_s8] sm:$0xff]  }
 0x3e0   : > { %v1056_v35 = vpop.f32.mrf.mxu1  ;;  %v1078_v36 = vsel %vm874_vm2, %v1068_v34, -inf }
 0x3e1   : > { %1079 = vmax.xlane.f32.xlu0 %v1078_v36 }
 0x3e2   : > { %v1889_v37 = vpop.f32.mrf.mxu1 }
 0x3ef   : > { %v1071_v38 = vpop.xlane.xlu0 %1070 }
 0x3f0   : > { %v1081_v39 = vsub.f32 %v1065_v11, %v1071_v38 }
 0x3f2   : > { %v1085_v40 = vmul.f32 1.442695, %v1081_v39 }
 0x3f4   : > { %2085 = vpow2.f32 %v1085_v40 }
 0x401   : > { %v2086_v41 = vpop.eup %2085 }
 0x402   : > { %v1093_v42 = vsel %vm874_vm2, %v2086_v41, 0.0 }
 0x403   : > { %1094 = vadd.xlane.f32.xlu0 %v1093_v42 }
 0x462   : > { %v1077_v43 = vpop.xlane.xlu0 %1076  ;;  %v1074_v44 = vpop.xlane.xlu1 %1073 }
 0x463   : > { %v1083_v45 = vsub.f32 %v1067_v23, %v1077_v43  ;;  %v1082_v46 = vsub.f32 %v1066_v22, %v1074_v44 }
 0x465   : > { %v1089_v47 = vmul.f32 1.442695, %v1083_v45  ;;  %v1087_v48 = vmul.f32 1.442695, %v1082_v46  ;;  %v1797_v45 = vld [vmem:[#allocation13] ss:$0 sm:$0xff] }
 0x467   : > { %2087 = vpow2.f32 %v1089_v47 }
 0x468   : > { %2089 = vpow2.f32 %v1087_v48 }
 0x46a   : > { %v1080_v54 = vpop.xlane.xlu0 %1079 }
 0x46b   : > { %v1084_v55 = vsub.f32 %v1068_v34, %v1080_v54 }
 0x46d   : > { %v1091_v56 = vmul.f32 1.442695, %v1084_v55 }
 0x46f   : > { %2091 = vpow2.f32 %v1091_v56 }
 0x474   : > { %v2088_v50 = vpop.eup %2087 }
 0x475   : > { %v2090_v51 = vpop.eup %2089  ;;  %v1099_v52 = vsel %vm874_vm2, %v2088_v50, 0.0 }
 0x476   : > { %1100 = vadd.xlane.f32.xlu0 %v1099_v52  ;;  %v1096_v53 = vsel %vm874_vm2, %v2090_v51, 0.0 }
 0x477   : > { %1097 = vadd.xlane.f32.xlu1 %v1096_v53 }
 0x47c   : > { %v2092_v59 = vpop.eup %2091 }
 0x47d   : > { %v1102_v60 = vsel %vm874_vm2, %v2092_v59, 0.0 }
 0x488   : > { %1168 = vrot.lane.b32.xlu1 %v2730_v57, %s2401_s3 }
 0x48c   : > { %1217 = vrot.lane.b32.xlu1 %v2732_v58, %s2401_s3  ;;  %1118 = vrot.lane.b32.xlu0 %v2722_v49, %s2401_s3  ;;  %v1095_v61 = vpop.xlane.xlu0 %1094 }
 0x48d   : > { %2093 = vrcp.f32 %v1095_v61  ;;  %v2075_v61 = vld [vmem:[%s2899_s12 + $0x8] sm:$0xff]  }
 0x49a   : > { %v2094_v62 = vpop.eup %2093 }
 0x49b   : > { %v1109_v58 = vmul.f32 %v2094_v62, %v2086_v41 }
 0x49d   : > { %v1113_v4 = vpack.c.bf16 %v1109_v58, %v1109_v58 }
 0x4b0   : > { %1103 = vadd.xlane.f32.xlu1 %v1102_v60 }
 0x4c1   : > { %1266 = vrot.lane.b32.xlu1 %v2740_v63, %s2401_s3 }
 0x4ff   : > { %v1101_v0 = vpop.xlane.xlu0 %1100 }
 0x500   : > { %2095 = vrcp.f32 %v1101_v0  ;;  %v1098_v57 = vpop.xlane.xlu1 %1097 }
 0x501   : > { %2097 = vrcp.f32 %v1098_v57 }
 0x503   : > { %v1119_v49 = vpop.permute.xlu0 %1118 }
 0x504   : > { %v1125_v1 = vsel %vm1123_vm4, %v1119_v49, 0  ;;  %v1169_v2 = vpop.permute.xlu1 %1168  ;;  %v1801_v49 = vld [vmem:[%s2897_s10] ss:$0 sm:$0xff] }
 0x505   : > { %v1174_v3 = vsel %vm1123_vm4, %v1169_v2, 0  ;;  %1891 = vmatpush3.bf16.msra.mxu0 %v1125_v1  ;;  %v1802_v2 = vld [vmem:[%s2898_s11] ss:$0 sm:$0xff] }
 0x506   : > { %1897 = vmatpush3.bf16.msra.mxu1 %v1174_v3  ;;  %1902 = vmatprep.subr.bf16.mxu0 %v2396_v17 }
 0x507   : > { %1908 = vmatprep.subr.bf16.mxu1 %v2396_v17 }
 0x508   : > { %v1218_v63 = vpop.permute.xlu1 %1217  ;;  %1893 = vmatmul.mubr.msk.bf16.vlgmr.msra.gmra.mxu0 %vm874_vm2, %v1113_v4 }
 0x509   : > { %v1223_v5 = vsel %vm1123_vm4, %v1218_v63, 0  ;;  %1904 = vmatprep.mubr.msk.bf16.mxu0 %vm2397_vm1, %v2396_v17 }
 0x50a   : > { %1903 = vmatpush3.bf16.msra.mxu0 %v1223_v5  ;;  %v2077_v5 = vld [vmem:[%s2901_s14 + $0x18] sm:$0xff]  }
 0x50b   : > { %1914 = vmatprep.subr.bf16.mxu0 %v2396_v17 }
 0x50d   : > { %v2096_v6 = vpop.eup %2095 }
 0x50e   : > { %v2098_v7 = vpop.eup %2097  ;;  %v1111_v8 = vmul.f32 %v2096_v6, %v2088_v50  ;;  %v2078_v6 = vld [vmem:[%s2901_s14 + $0x10] sm:$0xff]  }
 0x50f   : > { %v1110_v9 = vmul.f32 %v2098_v7, %v2090_v51  ;;  %v2079_v7 = vld [vmem:[%s2901_s14 + $0x8] sm:$0xff]  }
 0x510   : > { %v1115_v10 = vpack.c.bf16 %v1111_v8, %v1111_v8  ;;  %v2080_v8 = vld [vmem:[%s2901_s14] sm:$0xff]  }
 0x511   : > { %v1114_v11 = vpack.c.bf16 %v1110_v9, %v1110_v9  ;;  %v1803_v9 = vld [vmem:[%s2948_s7] ss:$0 sm:$0xff] }
 0x512   : > { %1905 = vmatmul.mubr.msk.bf16.vlgmr.msra.gmra.mxu0 %vm874_vm2, %v1115_v10 }
 0x513   : > { %1899 = vmatmul.mubr.msk.bf16.vlgmr.msra.gmra.mxu1 %vm874_vm2, %v1114_v11  ;;  %1918 = vmatprep.mubr.msk.bf16.mxu0 %vm2397_vm1, %v2396_v17 }
 0x514   : > { %1910 = vmatprep.mubr.msk.bf16.mxu1 %vm2397_vm1, %v2396_v17  ;;  %1915 = vmatpush3.bf16.msra.mxu0 %v2073_v20 }
 0x515   : > { %1916 = vmatprep.subr.bf16.mxu0 %v2396_v17 }
 0x518   : > { %1917 = vmatpush3.bf16.msra.mxu0 %v2074_v33 }
 0x519   : > { %1930 = vmatprep.subr.bf16.mxu0 %v2396_v17 }
 0x539   : > { %v1104_v12 = vpop.xlane.xlu1 %1103 }
 0x53a   : > { %2099 = vrcp.f32 %v1104_v12 }
 0x53d   : > { %v1267_v13 = vpop.permute.xlu1 %1266 }
 0x53e   : > { %v1272_v14 = vsel %vm1123_vm4, %v1267_v13, 0 }
 0x53f   : > { %1909 = vmatpush3.bf16.msra.mxu1 %v1272_v14 }
 0x540   : > { %1922 = vmatprep.subr.bf16.mxu1 %v2396_v17 }
 0x547   : > { %v2100_v15 = vpop.eup %2099 }
 0x548   : > { %v1112_v16 = vmul.f32 %v2100_v15, %v2092_v59 }
 0x54a   : > { %v1116_v18 = vpack.c.bf16 %v1112_v16, %v1112_v16 }
 0x54c   : > { %1911 = vmatmul.mubr.msk.bf16.vlgmr.msra.gmra.mxu1 %vm874_vm2, %v1116_v18 }
 0x54d   : > { %1926 = vmatprep.mubr.msk.bf16.mxu1 %vm2397_vm1, %v2396_v17  ;;  %1923 = vmatpush3.bf16.msra.mxu1 %v2075_v61 }
 0x54e   : > { %1924 = vmatprep.subr.bf16.mxu1 %v2396_v17 }
 0x5c8   : > { %v1161_v19 = vpop.f32.mrf.mxu0 }
 0x5ca   : > { %v1894_v21 = vpop.f32.mrf.mxu0 }
 0x5cc   : > { %v1164_v22 = vpop.f32.mrf.mxu0 }
 0x5ce   : > { %v1895_v23 = vpop.f32.mrf.mxu0 }
 0x5d2   : > { %v1259_v24 = vpop.f32.mrf.mxu0 }
 0x5d3   : > { %v1210_v25 = vpop.f32.mrf.mxu1  ;;  %1319 = vrot.lane.b32.xlu1 %v1259_v24, %s2402_s23  ;;  %s2845_s23 = scalar_lea.hbm %s2951_s2, %s1814_s15 }
 0x5d4   : > { %1315 = vrot.lane.b32.xlu0 %v1210_v25, %s2403_s28  ;;  %v1906_v26 = vpop.f32.mrf.mxu0  ;;  %v1807_v25 = vld [vmem:[%s2950_s17] ss:$0 sm:$0xff]  ;;  %s1593_s28 = scalar_lea.sflag [#allocation4], %s2657_s9 }
 0x5d5   : > { %v1900_v27 = vpop.f32.mrf.mxu1 }
 0x5d6   : > { %v1262_v28 = vpop.f32.mrf.mxu0 }
 0x5d7   : > { %v1213_v29 = vpop.f32.mrf.mxu1 }
 0x5d8   : > { %v1907_v30 = vpop.f32.mrf.mxu0 }
 0x5d9   : > { %v1901_v32 = vpop.f32.mrf.mxu1 }
 0x60c   : > { %v1308_v34 = vpop.f32.mrf.mxu1 }
 0x60d   : > { %1323 = vrot.lane.b32.xlu0 %v1308_v34, %s2404_s0  ;;  %s2297_s0 = scalar_lea.vmem %s2296_s27, 128 }
 0x60e   : > { %v1912_v35 = vpop.f32.mrf.mxu1  ;;  %p2299_p11 = scmp.lt.s32.totalorder %s2297_s0, %s2291_s19 }
 0x610   : > { %v1311_v36 = vpop.f32.mrf.mxu1  ;;  %p2300_p12 = por %p2299_p11, %p2298_p10 }
 0x612   : > { %v1913_v37 = vpop.f32.mrf.mxu1  ;;  %p2301_p2 = pnand %p2300_p12, %p2294_p9 }
 0x645   : > { %v1320_v40 = vpop.permute.xlu1 %1319 }
 0x646   : > { %v1316_v38 = vpop.permute.xlu0 %1315 }
 0x647   : > { %v1326_v39 = vsel %vm874_vm2, %v1161_v19, %v1316_v38 }
 0x648   : > { %v1328_v41 = vsel %vm1327_vm5, %v1326_v39, %v1320_v40 }
 0x67f   : > { %v1324_v42 = vpop.permute.xlu0 %1323 }
 0x680   : > { %v1330_v43 = vsel %vm1329_vm6, %v1328_v41, %v1324_v42 }
 0x681   : > { %v1331_v44 = vpack.c.bf16 %v1330_v43, %v1330_v43 }
 0x683   : > { %1919 = vmatmul.mubr.msk.bf16.vlgmr.msra.gmra.mxu0 %vm660_vm0, %v1331_v44 }
 0x684   : > { %1938 = vmatprep.mubr.msk.bf16.mxu0 %vm2397_vm1, %v2396_v17  ;;  %1931 = vmatpush3.bf16.msra.mxu0 %v2077_v5 }
 0x685   : > { %1932 = vmatprep.subr.bf16.mxu0 %v2396_v17 }
 0x688   : > { %1933 = vmatpush3.bf16.msra.mxu0 %v2078_v6 }
 0x689   : > { %1934 = vmatprep.subr.bf16.mxu0 %v2396_v17 }
 0x68c   : > { %1935 = vmatpush3.bf16.msra.mxu0 %v2079_v7 }
 0x68d   : > { %1936 = vmatprep.subr.bf16.mxu0 %v2396_v17 }
 0x690   : > { %1937 = vmatpush3.bf16.msra.mxu0 %v2080_v8 }
 0x743   : > { %v1392_v46 = vpop.f32.mrf.mxu0 }
 0x744   : > { %v1393_v47 = vadd.f32 %v1797_v45, %v1392_v46 }
 0x745   : > { %v1920_v48 = vpop.f32.mrf.mxu0 }
 0x746   : > { %v1398_v50 = vadd.f32 %v1393_v47, %v2704_v31  ;;  %v2076_v31 = vld [vmem:[%s2899_s12] sm:$0xff]  }
 0x747   : > { %v1395_v51 = vpop.f32.mrf.mxu0  ;;  %1925 = vmatpush3.bf16.msra.mxu1 %v2076_v31 }
 0x748   : > { %v1401_v52 = vsel %vm660_vm0, %v1398_v50, 0.0 }
 0x749   : > { %1402 = vadd.xlane.f32.xlu1 %v1401_v52  ;;  %v1921_v53 = vpop.f32.mrf.mxu0 }
 0x7d2   : > { %v1403_v54 = vpop.xlane.xlu1 %1402 }
 0x7d3   : > { %v1404_v55 = vmul.f32 0.03125, %v1403_v54 }
 0x7d5   : > { %v1405_v56 = vsub.f32 %v1398_v50, %v1404_v55 }
 0x7d7   : > { %v1406_v59 = vmul.f32 %v1405_v56, %v1405_v56 }
 0x7d9   : > { %v1407_v60 = vsel %vm660_vm0, %v1406_v59, 0.0 }
 0x7da   : > { %1408 = vadd.xlane.f32.xlu0 %v1407_v60 }
 0x863   : > { %v1409_v62 = vpop.xlane.xlu0 %1408 }
 0x864   : > { %v1410_v0 = vmul.f32 0.03125, %v1409_v62 }
 0x866   : > { %v1411_v57 = vadd.f32 1e-06, %v1410_v0 }
 0x868   : > { %2101 = vrsqrt.f32 %v1411_v57 }
 0x875   : > { %v2102_v58 = vpop.eup %2101 }
 0x876   : > { %v1413_v1 = vmul.f32 %v2102_v58, %v1405_v56 }
 0x878   : > { %v1420_v3 = vmul.f32 %v1801_v49, %v1413_v1 }
 0x87a   : > { %v1427_v4 = vadd.f32 %v1802_v2, %v1420_v3 }
 0x87c   : > { %v1428_v63 = vpack.c.bf16 %v1427_v4, %v1427_v4 }
 0x87e   : > { %1927 = vmatmul.mubr.msk.bf16.vlgmr.msra.gmra.mxu1 %vm660_vm0, %v1428_v63 }
 0x93e   : > { %v1489_v10 = vpop.f32.mrf.mxu1 }
 0x93f   : > { %v1490_v11 = vadd.f32 %v1803_v9, %v1489_v10 }
 0x940   : > { %v1928_v12 = vpop.f32.mrf.mxu1 }
 0x941   : > { %v1496_v13 = vmul.f32 0.044715, %v1490_v11  ;;  %v1495_v17 = vmul.f32 0.5, %v1490_v11 }
 0x942   : > { %v1492_v14 = vpop.f32.mrf.mxu1 }
 0x943   : > { %v1497_v15 = vmul.f32 %v1496_v13, %v1490_v11 }
 0x944   : > { %v1929_v16 = vpop.f32.mrf.mxu1 }
 0x945   : > { %v1498_v18 = vmul.f32 %v1497_v15, %v1490_v11 }
 0x947   : > { %v1499_v19 = vadd.f32 %v1498_v18, %v1490_v11 }
 0x949   : > { %v1500_v20 = vmul.f32 0.7978846, %v1499_v19 }
 0x94b   : > { %2103 = vtanh.f32 %v1500_v20 }
 0x958   : > { %v2104_v21 = vpop.eup %2103 }
 0x959   : > { %v1502_v22 = vadd.f32 1.0, %v2104_v21 }
 0x95b   : > { %v1503_v23 = vmul.f32 %v1502_v22, %v1495_v17 }
 0x95d   : > { %v1504_v24 = vpack.c.bf16 %v1503_v23, %v1503_v23 }
 0x95f   : > { %1939 = vmatmul.mubr.msk.bf16.vlgmr.msra.gmra.mxu0 %vm1544_vm7, %v1504_v24 }
 0xa1f   : > { %v1582_v26 = vpop.f32.mrf.mxu0 }
 0xa20   : > { %v1583_v27 = vadd.f32 %v1807_v25, %v1582_v26 }
 0xa21   : > { %v1940_v28 = vpop.f32.mrf.mxu0 }
 0xa22   : > { %v1588_v29 = vadd.f32 %v1583_v27, %v1427_v4 }
 0xa23   : > { %v1585_v30 = vpop.f32.mrf.mxu0 }
 0xa24   : > { %v1589_v32 = vpack.c.bf16 %v1588_v29, %v1588_v29 }
 0xa25   : > { %v1941_v33 = vpop.f32.mrf.mxu0 }
 0xa26   : > { %1591 = vst.msk [vmem:[%s652_s18] sm:$0xf] %vm1590_vm8, %v1589_v32 }
 0xa27   : > { %2304 = shalt.err (!%p2301_p2)
}
 0xa28   : > { %s2305_s29 = scalar_lea.hbm %s2845_s23, 64  ;;  %s2309_s16 = scalar_lea.hbm %s2951_s2, 128 }
 0xa29   : > { %p2306_p7 = scmp.ne.s32.totalorder %s2845_s23, %s2305_s29  ;;  %p2310_p13 = scmp.lt.s32.totalorder %s2845_s23, %s2951_s2 }
 0xa2a   : > { %p2311_p5 = scmp.lt.s32.totalorder %s2309_s16, %s2305_s29 }
 0xa2b   : > { %p2307_p1 = pnand %p2306_p7, %p2612_p4 }
 0xa2c   : > { %p2312_p6 = por %p2311_p5, %p2310_p13 }
 0xa2d   : > { %p2308_p3 = pneg %p2307_p1 }
 0xa2f   : > { %p2313_p8 = pnand %p2312_p6, %p2308_p3 }
 0xa31   : > { %2316 = shalt.err (!%p2313_p8)
}
 0xa32   : > { %1966 = dma.vmem_to_hbm [thread:$0]  (%p2612_p4), %s1608_s5, 64, %s2845_s23, %s1593_s28  }
 0xa33 PF: > { %s1619_s15 = sand.u32 1, %s2367_s21   ;;  %p2953_p9 = scmp.ge.s32.totalorder %s2387_s26, 2 }
 0xa34   : > { %s1620_s18 = scalar_lea.sflag [#allocation4], %s1619_s15 }
 0xa35   : > { %p1992_p10 = pnand %p2953_p9, %p2620_p0 }
 0xa37   : > { %p1993_p11 = pneg %p1992_p10 }
 0xa39   : > { %2362 = dma.done.wait (%p1993_p11), %s1620_s18, 64  }
 0xa3a   : > { %2364 = vsyncadd (%p1993_p11), %s1620_s18, 4294967232  ;;  %s37_s26 = sadd.s32 1, %s2387_s26   ;;  %s2954_s3 = sld [smem:[#allocation21_spill]] }
 0xa3b   : > { %p34_p12 = scmp.ge.s32.totalorder %s37_s26, 4   ;;  %s2955_s23 = sld [smem:[#allocation25_spill]] }
 0xa3c   : > { %s2956_s24 = sld [smem:[#allocation23_spill]]  ;;  %s2958_s21 = smov %s2371_s22 }
 0xa3d   : > { %s2957_s25 = sld [smem:[#allocation24_spill]]  ;;  %36 = sbr.rel (!%p34_p12) target bundleno = 20 (0x14), region = 162 }
 0xa40   : > { %s2959_s22 = smov %s2954_s3 }
 0xa42   :  { %1625 = vsyncpa [#allocation3], 1 }
 0xa43   :  { %1627 = vsyncpa [#allocation3 + $0x1], 1 }
 0xa44   :  { %1628 = vsyncpa [#allocation6], 1 }
 0xa45   :  { %1630 = vsyncpa [#allocation6 + $0x1], 1 }
 0xa46   :  { %1631 = vsyncpa [#allocation9], 1 }
 0xa47   :  { %1632 = vsyncpa [#allocation12], 1 }
 0xa48   :  { %1633 = vsyncpa [#allocation4], 1 }
 0xa49   :  { %1635 = vsyncpa [#allocation4 + $0x1], 1 }

</bundles_post_ra>
